<compile_context>
chip_gen: v6e
topology: v6e:2x2x1
jax: 0.10.0
libtpu: 0.0.40
codegen_flags: <defaults>
</compile_context>

<pallas_src>
import functools

import jax
import jax.numpy as jnp
import numpy as np
from jax.experimental import pallas as pl
from jax.experimental.pallas import tpu as pltpu

C_IN = 128 * 3 + 128   # 512
C_H = 512
C_OUT = 1024
BN_EPS = 1e-5


def _transform_kernel(x_ref,
                      w1_ref, g1_ref, be1_ref,
                      w2_ref, g2_ref, be2_ref,
                      w3_ref, g3_ref, be3_ref,
                      w4_ref, b4_ref,
                      o_ref, *, B, L):
    n_rows = B * L
    inv_n = jnp.float32(1.0 / n_rows)

    def conv_bn_relu(h_bf16, w_ref, g_ref, be_ref):
        # 1x1 Conv1d == per-position channel matmul (bf16 operands, f32 acc).
        # The conv bias is dropped: it cancels under training-mode BatchNorm.
        z = jnp.dot(h_bf16, w_ref[...], preferred_element_type=jnp.float32)
        # Centered batch statistics (biased variance, matching PyTorch training
        # BN).  z is already resident, so the centered second pass is one extra
        # cheap elementwise sweep and avoids E[z^2]-E[z]^2 cancellation.
        mu = jnp.sum(z, axis=0, keepdims=True) * inv_n
        zc = z - mu
        var = jnp.sum(zc * zc, axis=0, keepdims=True) * inv_n
        # Fold BN into one per-channel scale: zn = zc*a + beta   (fp32 VPU).
        a = g_ref[...] * jax.lax.rsqrt(var + BN_EPS)
        return jnp.maximum(zc * a + be_ref[...], 0.0)  # ReLU

    h = conv_bn_relu(x_ref[...], w1_ref, g1_ref, be1_ref)                  # (B*L, 512) f32
    h = conv_bn_relu(h.astype(jnp.bfloat16), w2_ref, g2_ref, be2_ref)
    h = conv_bn_relu(h.astype(jnp.bfloat16), w3_ref, g3_ref, be3_ref)

    # conv4: matmul + bias (no BN / ReLU).
    z = jnp.dot(h.astype(jnp.bfloat16), w4_ref[...],
                preferred_element_type=jnp.float32) + b4_ref[...]          # (B*L, 1024)

    # MaxPool1d over the full length, then flatten -> (B, C_OUT).
    # L % 8 == 0 is asserted in the wrapper so this reshape stays tile-aligned.
    o_ref[...] = jnp.max(z.reshape(B, L, C_OUT), axis=1)


def _full_spec(shape):
    n = len(shape)
    return pl.BlockSpec(shape, lambda: (0,) * n)  # no grid -> block (0,...,0)


def prepare_params(params):
    """One-time conversion of the fp32 PyTorch-style params into the
    kernel-resident form.  Hoisted out of the forward path (perf review #1):
    the bf16 weight casts run once here and the bf16 copies stay on device, so
    per-call HBM traffic is just the ~2.5 MB bf16 weight read + activations."""
    (w1, _b1, g1, be1,
     w2, _b2, g2, be2,
     w3, _b3, g3, be3,
     w4, b4) = params
    prepared = (w1.astype(jnp.bfloat16), g1, be1,
                w2.astype(jnp.bfloat16), g2, be2,
                w3.astype(jnp.bfloat16), g3, be3,
                w4.astype(jnp.bfloat16), b4)
    # Force materialization now so no cast ever runs inside the hot path.
    return jax.block_until_ready(prepared)


@jax.jit
def transform_forward(x_ncl, prepared):
    """x_ncl: (B, C_IN, L) float32, PyTorch Conv1d (NCL) layout.
    prepared: output of prepare_params() (device-resident bf16 weights)."""
    B, Cin, L = x_ncl.shape
    assert Cin == C_IN
    # Keep the final maxpool reshape sublane-aligned (f32 sublane = 8); for
    # arbitrary L the reduce would need to be restructured as a running max.
    assert L % 8 == 0, "L must be a multiple of 8 for the fused maxpool reshape"

    # NCL -> (B*L, C) channels-last, fused (under jit) with the bf16 downcast
    # so the layout change rides the dtype conversion in a single HBM pass.
    x2d = jnp.transpose(x_ncl, (0, 2, 1)).reshape(B * L, C_IN).astype(jnp.bfloat16)

    args = (x2d,) + tuple(prepared)
    kernel = functools.partial(_transform_kernel, B=B, L=L)

    out = pl.pallas_call(
        kernel,
        out_shape=jax.ShapeDtypeStruct((B, C_OUT), jnp.float32),
        in_specs=[_full_spec(a.shape) for a in args],
        out_specs=_full_spec((B, C_OUT)),
        compiler_params=pltpu.CompilerParams(vmem_limit_bytes=32 << 20),
    )(*args)
    return out


def init_params(key):
    """Deterministic init mirroring PyTorch default Conv1d init.

    Conv1d weight (C_out, C_in, 1) stored transposed as (C_in, C_out) so the
    kernel computes h @ W.  BatchNorm gamma=1, beta=0 (PyTorch defaults).
    Biases b1/b2/b3 are generated (the fp32 reference uses them) but the kernel
    drops them since they cancel under training-mode BatchNorm."""
    def conv_init(key, cin, cout):
        kw, kb = jax.random.split(key)
        bound = 1.0 / np.sqrt(cin)
        w = jax.random.uniform(kw, (cin, cout), jnp.float32, -bound, bound)
        b = jax.random.uniform(kb, (1, cout), jnp.float32, -bound, bound)
        return w, b

    k1, k2, k3, k4 = jax.random.split(key, 4)
    w1, b1 = conv_init(k1, C_IN, C_H)
    w2, b2 = conv_init(k2, C_H, C_H)
    w3, b3 = conv_init(k3, C_H, C_H)
    w4, b4 = conv_init(k4, C_H, C_OUT)

    g1 = jnp.ones((1, C_H), jnp.float32); be1 = jnp.zeros((1, C_H), jnp.float32)
    g2 = jnp.ones((1, C_H), jnp.float32); be2 = jnp.zeros((1, C_H), jnp.float32)
    g3 = jnp.ones((1, C_H), jnp.float32); be3 = jnp.zeros((1, C_H), jnp.float32)

    return (w1, b1, g1, be1,
            w2, b2, g2, be2,
            w3, b3, g3, be3,
            w4, b4)


def transform_reference(x_ncl, params):
    """Pure-JAX fp32 reference of the PyTorch forward (training-mode BN, with
    conv biases) — semantics check for the bf16 kernel."""
    (w1, b1, g1, be1,
     w2, b2, g2, be2,
     w3, b3, g3, be3,
     w4, b4) = params
    x = jnp.transpose(x_ncl, (0, 2, 1))
    B, L, _ = x.shape
    h = x.reshape(B * L, -1)

    def block(h, w, b, g, be):
        z = h @ w + b
        mu = jnp.mean(z, axis=0, keepdims=True)
        var = jnp.mean((z - mu) ** 2, axis=0, keepdims=True)
        z = (z - mu) / jnp.sqrt(var + BN_EPS) * g + be
        return jnp.maximum(z, 0.0)

    h = block(h, w1, b1, g1, be1)
    h = block(h, w2, b2, g2, be2)
    h = block(h, w3, b3, g3, be3)
    z = h @ w4 + b4
    return jnp.max(z.reshape(B, L, -1), axis=1)


if __name__ == "__main__":
    key = jax.random.PRNGKey(0)
    kx, kp = jax.random.split(key)

    B, L = 2, 8
    x = jax.random.normal(kx, (B, C_IN, L), jnp.float32)  # PyTorch NCL layout
    params = init_params(kp)

    # One-time weight prep (bf16 casts hoisted out of the forward path).
    prepared = prepare_params(params)

    out = transform_forward(x, prepared)
    out = jax.block_until_ready(out)

    ref = transform_reference(x, params)
    # bf16 matmul operands vs fp32 reference => loosened tolerance.
    np.testing.assert_allclose(np.asarray(out), np.asarray(ref), rtol=5e-2, atol=8e-2)
    assert out.shape == (B, C_OUT)

    print("KERNEL_OK")
</pallas_src>

<mosaic_0001>
module attributes {stable_mosaic.version = 11 : i64} {
  func.func @_transform_kernel(%arg0: memref<16x512xbf16, #tpu.memory_space<vmem>>, %arg1: memref<512x512xbf16, #tpu.memory_space<vmem>>, %arg2: memref<1x512xf32, #tpu.memory_space<vmem>>, %arg3: memref<1x512xf32, #tpu.memory_space<vmem>>, %arg4: memref<512x512xbf16, #tpu.memory_space<vmem>>, %arg5: memref<1x512xf32, #tpu.memory_space<vmem>>, %arg6: memref<1x512xf32, #tpu.memory_space<vmem>>, %arg7: memref<512x512xbf16, #tpu.memory_space<vmem>>, %arg8: memref<1x512xf32, #tpu.memory_space<vmem>>, %arg9: memref<1x512xf32, #tpu.memory_space<vmem>>, %arg10: memref<512x1024xbf16, #tpu.memory_space<vmem>>, %arg11: memref<1x1024xf32, #tpu.memory_space<vmem>>, %arg12: memref<2x1024xf32, #tpu.memory_space<vmem>>) attributes {dimension_semantics = [], scalar_prefetch = 0 : i64, scratch_operands = 0 : i64, tpu.core_type = #tpu.core_type<tc>} {
    %c0 = arith.constant 0 : index
    %c0_0 = arith.constant 0 : index
    %0 = vector.load %arg0[%c0, %c0_0] : memref<16x512xbf16, #tpu.memory_space<vmem>>, vector<16x512xbf16>
    %c0_1 = arith.constant 0 : index
    %c0_2 = arith.constant 0 : index
    %1 = vector.load %arg1[%c0_1, %c0_2] : memref<512x512xbf16, #tpu.memory_space<vmem>>, vector<512x512xbf16>
    %cst = arith.constant dense<0.000000e+00> : vector<16x512xf32>
    %2 = tpu.matmul %0, %1, %cst {dimension_numbers = #tpu.dot_dimension_numbers<[1], [0], [0], [1], [0, 0, 1, 1], [], []>} : vector<16x512xbf16>, vector<512x512xbf16>, vector<16x512xf32> -> vector<16x512xf32>
    %cst_3 = arith.constant dense<0.000000e+00> : vector<512xf32>
    %3 = vector.multi_reduction <add>, %2, %cst_3 [0] : vector<16x512xf32> to vector<512xf32>
    %4 = vector.shape_cast %3 : vector<512xf32> to vector<1x512xf32>
    %cst_4 = arith.constant 6.250000e-02 : f32
    %5 = vector.broadcast %cst_4 : f32 to vector<1x512xf32>
    %6 = arith.mulf %4, %5 : vector<1x512xf32>
    %7 = vector.broadcast %6 : vector<1x512xf32> to vector<16x512xf32>
    %8 = arith.subf %2, %7 : vector<16x512xf32>
    %9 = arith.mulf %8, %8 : vector<16x512xf32>
    %cst_5 = arith.constant dense<0.000000e+00> : vector<512xf32>
    %10 = vector.multi_reduction <add>, %9, %cst_5 [0] : vector<16x512xf32> to vector<512xf32>
    %11 = vector.shape_cast %10 : vector<512xf32> to vector<1x512xf32>
    %cst_6 = arith.constant 6.250000e-02 : f32
    %12 = vector.broadcast %cst_6 : f32 to vector<1x512xf32>
    %13 = arith.mulf %11, %12 : vector<1x512xf32>
    %c0_7 = arith.constant 0 : index
    %c0_8 = arith.constant 0 : index
    %14 = vector.load %arg2[%c0_7, %c0_8] : memref<1x512xf32, #tpu.memory_space<vmem>>, vector<1x512xf32>
    %cst_9 = arith.constant 9.99999974E-6 : f32
    %15 = vector.broadcast %cst_9 : f32 to vector<1x512xf32>
    %16 = arith.addf %13, %15 : vector<1x512xf32>
    %17 = math.rsqrt %16 : vector<1x512xf32>
    %18 = arith.mulf %14, %17 : vector<1x512xf32>
    %19 = vector.broadcast %18 : vector<1x512xf32> to vector<16x512xf32>
    %20 = arith.mulf %8, %19 : vector<16x512xf32>
    %c0_10 = arith.constant 0 : index
    %c0_11 = arith.constant 0 : index
    %21 = vector.load %arg3[%c0_10, %c0_11] : memref<1x512xf32, #tpu.memory_space<vmem>>, vector<1x512xf32>
    %22 = vector.broadcast %21 : vector<1x512xf32> to vector<16x512xf32>
    %23 = arith.addf %20, %22 : vector<16x512xf32>
    %cst_12 = arith.constant 0.000000e+00 : f32
    %24 = vector.broadcast %cst_12 : f32 to vector<16x512xf32>
    %25 = arith.maximumf %23, %24 : vector<16x512xf32>
    %26 = arith.truncf %25 : vector<16x512xf32> to vector<16x512xbf16>
    %c0_13 = arith.constant 0 : index
    %c0_14 = arith.constant 0 : index
    %27 = vector.load %arg4[%c0_13, %c0_14] : memref<512x512xbf16, #tpu.memory_space<vmem>>, vector<512x512xbf16>
    %cst_15 = arith.constant dense<0.000000e+00> : vector<16x512xf32>
    %28 = tpu.matmul %26, %27, %cst_15 {dimension_numbers = #tpu.dot_dimension_numbers<[1], [0], [0], [1], [0, 0, 1, 1], [], []>} : vector<16x512xbf16>, vector<512x512xbf16>, vector<16x512xf32> -> vector<16x512xf32>
    %cst_16 = arith.constant dense<0.000000e+00> : vector<512xf32>
    %29 = vector.multi_reduction <add>, %28, %cst_16 [0] : vector<16x512xf32> to vector<512xf32>
    %30 = vector.shape_cast %29 : vector<512xf32> to vector<1x512xf32>
    %cst_17 = arith.constant 6.250000e-02 : f32
    %31 = vector.broadcast %cst_17 : f32 to vector<1x512xf32>
    %32 = arith.mulf %30, %31 : vector<1x512xf32>
    %33 = vector.broadcast %32 : vector<1x512xf32> to vector<16x512xf32>
    %34 = arith.subf %28, %33 : vector<16x512xf32>
    %35 = arith.mulf %34, %34 : vector<16x512xf32>
    %cst_18 = arith.constant dense<0.000000e+00> : vector<512xf32>
    %36 = vector.multi_reduction <add>, %35, %cst_18 [0] : vector<16x512xf32> to vector<512xf32>
    %37 = vector.shape_cast %36 : vector<512xf32> to vector<1x512xf32>
    %cst_19 = arith.constant 6.250000e-02 : f32
    %38 = vector.broadcast %cst_19 : f32 to vector<1x512xf32>
    %39 = arith.mulf %37, %38 : vector<1x512xf32>
    %c0_20 = arith.constant 0 : index
    %c0_21 = arith.constant 0 : index
    %40 = vector.load %arg5[%c0_20, %c0_21] : memref<1x512xf32, #tpu.memory_space<vmem>>, vector<1x512xf32>
    %cst_22 = arith.constant 9.99999974E-6 : f32
    %41 = vector.broadcast %cst_22 : f32 to vector<1x512xf32>
    %42 = arith.addf %39, %41 : vector<1x512xf32>
    %43 = math.rsqrt %42 : vector<1x512xf32>
    %44 = arith.mulf %40, %43 : vector<1x512xf32>
    %45 = vector.broadcast %44 : vector<1x512xf32> to vector<16x512xf32>
    %46 = arith.mulf %34, %45 : vector<16x512xf32>
    %c0_23 = arith.constant 0 : index
    %c0_24 = arith.constant 0 : index
    %47 = vector.load %arg6[%c0_23, %c0_24] : memref<1x512xf32, #tpu.memory_space<vmem>>, vector<1x512xf32>
    %48 = vector.broadcast %47 : vector<1x512xf32> to vector<16x512xf32>
    %49 = arith.addf %46, %48 : vector<16x512xf32>
    %cst_25 = arith.constant 0.000000e+00 : f32
    %50 = vector.broadcast %cst_25 : f32 to vector<16x512xf32>
    %51 = arith.maximumf %49, %50 : vector<16x512xf32>
    %52 = arith.truncf %51 : vector<16x512xf32> to vector<16x512xbf16>
    %c0_26 = arith.constant 0 : index
    %c0_27 = arith.constant 0 : index
    %53 = vector.load %arg7[%c0_26, %c0_27] : memref<512x512xbf16, #tpu.memory_space<vmem>>, vector<512x512xbf16>
    %cst_28 = arith.constant dense<0.000000e+00> : vector<16x512xf32>
    %54 = tpu.matmul %52, %53, %cst_28 {dimension_numbers = #tpu.dot_dimension_numbers<[1], [0], [0], [1], [0, 0, 1, 1], [], []>} : vector<16x512xbf16>, vector<512x512xbf16>, vector<16x512xf32> -> vector<16x512xf32>
    %cst_29 = arith.constant dense<0.000000e+00> : vector<512xf32>
    %55 = vector.multi_reduction <add>, %54, %cst_29 [0] : vector<16x512xf32> to vector<512xf32>
    %56 = vector.shape_cast %55 : vector<512xf32> to vector<1x512xf32>
    %cst_30 = arith.constant 6.250000e-02 : f32
    %57 = vector.broadcast %cst_30 : f32 to vector<1x512xf32>
    %58 = arith.mulf %56, %57 : vector<1x512xf32>
    %59 = vector.broadcast %58 : vector<1x512xf32> to vector<16x512xf32>
    %60 = arith.subf %54, %59 : vector<16x512xf32>
    %61 = arith.mulf %60, %60 : vector<16x512xf32>
    %cst_31 = arith.constant dense<0.000000e+00> : vector<512xf32>
    %62 = vector.multi_reduction <add>, %61, %cst_31 [0] : vector<16x512xf32> to vector<512xf32>
    %63 = vector.shape_cast %62 : vector<512xf32> to vector<1x512xf32>
    %cst_32 = arith.constant 6.250000e-02 : f32
    %64 = vector.broadcast %cst_32 : f32 to vector<1x512xf32>
    %65 = arith.mulf %63, %64 : vector<1x512xf32>
    %c0_33 = arith.constant 0 : index
    %c0_34 = arith.constant 0 : index
    %66 = vector.load %arg8[%c0_33, %c0_34] : memref<1x512xf32, #tpu.memory_space<vmem>>, vector<1x512xf32>
    %cst_35 = arith.constant 9.99999974E-6 : f32
    %67 = vector.broadcast %cst_35 : f32 to vector<1x512xf32>
    %68 = arith.addf %65, %67 : vector<1x512xf32>
    %69 = math.rsqrt %68 : vector<1x512xf32>
    %70 = arith.mulf %66, %69 : vector<1x512xf32>
    %71 = vector.broadcast %70 : vector<1x512xf32> to vector<16x512xf32>
    %72 = arith.mulf %60, %71 : vector<16x512xf32>
    %c0_36 = arith.constant 0 : index
    %c0_37 = arith.constant 0 : index
    %73 = vector.load %arg9[%c0_36, %c0_37] : memref<1x512xf32, #tpu.memory_space<vmem>>, vector<1x512xf32>
    %74 = vector.broadcast %73 : vector<1x512xf32> to vector<16x512xf32>
    %75 = arith.addf %72, %74 : vector<16x512xf32>
    %cst_38 = arith.constant 0.000000e+00 : f32
    %76 = vector.broadcast %cst_38 : f32 to vector<16x512xf32>
    %77 = arith.maximumf %75, %76 : vector<16x512xf32>
    %78 = arith.truncf %77 : vector<16x512xf32> to vector<16x512xbf16>
    %c0_39 = arith.constant 0 : index
    %c0_40 = arith.constant 0 : index
    %79 = vector.load %arg10[%c0_39, %c0_40] : memref<512x1024xbf16, #tpu.memory_space<vmem>>, vector<512x1024xbf16>
    %cst_41 = arith.constant dense<0.000000e+00> : vector<16x1024xf32>
    %80 = tpu.matmul %78, %79, %cst_41 {dimension_numbers = #tpu.dot_dimension_numbers<[1], [0], [0], [1], [0, 0, 1, 1], [], []>} : vector<16x512xbf16>, vector<512x1024xbf16>, vector<16x1024xf32> -> vector<16x1024xf32>
    %c0_42 = arith.constant 0 : index
    %c0_43 = arith.constant 0 : index
    %81 = vector.load %arg11[%c0_42, %c0_43] : memref<1x1024xf32, #tpu.memory_space<vmem>>, vector<1x1024xf32>
    %82 = vector.broadcast %81 : vector<1x1024xf32> to vector<16x1024xf32>
    %83 = arith.addf %80, %82 : vector<16x1024xf32>
    %84 = vector.shape_cast %83 : vector<16x1024xf32> to vector<2x8x1024xf32>
    %cst_44 = arith.constant dense<0xFF800000> : vector<2x1024xf32>
    %85 = vector.multi_reduction <maximumf>, %84, %cst_44 [1] : vector<2x8x1024xf32> to vector<2x1024xf32>
    %c0_45 = arith.constant 0 : index
    %c0_46 = arith.constant 0 : index
    %86 = vector.load %arg12[%c0_45, %c0_46] : memref<2x1024xf32, #tpu.memory_space<vmem>>, vector<2x1024xf32>
    tpu.vector_store %arg12[%c0_45, %c0_46], %85 {strides = array<i32>} : memref<2x1024xf32, #tpu.memory_space<vmem>>, vector<2x1024xf32>,
    return
  }
}

</mosaic_0001>

<bundles_post_ra>
// kernel: transform_forward.1
= control target key start
LH: loop header
LB: loop body
LE: loop exit
PB: predicated region body
PF: predicated region fallthrough
CT: control target
= control target key end

     0   :  { %17 = vsyncpa [#allocation3], 0  ;;  %s7404_s0 = inlined_call_operand.vmem [shape: bf16[16,512], index: 0, kind: input, shape index: {}]   ;;  %s7405_s1 = inlined_call_operand.hbm [shape: bf16[512,512], index: 1, kind: input, shape index: {}]   ;;  %s7406_s2 = inlined_call_operand.vmem [shape: f32[1,512], index: 2, kind: input, shape index: {}]   ;;  %s7407_s3 = inlined_call_operand.vmem [shape: f32[1,512], index: 3, kind: input, shape index: {}]   ;;  %s7408_s4 = inlined_call_operand.hbm [shape: bf16[512,512], index: 4, kind: input, shape index: {}]   ;;  %s7409_s5 = inlined_call_operand.vmem [shape: f32[1,512], index: 5, kind: input, shape index: {}]   ;;  %s7410_s6 = inlined_call_operand.vmem [shape: f32[1,512], index: 6, kind: input, shape index: {}]   ;;  %s7411_s7 = inlined_call_operand.hbm [shape: bf16[512,512], index: 7, kind: input, shape index: {}]   ;;  %s7412_s8 = inlined_call_operand.vmem [shape: f32[1,512], index: 8, kind: input, shape index: {}]   ;;  %s7413_s9 = inlined_call_operand.vmem [shape: f32[1,512], index: 9, kind: input, shape index: {}]   ;;  %s7414_s10 = inlined_call_operand.hbm [shape: bf16[512,1024], index: 10, kind: input, shape index: {}]   ;;  %s7415_s11 = inlined_call_operand.vmem [shape: f32[1,1024], index: 11, kind: input, shape index: {}]   ;;  %s7416_s12 = inlined_call_operand.hbm [shape: f32[2,1024], index: 12, kind: output, shape index: {}]  }
   0x1   :  { %18 = vsyncpa [#allocation6], 0 }
   0x2   :  { %19 = vsyncpa [#allocation9], 0 }
   0x3   :  { %20 = vsyncpa [#allocation4], 0  ;;  %s7023_s21 = smov [#allocation5]   ;;  %s7024_s23 = smov [#allocation2]  }
   0x4   :  { %s44_s22 = sshll.u32 %s7023_s21, 4  ;;  %s28_s24 = sshll.u32 %s7024_s23, 4  ;;  %s45_s22 = int_to_ptr.vmem [resolvable:$true] %s44_s22  ;;  %s29_s24 = int_to_ptr.vmem [resolvable:$true] %s28_s24 }
   0x5   :  { %s6923_s25 = scalar_lea.vmem %s45_s22, 16384  ;;  %p6928_p1 = scmp.lt.s32.totalorder %s45_s22, %s45_s22 }
   0x6   :  { %p6924_p0 = scmp.ne.s32.totalorder %s45_s22, %s6923_s25  ;;  %p6929_p2 = scmp.lt.s32.totalorder %s6923_s25, %s6923_s25 }
   0x8   :  { %p6930_p3 = por %p6929_p2, %p6928_p1 }
   0xa   :  { %p6931_p4 = pnand %p6930_p3, %p6924_p0 }
   0xc   :  { %6934 = shalt.err (!%p6931_p4)
}
   0xd   :  { %s7025_s26 = smov 256   ;;  %s7026_s27 = smov 16  }
   0xe   :  { %50 = dma.hbm_to_vmem [thread:$0]  %s7408_s4, 16384, %s45_s22, [#allocation6], %s7025_s26, %s7025_s26, %s7026_s27  }
   0xf   :  { %s6943_s30 = scalar_lea.vmem %s29_s24, 16384  ;;  %p6948_p6 = scmp.lt.s32.totalorder %s29_s24, %s29_s24 }
  0x10   :  { %p6944_p5 = scmp.ne.s32.totalorder %s29_s24, %s6943_s30  ;;  %p6949_p7 = scmp.lt.s32.totalorder %s6943_s30, %s6943_s30 }
  0x12   :  { %p6950_p8 = por %p6949_p7, %p6948_p6 }
  0x14   :  { %p6951_p9 = pnand %p6950_p8, %p6944_p5 }
  0x16   :  { %6954 = shalt.err (!%p6951_p9)
}
  0x17   :  { %34 = dma.hbm_to_vmem [thread:$0]  %s7405_s1, 16384, %s29_s24, [#allocation3], %s7025_s26, %s7025_s26, %s7026_s27  }
  0x18   :  { %s7027_s15 = smov [#allocation7]   ;;  %s7028_s17 = smov [#allocation8]  }
  0x19   :  { %s60_s16 = sshll.u32 %s7027_s15, 4  ;;  %s76_s18 = sshll.u32 %s7028_s17, 4  ;;  %s61_s16 = int_to_ptr.vmem [resolvable:$true] %s60_s16  ;;  %s77_s18 = int_to_ptr.vmem [resolvable:$true] %s76_s18 }
  0x1a   :  { %s6963_s19 = scalar_lea.vmem %s61_s16, 16384  ;;  %p6968_p11 = scmp.lt.s32.totalorder %s61_s16, %s61_s16 }
  0x1b   :  { %p6964_p10 = scmp.ne.s32.totalorder %s61_s16, %s6963_s19  ;;  %p6969_p12 = scmp.lt.s32.totalorder %s6963_s19, %s6963_s19 }
  0x1d   :  { %p6970_p13 = por %p6969_p12, %p6968_p11 }
  0x1f   :  { %p6971_p0 = pnand %p6970_p13, %p6964_p10 }
  0x21   :  { %6974 = shalt.err (!%p6971_p0)
}
  0x22   :  { %66 = dma.hbm_to_vmem [thread:$0]  %s7411_s7, 16384, %s61_s16, [#allocation6], %s7025_s26, %s7025_s26, %s7026_s27  }
  0x23   :  { %s6983_s21 = scalar_lea.vmem %s77_s18, 32768  ;;  %p6988_p2 = scmp.lt.s32.totalorder %s77_s18, %s77_s18 }
  0x24   :  { %p6984_p1 = scmp.ne.s32.totalorder %s77_s18, %s6983_s21  ;;  %p6989_p3 = scmp.lt.s32.totalorder %s6983_s21, %s6983_s21 }
  0x26   :  { %p6990_p4 = por %p6989_p3, %p6988_p2 }
  0x28   :  { %p6991_p5 = pnand %p6990_p4, %p6984_p1 }
  0x2a   :  { %6994 = shalt.err (!%p6991_p5)
}
  0x2b   :  { %s7029_s1 = smov 512   ;;  %s7030_s22 = smov 32  }
  0x2c   :  { %82 = dma.hbm_to_vmem [thread:$0]  %s7414_s10, 32768, %s77_s18, [#allocation9], %s7029_s1, %s7029_s1, %s7030_s22  }
  0x2d   :  { %7015 = dma.done.wait [#allocation3], 16384  }
  0x2e   :  { %7016 = vsyncadd [#allocation3], 4294950912 }
  0x2f   :  { %7017 = dma.done.wait [#allocation6], 32768  }
  0x30   :  { %7018 = vsyncadd [#allocation6], 4294934528 }
  0x31   :  { %7019 = dma.done.wait [#allocation9], 32768  }
  0x32   :  { %7020 = vsyncadd [#allocation9], 4294934528  ;;  %v6309_v0 = vld [vmem:[#allocation2 + $0xe4] ss:$16 sps:$4 sm:$0xff]   ;;  %v6313_v2 = vld [vmem:[#allocation2 + $0xe0] ss:$16 sps:$4 sm:$0xff]  }
  0x33   :  { %v6311_v1 = vld [vmem:[#allocation2 + $0x2e4] ss:$16 sps:$4 sm:$0xff]   ;;  %889 = vmatprep.subr.bf16.mxu0 %v6309_v0  ;;  %v6314_v3 = vld [vmem:[#allocation2 + $0x2e0] ss:$16 sps:$4 sm:$0xff]   ;;  %v6410_v51 = vld [vmem:[%s7404_s0 + $0xc] ss:$16 sps:$4 sm:$0xff]  }
  0x34   :  { %932 = vmatprep.subr.bf16.mxu1 %v6311_v1  ;;  %v6315_v4 = vld [vmem:[#allocation2 + $0xc4] ss:$16 sps:$4 sm:$0xff]   ;;  %890 = vmatpush1.bf16.msra.mxu0 %v6313_v2  ;;  %v6319_v6 = vld [vmem:[#allocation2 + $0xc0] ss:$16 sps:$4 sm:$0xff]   ;;  %v6413_v2 = vld [vmem:[#allocation2 + $0xec] ss:$16 sps:$4 sm:$0xff]  }
  0x35   :  { %933 = vmatpush1.bf16.msra.mxu1 %v6314_v3  ;;  %v6317_v5 = vld [vmem:[#allocation2 + $0x2c4] ss:$16 sps:$4 sm:$0xff]   ;;  %891 = vmatprep.subr.bf16.mxu0 %v6315_v4  ;;  %v6320_v7 = vld [vmem:[#allocation2 + $0x2c0] ss:$16 sps:$4 sm:$0xff]   ;;  %v6416_v3 = vld [vmem:[#allocation2 + $0x2ec] ss:$16 sps:$4 sm:$0xff]  }
  0x36   :  { %934 = vmatprep.subr.bf16.mxu1 %v6317_v5  ;;  %v6321_v8 = vld [vmem:[#allocation2 + $0xa4] ss:$16 sps:$4 sm:$0xff]   ;;  %v6325_v10 = vld [vmem:[#allocation2 + $0xa0] ss:$16 sps:$4 sm:$0xff]   ;;  %964 = vmatprep.mubr.bf16.mxu1 %v6410_v51  ;;  %v7125_v5 = vld [vmem:[%s7404_s0 + $0x8] ss:$16 sps:$4 sm:$0xff]  }
  0x37   :  { %v6323_v9 = vld [vmem:[#allocation2 + $0x2a4] ss:$16 sps:$4 sm:$0xff]   ;;  %v6326_v11 = vld [vmem:[#allocation2 + $0x2a0] ss:$16 sps:$4 sm:$0xff]   ;;  %vm5618_vm0 = vcmask 1041409   ;;  %vm5620_vm1 = vcmask 1043459  }
  0x38   :  { %892 = vmatpush1.bf16.msra.mxu0 %v6319_v6  ;;  %v6327_v12 = vld [vmem:[#allocation2 + $0x84] ss:$16 sps:$4 sm:$0xff]   ;;  %v6331_v14 = vld [vmem:[#allocation2 + $0x80] ss:$16 sps:$4 sm:$0xff]   ;;  %v6411_v6 = vld [vmem:[#allocation2 + $0xe8] ss:$16 sps:$4 sm:$0xff]  }
  0x39   :  { %935 = vmatpush1.bf16.msra.mxu1 %v6320_v7  ;;  %893 = vmatprep.subr.bf16.mxu0 %v6321_v8  ;;  %v6329_v13 = vld [vmem:[#allocation2 + $0x284] ss:$16 sps:$4 sm:$0xff]   ;;  %v6332_v15 = vld [vmem:[#allocation2 + $0x280] ss:$16 sps:$4 sm:$0xff]   ;;  %v6414_v7 = vld [vmem:[#allocation2 + $0x2e8] ss:$16 sps:$4 sm:$0xff]  }
  0x3a   :  { %936 = vmatprep.subr.bf16.mxu1 %v6323_v9  ;;  %v6333_v16 = vld [vmem:[#allocation2 + $0x64] ss:$16 sps:$4 sm:$0xff]   ;;  %v6337_v18 = vld [vmem:[#allocation2 + $0x60] ss:$16 sps:$4 sm:$0xff]   ;;  %v6419_v8 = vld [vmem:[#allocation2 + $0xcc] ss:$16 sps:$4 sm:$0xff]  }
  0x3b   :  { %v6335_v17 = vld [vmem:[#allocation2 + $0x264] ss:$16 sps:$4 sm:$0xff]   ;;  %v6338_v19 = vld [vmem:[#allocation2 + $0x260] ss:$16 sps:$4 sm:$0xff]   ;;  %v6422_v9 = vld [vmem:[#allocation2 + $0x2cc] ss:$16 sps:$4 sm:$0xff]  }
  0x3c   :  { %894 = vmatpush1.bf16.msra.mxu0 %v6325_v10  ;;  %v6339_v20 = vld [vmem:[#allocation2 + $0x44] ss:$16 sps:$4 sm:$0xff]   ;;  %v6343_v22 = vld [vmem:[#allocation2 + $0x40] ss:$16 sps:$4 sm:$0xff]   ;;  %v6417_v10 = vld [vmem:[#allocation2 + $0xc8] ss:$16 sps:$4 sm:$0xff]  }
  0x3d   :  { %937 = vmatpush1.bf16.msra.mxu1 %v6326_v11  ;;  %895 = vmatprep.subr.bf16.mxu0 %v6327_v12  ;;  %v6341_v21 = vld [vmem:[#allocation2 + $0x244] ss:$16 sps:$4 sm:$0xff]   ;;  %v6344_v23 = vld [vmem:[#allocation2 + $0x240] ss:$16 sps:$4 sm:$0xff]   ;;  %v6420_v11 = vld [vmem:[#allocation2 + $0x2c8] ss:$16 sps:$4 sm:$0xff]  }
  0x3e   :  { %938 = vmatprep.subr.bf16.mxu1 %v6329_v13  ;;  %v6345_v24 = vld [vmem:[#allocation2 + $0x24] ss:$16 sps:$4 sm:$0xff]   ;;  %v6349_v26 = vld [vmem:[#allocation2 + $0x20] ss:$16 sps:$4 sm:$0xff]   ;;  %v6425_v12 = vld [vmem:[#allocation2 + $0xac] ss:$16 sps:$4 sm:$0xff]  }
  0x3f   :  { %v6347_v25 = vld [vmem:[#allocation2 + $0x224] ss:$16 sps:$4 sm:$0xff]   ;;  %v6350_v27 = vld [vmem:[#allocation2 + $0x220] ss:$16 sps:$4 sm:$0xff]   ;;  %v6428_v13 = vld [vmem:[#allocation2 + $0x2ac] ss:$16 sps:$4 sm:$0xff]  }
  0x40   :  { %896 = vmatpush1.bf16.msra.mxu0 %v6331_v14  ;;  %v6351_v28 = vld [vmem:[#allocation2 + $0x4] ss:$16 sps:$4 sm:$0xff]   ;;  %v6355_v30 = vld [vmem:[#allocation2] ss:$16 sps:$4 sm:$0xff]   ;;  %v6423_v14 = vld [vmem:[#allocation2 + $0xa8] ss:$16 sps:$4 sm:$0xff]  }
  0x41   :  { %939 = vmatpush1.bf16.msra.mxu1 %v6332_v15  ;;  %897 = vmatprep.subr.bf16.mxu0 %v6333_v16  ;;  %v6353_v29 = vld [vmem:[#allocation2 + $0x204] ss:$16 sps:$4 sm:$0xff]   ;;  %v6356_v31 = vld [vmem:[#allocation2 + $0x200] ss:$16 sps:$4 sm:$0xff]   ;;  %v6426_v15 = vld [vmem:[#allocation2 + $0x2a8] ss:$16 sps:$4 sm:$0xff]  }
  0x42   :  { %940 = vmatprep.subr.bf16.mxu1 %v6335_v17  ;;  %v6357_v32 = vld [vmem:[#allocation2 + $0x1e4] ss:$16 sps:$4 sm:$0xff]   ;;  %v6361_v34 = vld [vmem:[#allocation2 + $0x1e0] ss:$16 sps:$4 sm:$0xff]   ;;  %v6431_v16 = vld [vmem:[#allocation2 + $0x8c] ss:$16 sps:$4 sm:$0xff]  }
  0x43   :  { %v6359_v33 = vld [vmem:[#allocation2 + $0x3e4] ss:$16 sps:$4 sm:$0xff]   ;;  %v6362_v35 = vld [vmem:[#allocation2 + $0x3e0] ss:$16 sps:$4 sm:$0xff]   ;;  %v6434_v17 = vld [vmem:[#allocation2 + $0x28c] ss:$16 sps:$4 sm:$0xff]  }
  0x44   :  { %898 = vmatpush1.bf16.msra.mxu0 %v6337_v18  ;;  %v6363_v36 = vld [vmem:[#allocation2 + $0x1c4] ss:$16 sps:$4 sm:$0xff]   ;;  %v6367_v38 = vld [vmem:[#allocation2 + $0x1c0] ss:$16 sps:$4 sm:$0xff]   ;;  %v6429_v18 = vld [vmem:[#allocation2 + $0x88] ss:$16 sps:$4 sm:$0xff]  }
  0x45   :  { %941 = vmatpush1.bf16.msra.mxu1 %v6338_v19  ;;  %899 = vmatprep.subr.bf16.mxu0 %v6339_v20  ;;  %v6365_v37 = vld [vmem:[#allocation2 + $0x3c4] ss:$16 sps:$4 sm:$0xff]   ;;  %v6368_v39 = vld [vmem:[#allocation2 + $0x3c0] ss:$16 sps:$4 sm:$0xff]   ;;  %v6432_v19 = vld [vmem:[#allocation2 + $0x288] ss:$16 sps:$4 sm:$0xff]  }
  0x46   :  { %942 = vmatprep.subr.bf16.mxu1 %v6341_v21  ;;  %v6369_v40 = vld [vmem:[#allocation2 + $0x1a4] ss:$16 sps:$4 sm:$0xff]   ;;  %v6373_v42 = vld [vmem:[#allocation2 + $0x1a0] ss:$16 sps:$4 sm:$0xff]   ;;  %v6437_v20 = vld [vmem:[#allocation2 + $0x6c] ss:$16 sps:$4 sm:$0xff]  }
  0x47   :  { %v6371_v41 = vld [vmem:[#allocation2 + $0x3a4] ss:$16 sps:$4 sm:$0xff]   ;;  %v6374_v43 = vld [vmem:[#allocation2 + $0x3a0] ss:$16 sps:$4 sm:$0xff]   ;;  %v6440_v21 = vld [vmem:[#allocation2 + $0x26c] ss:$16 sps:$4 sm:$0xff]  }
  0x48   :  { %900 = vmatpush1.bf16.msra.mxu0 %v6343_v22  ;;  %v6375_v44 = vld [vmem:[#allocation2 + $0x184] ss:$16 sps:$4 sm:$0xff]   ;;  %v6379_v46 = vld [vmem:[#allocation2 + $0x180] ss:$16 sps:$4 sm:$0xff]   ;;  %v6435_v22 = vld [vmem:[#allocation2 + $0x68] ss:$16 sps:$4 sm:$0xff]  }
  0x49   :  { %943 = vmatpush1.bf16.msra.mxu1 %v6344_v23  ;;  %901 = vmatprep.subr.bf16.mxu0 %v6345_v24  ;;  %v6377_v45 = vld [vmem:[#allocation2 + $0x384] ss:$16 sps:$4 sm:$0xff]   ;;  %v6380_v47 = vld [vmem:[#allocation2 + $0x380] ss:$16 sps:$4 sm:$0xff]   ;;  %v6438_v23 = vld [vmem:[#allocation2 + $0x268] ss:$16 sps:$4 sm:$0xff]  }
  0x4a   :  { %944 = vmatprep.subr.bf16.mxu1 %v6347_v25  ;;  %v6381_v48 = vld [vmem:[#allocation2 + $0x164] ss:$16 sps:$4 sm:$0xff]   ;;  %v6385_v52 = vld [vmem:[#allocation2 + $0x160] ss:$16 sps:$4 sm:$0xff]   ;;  %v6443_v24 = vld [vmem:[#allocation2 + $0x4c] ss:$16 sps:$4 sm:$0xff]  }
  0x4b   :  { %v6407_v49 = vld [vmem:[%s7404_s0 + $0x4] ss:$16 sps:$4 sm:$0xff]   ;;  %v6386_v53 = vld [vmem:[#allocation2 + $0x360] ss:$16 sps:$4 sm:$0xff]   ;;  %v6446_v25 = vld [vmem:[#allocation2 + $0x24c] ss:$16 sps:$4 sm:$0xff]  }
  0x4c   :  { %902 = vmatpush1.bf16.msra.mxu0 %v6349_v26  ;;  %v6383_v50 = vld [vmem:[#allocation2 + $0x364] ss:$16 sps:$4 sm:$0xff]   ;;  %921 = vmatprep.mubr.bf16.mxu0 %v6407_v49  ;;  %v6391_v56 = vld [vmem:[#allocation2 + $0x140] ss:$16 sps:$4 sm:$0xff]   ;;  %v6441_v26 = vld [vmem:[#allocation2 + $0x48] ss:$16 sps:$4 sm:$0xff]  }
  0x4d   :  { %945 = vmatpush1.bf16.msra.mxu1 %v6350_v27  ;;  %903 = vmatprep.subr.bf16.mxu0 %v6351_v28  ;;  %v6387_v54 = vld [vmem:[#allocation2 + $0x144] ss:$16 sps:$4 sm:$0xff]   ;;  %v6392_v57 = vld [vmem:[#allocation2 + $0x340] ss:$16 sps:$4 sm:$0xff]   ;;  %v6444_v27 = vld [vmem:[#allocation2 + $0x248] ss:$16 sps:$4 sm:$0xff]  }
  0x4e   :  { %946 = vmatprep.subr.bf16.mxu1 %v6353_v29  ;;  %v6389_v55 = vld [vmem:[#allocation2 + $0x344] ss:$16 sps:$4 sm:$0xff]   ;;  %v6397_v60 = vld [vmem:[#allocation2 + $0x120] ss:$16 sps:$4 sm:$0xff]   ;;  %v6449_v28 = vld [vmem:[#allocation2 + $0x2c] ss:$16 sps:$4 sm:$0xff]  }
  0x4f   :  { %v6393_v58 = vld [vmem:[#allocation2 + $0x124] ss:$16 sps:$4 sm:$0xff]   ;;  %v6398_v61 = vld [vmem:[#allocation2 + $0x320] ss:$16 sps:$4 sm:$0xff]   ;;  %v6452_v29 = vld [vmem:[#allocation2 + $0x22c] ss:$16 sps:$4 sm:$0xff]  }
  0x50   :  { %904 = vmatpush1.bf16.msra.mxu0 %v6355_v30  ;;  %v6395_v59 = vld [vmem:[#allocation2 + $0x324] ss:$16 sps:$4 sm:$0xff]   ;;  %v6403_v0 = vld [vmem:[#allocation2 + $0x100] ss:$16 sps:$4 sm:$0xff]   ;;  %v6447_v30 = vld [vmem:[#allocation2 + $0x28] ss:$16 sps:$4 sm:$0xff]  }
  0x51   :  { %947 = vmatpush1.bf16.msra.mxu1 %v6356_v31  ;;  %905 = vmatprep.subr.bf16.mxu0 %v6357_v32  ;;  %v6399_v62 = vld [vmem:[#allocation2 + $0x104] ss:$16 sps:$4 sm:$0xff]   ;;  %v6404_v1 = vld [vmem:[#allocation2 + $0x300] ss:$16 sps:$4 sm:$0xff]   ;;  %v6450_v31 = vld [vmem:[#allocation2 + $0x228] ss:$16 sps:$4 sm:$0xff]  }
  0x52   :  { %948 = vmatprep.subr.bf16.mxu1 %v6359_v33  ;;  %v6401_v63 = vld [vmem:[#allocation2 + $0x304] ss:$16 sps:$4 sm:$0xff]   ;;  %v7120_v4 = vld [vmem:[%s7404_s0] ss:$16 sps:$4 sm:$0xff]   ;;  %v6455_v32 = vld [vmem:[#allocation2 + $0xc] ss:$16 sps:$4 sm:$0xff]  }
  0x53   :  { %v6458_v33 = vld [vmem:[#allocation2 + $0x20c] ss:$16 sps:$4 sm:$0xff]   ;;  %vm5622_vm2 = vcmask 1045509   ;;  %vm5624_vm3 = vcmask 1047559  }
  0x54   :  { %906 = vmatpush2.bf16.msra.mxu0 %v6361_v34  ;;  %v6453_v34 = vld [vmem:[#allocation2 + $0x8] ss:$16 sps:$4 sm:$0xff]  }
  0x55   :  { %949 = vmatpush2.bf16.msra.mxu1 %v6362_v35  ;;  %907 = vmatprep.subr.bf16.mxu0 %v6363_v36  ;;  %v6456_v35 = vld [vmem:[#allocation2 + $0x208] ss:$16 sps:$4 sm:$0xff]   ;;  %v6461_v36 = vld [vmem:[#allocation2 + $0x1ec] ss:$16 sps:$4 sm:$0xff]  }
  0x56   :  { %950 = vmatprep.subr.bf16.mxu1 %v6365_v37  ;;  %v6464_v37 = vld [vmem:[#allocation2 + $0x3ec] ss:$16 sps:$4 sm:$0xff]  }
  0x58   :  { %908 = vmatpush2.bf16.msra.mxu0 %v6367_v38  ;;  %v6459_v38 = vld [vmem:[#allocation2 + $0x1e8] ss:$16 sps:$4 sm:$0xff]  }
  0x59   :  { %951 = vmatpush2.bf16.msra.mxu1 %v6368_v39  ;;  %909 = vmatprep.subr.bf16.mxu0 %v6369_v40  ;;  %v6462_v39 = vld [vmem:[#allocation2 + $0x3e8] ss:$16 sps:$4 sm:$0xff]   ;;  %v6467_v40 = vld [vmem:[#allocation2 + $0x1cc] ss:$16 sps:$4 sm:$0xff]  }
  0x5a   :  { %952 = vmatprep.subr.bf16.mxu1 %v6371_v41  ;;  %v6470_v41 = vld [vmem:[#allocation2 + $0x3cc] ss:$16 sps:$4 sm:$0xff]  }
  0x5c   :  { %910 = vmatpush2.bf16.msra.mxu0 %v6373_v42  ;;  %v6465_v42 = vld [vmem:[#allocation2 + $0x1c8] ss:$16 sps:$4 sm:$0xff]  }
  0x5d   :  { %953 = vmatpush2.bf16.msra.mxu1 %v6374_v43  ;;  %911 = vmatprep.subr.bf16.mxu0 %v6375_v44  ;;  %v6468_v43 = vld [vmem:[#allocation2 + $0x3c8] ss:$16 sps:$4 sm:$0xff]   ;;  %v6473_v44 = vld [vmem:[#allocation2 + $0x1ac] ss:$16 sps:$4 sm:$0xff]  }
  0x5e   :  { %954 = vmatprep.subr.bf16.mxu1 %v6377_v45  ;;  %v6476_v45 = vld [vmem:[#allocation2 + $0x3ac] ss:$16 sps:$4 sm:$0xff]  }
  0x60   :  { %912 = vmatpush2.bf16.msra.mxu0 %v6379_v46  ;;  %v6471_v46 = vld [vmem:[#allocation2 + $0x1a8] ss:$16 sps:$4 sm:$0xff]  }
  0x61   :  { %955 = vmatpush2.bf16.msra.mxu1 %v6380_v47  ;;  %913 = vmatprep.subr.bf16.mxu0 %v6381_v48  ;;  %v6474_v47 = vld [vmem:[#allocation2 + $0x3a8] ss:$16 sps:$4 sm:$0xff]   ;;  %v6479_v48 = vld [vmem:[#allocation2 + $0x18c] ss:$16 sps:$4 sm:$0xff]  }
  0x62   :  { %956 = vmatprep.subr.bf16.mxu1 %v6383_v50  ;;  %v6477_v50 = vld [vmem:[#allocation2 + $0x188] ss:$16 sps:$4 sm:$0xff]  }
  0x64   :  { %914 = vmatpush2.bf16.msra.mxu0 %v6385_v52  ;;  %v6485_v52 = vld [vmem:[#allocation2 + $0x16c] ss:$16 sps:$4 sm:$0xff]  }
  0x65   :  { %957 = vmatpush2.bf16.msra.mxu1 %v6386_v53  ;;  %915 = vmatprep.subr.bf16.mxu0 %v6387_v54  ;;  %v6488_v53 = vld [vmem:[#allocation2 + $0x36c] ss:$16 sps:$4 sm:$0xff]   ;;  %v6483_v54 = vld [vmem:[#allocation2 + $0x168] ss:$16 sps:$4 sm:$0xff]  }
  0x66   :  { %958 = vmatprep.subr.bf16.mxu1 %v6389_v55  ;;  %v6486_v55 = vld [vmem:[#allocation2 + $0x368] ss:$16 sps:$4 sm:$0xff]  }
  0x68   :  { %916 = vmatpush2.bf16.msra.mxu0 %v6391_v56  ;;  %v6491_v56 = vld [vmem:[#allocation2 + $0x14c] ss:$16 sps:$4 sm:$0xff]  }
  0x69   :  { %959 = vmatpush2.bf16.msra.mxu1 %v6392_v57  ;;  %917 = vmatprep.subr.bf16.mxu0 %v6393_v58  ;;  %v6494_v57 = vld [vmem:[#allocation2 + $0x34c] ss:$16 sps:$4 sm:$0xff]   ;;  %v6489_v58 = vld [vmem:[#allocation2 + $0x148] ss:$16 sps:$4 sm:$0xff]  }
  0x6a   :  { %960 = vmatprep.subr.bf16.mxu1 %v6395_v59  ;;  %v6492_v59 = vld [vmem:[#allocation2 + $0x348] ss:$16 sps:$4 sm:$0xff]  }
  0x6c   :  { %918 = vmatpush2.bf16.msra.mxu0 %v6397_v60  ;;  %v6497_v60 = vld [vmem:[#allocation2 + $0x12c] ss:$16 sps:$4 sm:$0xff]  }
  0x6d   :  { %961 = vmatpush2.bf16.msra.mxu1 %v6398_v61  ;;  %919 = vmatprep.subr.bf16.mxu0 %v6399_v62  ;;  %v6500_v61 = vld [vmem:[#allocation2 + $0x32c] ss:$16 sps:$4 sm:$0xff]   ;;  %v6495_v62 = vld [vmem:[#allocation2 + $0x128] ss:$16 sps:$4 sm:$0xff]  }
  0x6e   :  { %962 = vmatprep.subr.bf16.mxu1 %v6401_v63  ;;  %v6498_v63 = vld [vmem:[#allocation2 + $0x328] ss:$16 sps:$4 sm:$0xff]  }
  0x70   :  { %920 = vmatpush2.bf16.msra.mxu0 %v6403_v0  ;;  %v6503_v0 = vld [vmem:[#allocation2 + $0x10c] ss:$16 sps:$4 sm:$0xff]  }
  0x71   :  { %963 = vmatpush2.bf16.msra.mxu1 %v6404_v1  ;;  %975 = vmatprep.subr.bf16.mxu0 %v6413_v2  ;;  %v6506_v1 = vld [vmem:[#allocation2 + $0x30c] ss:$16 sps:$4 sm:$0xff]   ;;  %v6501_v2 = vld [vmem:[#allocation2 + $0x108] ss:$16 sps:$4 sm:$0xff]  }
  0x72   :  { %1018 = vmatprep.subr.bf16.mxu1 %v6416_v3  ;;  %v6504_v3 = vld [vmem:[#allocation2 + $0x308] ss:$16 sps:$4 sm:$0xff]  }
  0x73   :  { %922 = vmatmul.mubr.bf16.vlgmr.msra.gmra.mxu0 %v7120_v4 }
  0x74   :  { %965 = vmatmul.mubr.bf16.vlgmr.msra.gmra.mxu1 %v7125_v5  ;;  %976 = vmatpush1.bf16.msra.mxu0 %v6411_v6  ;;  %v6509_v6 = vld [vmem:[#allocation5 + $0xe4] ss:$16 sps:$4 sm:$0xff]  }
  0x75   :  { %1019 = vmatpush1.bf16.msra.mxu1 %v6414_v7  ;;  %977 = vmatprep.subr.bf16.mxu0 %v6419_v8  ;;  %v6512_v7 = vld [vmem:[#allocation5 + $0x2e4] ss:$16 sps:$4 sm:$0xff]   ;;  %v6507_v8 = vld [vmem:[#allocation5 + $0xe0] ss:$16 sps:$4 sm:$0xff]  }
  0x76   :  { %1020 = vmatprep.subr.bf16.mxu1 %v6422_v9  ;;  %1007 = vmatprep.mubr.bf16.mxu0 %v6407_v49  ;;  %v6482_v49 = vld [vmem:[#allocation2 + $0x38c] ss:$16 sps:$4 sm:$0xff]   ;;  %v6510_v9 = vld [vmem:[#allocation5 + $0x2e0] ss:$16 sps:$4 sm:$0xff]  }
  0x77   :  { %1050 = vmatprep.mubr.bf16.mxu1 %v6410_v51  ;;  %v6480_v51 = vld [vmem:[#allocation2 + $0x388] ss:$16 sps:$4 sm:$0xff]  }
  0x78   :  { %978 = vmatpush1.bf16.msra.mxu0 %v6417_v10  ;;  %v6515_v10 = vld [vmem:[#allocation5 + $0xc4] ss:$16 sps:$4 sm:$0xff]  }
  0x79   :  { %1021 = vmatpush1.bf16.msra.mxu1 %v6420_v11  ;;  %979 = vmatprep.subr.bf16.mxu0 %v6425_v12  ;;  %v6518_v11 = vld [vmem:[#allocation5 + $0x2c4] ss:$16 sps:$4 sm:$0xff]   ;;  %v6513_v12 = vld [vmem:[#allocation5 + $0xc0] ss:$16 sps:$4 sm:$0xff]  }
  0x7a   :  { %1022 = vmatprep.subr.bf16.mxu1 %v6428_v13  ;;  %v6516_v13 = vld [vmem:[#allocation5 + $0x2c0] ss:$16 sps:$4 sm:$0xff]  }
  0x7c   :  { %980 = vmatpush1.bf16.msra.mxu0 %v6423_v14  ;;  %v6521_v14 = vld [vmem:[#allocation5 + $0xa4] ss:$16 sps:$4 sm:$0xff]  }
  0x7d   :  { %1023 = vmatpush1.bf16.msra.mxu1 %v6426_v15  ;;  %981 = vmatprep.subr.bf16.mxu0 %v6431_v16  ;;  %v6519_v15 = vld [vmem:[#allocation5 + $0xa0] ss:$16 sps:$4 sm:$0xff]   ;;  %v6527_v16 = vld [vmem:[#allocation5 + $0x84] ss:$16 sps:$4 sm:$0xff]  }
  0x7e   :  { %1024 = vmatprep.subr.bf16.mxu1 %v6434_v17  ;;  %v6530_v17 = vld [vmem:[#allocation5 + $0x284] ss:$16 sps:$4 sm:$0xff]  }
  0x80   :  { %982 = vmatpush1.bf16.msra.mxu0 %v6429_v18  ;;  %v6525_v18 = vld [vmem:[#allocation5 + $0x80] ss:$16 sps:$4 sm:$0xff]  }
  0x81   :  { %1025 = vmatpush1.bf16.msra.mxu1 %v6432_v19  ;;  %983 = vmatprep.subr.bf16.mxu0 %v6437_v20  ;;  %v6528_v19 = vld [vmem:[#allocation5 + $0x280] ss:$16 sps:$4 sm:$0xff]   ;;  %v6533_v20 = vld [vmem:[#allocation5 + $0x64] ss:$16 sps:$4 sm:$0xff]  }
  0x82   :  { %1026 = vmatprep.subr.bf16.mxu1 %v6440_v21  ;;  %v6536_v21 = vld [vmem:[#allocation5 + $0x264] ss:$16 sps:$4 sm:$0xff]  }
  0x84   :  { %984 = vmatpush1.bf16.msra.mxu0 %v6435_v22  ;;  %v6531_v22 = vld [vmem:[#allocation5 + $0x60] ss:$16 sps:$4 sm:$0xff]  }
  0x85   :  { %1027 = vmatpush1.bf16.msra.mxu1 %v6438_v23  ;;  %985 = vmatprep.subr.bf16.mxu0 %v6443_v24  ;;  %v6534_v23 = vld [vmem:[#allocation5 + $0x260] ss:$16 sps:$4 sm:$0xff]   ;;  %v6539_v24 = vld [vmem:[#allocation5 + $0x44] ss:$16 sps:$4 sm:$0xff]  }
  0x86   :  { %1028 = vmatprep.subr.bf16.mxu1 %v6446_v25  ;;  %v6542_v25 = vld [vmem:[#allocation5 + $0x244] ss:$16 sps:$4 sm:$0xff]  }
  0x88   :  { %986 = vmatpush1.bf16.msra.mxu0 %v6441_v26  ;;  %v6537_v26 = vld [vmem:[#allocation5 + $0x40] ss:$16 sps:$4 sm:$0xff]  }
  0x89   :  { %1029 = vmatpush1.bf16.msra.mxu1 %v6444_v27  ;;  %987 = vmatprep.subr.bf16.mxu0 %v6449_v28  ;;  %v6540_v27 = vld [vmem:[#allocation5 + $0x240] ss:$16 sps:$4 sm:$0xff]   ;;  %v6545_v28 = vld [vmem:[#allocation5 + $0x24] ss:$16 sps:$4 sm:$0xff]  }
  0x8a   :  { %1030 = vmatprep.subr.bf16.mxu1 %v6452_v29  ;;  %v6548_v29 = vld [vmem:[#allocation5 + $0x224] ss:$16 sps:$4 sm:$0xff]  }
  0x8c   :  { %988 = vmatpush1.bf16.msra.mxu0 %v6447_v30  ;;  %v6543_v30 = vld [vmem:[#allocation5 + $0x20] ss:$16 sps:$4 sm:$0xff]  }
  0x8d   :  { %1031 = vmatpush1.bf16.msra.mxu1 %v6450_v31  ;;  %989 = vmatprep.subr.bf16.mxu0 %v6455_v32  ;;  %v6546_v31 = vld [vmem:[#allocation5 + $0x220] ss:$16 sps:$4 sm:$0xff]   ;;  %v6551_v32 = vld [vmem:[#allocation5 + $0x4] ss:$16 sps:$4 sm:$0xff]  }
  0x8e   :  { %1032 = vmatprep.subr.bf16.mxu1 %v6458_v33  ;;  %v6554_v33 = vld [vmem:[#allocation5 + $0x204] ss:$16 sps:$4 sm:$0xff]  }
  0x90   :  { %990 = vmatpush1.bf16.msra.mxu0 %v6453_v34  ;;  %v6549_v34 = vld [vmem:[#allocation5] ss:$16 sps:$4 sm:$0xff]  }
  0x91   :  { %1033 = vmatpush1.bf16.msra.mxu1 %v6456_v35  ;;  %991 = vmatprep.subr.bf16.mxu0 %v6461_v36  ;;  %v6552_v35 = vld [vmem:[#allocation5 + $0x200] ss:$16 sps:$4 sm:$0xff]   ;;  %v6557_v36 = vld [vmem:[#allocation5 + $0x1e4] ss:$16 sps:$4 sm:$0xff]  }
  0x92   :  { %1034 = vmatprep.subr.bf16.mxu1 %v6464_v37  ;;  %v6560_v37 = vld [vmem:[#allocation5 + $0x3e4] ss:$16 sps:$4 sm:$0xff]  }
  0x94   :  { %992 = vmatpush2.bf16.msra.mxu0 %v6459_v38  ;;  %v6555_v38 = vld [vmem:[#allocation5 + $0x1e0] ss:$16 sps:$4 sm:$0xff]  }
  0x95   :  { %1035 = vmatpush2.bf16.msra.mxu1 %v6462_v39  ;;  %993 = vmatprep.subr.bf16.mxu0 %v6467_v40  ;;  %v6558_v39 = vld [vmem:[#allocation5 + $0x3e0] ss:$16 sps:$4 sm:$0xff]   ;;  %v6563_v40 = vld [vmem:[#allocation5 + $0x1c4] ss:$16 sps:$4 sm:$0xff]  }
  0x96   :  { %1036 = vmatprep.subr.bf16.mxu1 %v6470_v41  ;;  %v6566_v41 = vld [vmem:[#allocation5 + $0x3c4] ss:$16 sps:$4 sm:$0xff]  }
  0x98   :  { %994 = vmatpush2.bf16.msra.mxu0 %v6465_v42  ;;  %v6561_v42 = vld [vmem:[#allocation5 + $0x1c0] ss:$16 sps:$4 sm:$0xff]  }
  0x99   :  { %1037 = vmatpush2.bf16.msra.mxu1 %v6468_v43  ;;  %995 = vmatprep.subr.bf16.mxu0 %v6473_v44  ;;  %v6564_v43 = vld [vmem:[#allocation5 + $0x3c0] ss:$16 sps:$4 sm:$0xff]   ;;  %v6569_v44 = vld [vmem:[#allocation5 + $0x1a4] ss:$16 sps:$4 sm:$0xff]  }
  0x9a   :  { %1038 = vmatprep.subr.bf16.mxu1 %v6476_v45  ;;  %v6572_v45 = vld [vmem:[#allocation5 + $0x3a4] ss:$16 sps:$4 sm:$0xff]  }
  0x9c   :  { %996 = vmatpush2.bf16.msra.mxu0 %v6471_v46  ;;  %v6567_v46 = vld [vmem:[#allocation5 + $0x1a0] ss:$16 sps:$4 sm:$0xff]  }
  0x9d   :  { %1039 = vmatpush2.bf16.msra.mxu1 %v6474_v47  ;;  %997 = vmatprep.subr.bf16.mxu0 %v6479_v48  ;;  %v6570_v47 = vld [vmem:[#allocation5 + $0x3a0] ss:$16 sps:$4 sm:$0xff]   ;;  %v6575_v48 = vld [vmem:[#allocation5 + $0x184] ss:$16 sps:$4 sm:$0xff]  }
  0x9e   :  { %1040 = vmatprep.subr.bf16.mxu1 %v6482_v49  ;;  %v6578_v49 = vld [vmem:[#allocation5 + $0x384] ss:$16 sps:$4 sm:$0xff]  }
  0xa0   :  { %998 = vmatpush2.bf16.msra.mxu0 %v6477_v50  ;;  %v6573_v50 = vld [vmem:[#allocation5 + $0x180] ss:$16 sps:$4 sm:$0xff]  }
  0xa1   :  { %1041 = vmatpush2.bf16.msra.mxu1 %v6480_v51  ;;  %999 = vmatprep.subr.bf16.mxu0 %v6485_v52  ;;  %v6576_v51 = vld [vmem:[#allocation5 + $0x380] ss:$16 sps:$4 sm:$0xff]   ;;  %v6581_v52 = vld [vmem:[#allocation5 + $0x164] ss:$16 sps:$4 sm:$0xff]  }
  0xa2   :  { %1042 = vmatprep.subr.bf16.mxu1 %v6488_v53  ;;  %v6584_v53 = vld [vmem:[#allocation5 + $0x364] ss:$16 sps:$4 sm:$0xff]  }
  0xa4   :  { %1000 = vmatpush2.bf16.msra.mxu0 %v6483_v54  ;;  %v6579_v54 = vld [vmem:[#allocation5 + $0x160] ss:$16 sps:$4 sm:$0xff]  }
  0xa5   :  { %1043 = vmatpush2.bf16.msra.mxu1 %v6486_v55  ;;  %1001 = vmatprep.subr.bf16.mxu0 %v6491_v56  ;;  %v6582_v55 = vld [vmem:[#allocation5 + $0x360] ss:$16 sps:$4 sm:$0xff]   ;;  %v6587_v56 = vld [vmem:[#allocation5 + $0x144] ss:$16 sps:$4 sm:$0xff]  }
  0xa6   :  { %1044 = vmatprep.subr.bf16.mxu1 %v6494_v57  ;;  %v6590_v57 = vld [vmem:[#allocation5 + $0x344] ss:$16 sps:$4 sm:$0xff]  }
  0xa8   :  { %1002 = vmatpush2.bf16.msra.mxu0 %v6489_v58  ;;  %v6585_v58 = vld [vmem:[#allocation5 + $0x140] ss:$16 sps:$4 sm:$0xff]  }
  0xa9   :  { %1045 = vmatpush2.bf16.msra.mxu1 %v6492_v59  ;;  %1003 = vmatprep.subr.bf16.mxu0 %v6497_v60  ;;  %v6588_v59 = vld [vmem:[#allocation5 + $0x340] ss:$16 sps:$4 sm:$0xff]   ;;  %v6593_v60 = vld [vmem:[#allocation5 + $0x124] ss:$16 sps:$4 sm:$0xff]  }
  0xaa   :  { %1046 = vmatprep.subr.bf16.mxu1 %v6500_v61  ;;  %v6596_v61 = vld [vmem:[#allocation5 + $0x324] ss:$16 sps:$4 sm:$0xff]  }
  0xac   :  { %1004 = vmatpush2.bf16.msra.mxu0 %v6495_v62  ;;  %v6591_v62 = vld [vmem:[#allocation5 + $0x120] ss:$16 sps:$4 sm:$0xff]  }
  0xad   :  { %1047 = vmatpush2.bf16.msra.mxu1 %v6498_v63  ;;  %1005 = vmatprep.subr.bf16.mxu0 %v6503_v0  ;;  %v6594_v63 = vld [vmem:[#allocation5 + $0x320] ss:$16 sps:$4 sm:$0xff]   ;;  %v6599_v0 = vld [vmem:[#allocation5 + $0x104] ss:$16 sps:$4 sm:$0xff]  }
  0xae   :  { %1048 = vmatprep.subr.bf16.mxu1 %v6506_v1  ;;  %v6597_v1 = vld [vmem:[#allocation5 + $0x100] ss:$16 sps:$4 sm:$0xff]  }
  0xb0   :  { %1006 = vmatpush2.bf16.msra.mxu0 %v6501_v2  ;;  %v6600_v2 = vld [vmem:[#allocation5 + $0x300] ss:$16 sps:$4 sm:$0xff]  }
  0xb1   :  { %1049 = vmatpush2.bf16.msra.mxu1 %v6504_v3  ;;  %2019 = vmatprep.subr.bf16.mxu0 %v6509_v6  ;;  %v6602_v3 = vld [vmem:[#allocation5 + $0x304] ss:$16 sps:$4 sm:$0xff]  }
  0xb2   :  { %2062 = vmatprep.subr.bf16.mxu1 %v6512_v7 }
  0xb3   :  { %1008 = vmatmul.mubr.bf16.vlgmr.msra.gmra.mxu0 %v7120_v4  ;;  %v6524_v4 = vld [vmem:[#allocation5 + $0x2a4] ss:$16 sps:$4 sm:$0xff]  }
  0xb4   :  { %1051 = vmatmul.mubr.bf16.vlgmr.msra.gmra.mxu1 %v7125_v5  ;;  %2020 = vmatpush1.bf16.msra.mxu0 %v6507_v8  ;;  %v6522_v5 = vld [vmem:[#allocation5 + $0x2a0] ss:$16 sps:$4 sm:$0xff]   ;;  %v6605_v8 = vld [vmem:[#allocation5 + $0xec] ss:$16 sps:$4 sm:$0xff]  }
  0xb5   :  { %2063 = vmatpush1.bf16.msra.mxu1 %v6510_v9  ;;  %2021 = vmatprep.subr.bf16.mxu0 %v6515_v10  ;;  %v6608_v9 = vld [vmem:[#allocation5 + $0x2ec] ss:$16 sps:$4 sm:$0xff]  }
  0xb6   :  { %2064 = vmatprep.subr.bf16.mxu1 %v6518_v11 }
  0xb8   :  { %2022 = vmatpush1.bf16.msra.mxu0 %v6513_v12 }
  0xb9   :  { %2065 = vmatpush1.bf16.msra.mxu1 %v6516_v13  ;;  %2023 = vmatprep.subr.bf16.mxu0 %v6521_v14 }
  0xba   :  { %2066 = vmatprep.subr.bf16.mxu1 %v6524_v4 }
  0xbc   :  { %2024 = vmatpush1.bf16.msra.mxu0 %v6519_v15 }
  0xbd   :  { %2067 = vmatpush1.bf16.msra.mxu1 %v6522_v5  ;;  %2025 = vmatprep.subr.bf16.mxu0 %v6527_v16 }
  0xbe   :  { %2068 = vmatprep.subr.bf16.mxu1 %v6530_v17 }
  0xc0   :  { %2026 = vmatpush1.bf16.msra.mxu0 %v6525_v18 }
  0xc1   :  { %2069 = vmatpush1.bf16.msra.mxu1 %v6528_v19  ;;  %2027 = vmatprep.subr.bf16.mxu0 %v6533_v20 }
  0xc2   :  { %2070 = vmatprep.subr.bf16.mxu1 %v6536_v21 }
  0xc4   :  { %2028 = vmatpush1.bf16.msra.mxu0 %v6531_v22 }
  0xc5   :  { %2071 = vmatpush1.bf16.msra.mxu1 %v6534_v23  ;;  %2029 = vmatprep.subr.bf16.mxu0 %v6539_v24 }
  0xc6   :  { %2072 = vmatprep.subr.bf16.mxu1 %v6542_v25 }
  0xc8   :  { %2030 = vmatpush1.bf16.msra.mxu0 %v6537_v26 }
  0xc9   :  { %2073 = vmatpush1.bf16.msra.mxu1 %v6540_v27  ;;  %2031 = vmatprep.subr.bf16.mxu0 %v6545_v28 }
  0xca   :  { %2074 = vmatprep.subr.bf16.mxu1 %v6548_v29 }
  0xcc   :  { %2032 = vmatpush1.bf16.msra.mxu0 %v6543_v30 }
  0xcd   :  { %2075 = vmatpush1.bf16.msra.mxu1 %v6546_v31  ;;  %2033 = vmatprep.subr.bf16.mxu0 %v6551_v32 }
  0xce   :  { %2076 = vmatprep.subr.bf16.mxu1 %v6554_v33 }
  0xd0   :  { %2034 = vmatpush1.bf16.msra.mxu0 %v6549_v34 }
  0xd1   :  { %2077 = vmatpush1.bf16.msra.mxu1 %v6552_v35  ;;  %2035 = vmatprep.subr.bf16.mxu0 %v6557_v36 }
  0xd2   :  { %2078 = vmatprep.subr.bf16.mxu1 %v6560_v37 }
  0xd4   :  { %2036 = vmatpush2.bf16.msra.mxu0 %v6555_v38 }
  0xd5   :  { %2079 = vmatpush2.bf16.msra.mxu1 %v6558_v39  ;;  %2037 = vmatprep.subr.bf16.mxu0 %v6563_v40 }
  0xd6   :  { %2080 = vmatprep.subr.bf16.mxu1 %v6566_v41 }
  0xd8   :  { %2038 = vmatpush2.bf16.msra.mxu0 %v6561_v42 }
  0xd9   :  { %2081 = vmatpush2.bf16.msra.mxu1 %v6564_v43  ;;  %2039 = vmatprep.subr.bf16.mxu0 %v6569_v44 }
  0xda   :  { %2082 = vmatprep.subr.bf16.mxu1 %v6572_v45 }
  0xdc   :  { %2040 = vmatpush2.bf16.msra.mxu0 %v6567_v46 }
  0xdd   :  { %2083 = vmatpush2.bf16.msra.mxu1 %v6570_v47  ;;  %2041 = vmatprep.subr.bf16.mxu0 %v6575_v48 }
  0xde   :  { %2084 = vmatprep.subr.bf16.mxu1 %v6578_v49 }
  0xe0   :  { %2042 = vmatpush2.bf16.msra.mxu0 %v6573_v50 }
  0xe1   :  { %2085 = vmatpush2.bf16.msra.mxu1 %v6576_v51  ;;  %2043 = vmatprep.subr.bf16.mxu0 %v6581_v52 }
  0xe2   :  { %2086 = vmatprep.subr.bf16.mxu1 %v6584_v53 }
  0xe4   :  { %2044 = vmatpush2.bf16.msra.mxu0 %v6579_v54 }
  0xe5   :  { %2087 = vmatpush2.bf16.msra.mxu1 %v6582_v55  ;;  %2045 = vmatprep.subr.bf16.mxu0 %v6587_v56 }
  0xe6   :  { %2088 = vmatprep.subr.bf16.mxu1 %v6590_v57 }
  0xe8   :  { %2046 = vmatpush2.bf16.msra.mxu0 %v6585_v58 }
  0xe9   :  { %2089 = vmatpush2.bf16.msra.mxu1 %v6588_v59  ;;  %2047 = vmatprep.subr.bf16.mxu0 %v6593_v60 }
  0xea   :  { %2090 = vmatprep.subr.bf16.mxu1 %v6596_v61 }
  0xec   :  { %2048 = vmatpush2.bf16.msra.mxu0 %v6591_v62 }
  0xed   :  { %2091 = vmatpush2.bf16.msra.mxu1 %v6594_v63  ;;  %2049 = vmatprep.subr.bf16.mxu0 %v6599_v0 }
  0xee   :  { %2092 = vmatprep.subr.bf16.mxu1 %v6602_v3 }
  0xf0   :  { %2050 = vmatpush2.bf16.msra.mxu0 %v6597_v1 }
  0xf1   :  { %2093 = vmatpush2.bf16.msra.mxu1 %v6600_v2  ;;  %2105 = vmatprep.subr.bf16.mxu0 %v6605_v8 }
  0xf2   :  { %2148 = vmatprep.subr.bf16.mxu1 %v6608_v9 }
 0x133   :  { %v923_v6 = vpop.f32.mrf.mxu0 }
 0x134   :  { %v966_v7 = vpop.f32.mrf.mxu1 }
 0x135   :  { %v925_v10 = vpop.f32.mrf.mxu0  ;;  %v967_v17 = vadd.f32 %v966_v7, %v923_v6 }
 0x136   :  { %v968_v11 = vpop.f32.mrf.mxu1 }
 0x137   :  { %v927_v12 = vpop.f32.mrf.mxu0  ;;  %v969_v16 = vadd.f32 %v968_v11, %v925_v10 }
 0x138   :  { %v970_v13 = vpop.f32.mrf.mxu1 }
 0x139   :  { %v929_v14 = vpop.f32.mrf.mxu0  ;;  %v971_v5 = vadd.f32 %v970_v13, %v927_v12 }
 0x13a   :  { %v972_v4 = vpop.f32.mrf.mxu1 }
 0x13b   :  { %v973_v15 = vadd.f32 %v972_v4, %v929_v14  ;;  %v1061_v19 = vadd.f32 %v971_v5, %v967_v17 }
 0x13d   :  { %v1068_v18 = vadd.f32 %v973_v15, %v969_v16  ;;  %v1062_v21 = vrot.slane %v1061_v19, 4 }
 0x13f   :  { %v1069_v20 = vrot.slane %v1068_v18, 4  ;;  %v1063_v23 = vadd.f32 %v1062_v21, %v1061_v19 }
 0x141   :  { %v1070_v22 = vadd.f32 %v1069_v20, %v1068_v18  ;;  %v1064_v25 = vrot.slane %v1063_v23, 2 }
 0x143   :  { %v1071_v24 = vrot.slane %v1070_v22, 2  ;;  %v1065_v27 = vadd.f32 %v1064_v25, %v1063_v23 }
 0x145   :  { %v1072_v26 = vadd.f32 %v1071_v24, %v1070_v22  ;;  %v1066_v29 = vrot.slane %v1065_v27, 1 }
 0x147   :  { %v1073_v28 = vrot.slane %v1072_v26, 1  ;;  %v1067_v31 = vadd.f32 %v1066_v29, %v1065_v27 }
 0x149   :  { %v1074_v30 = vadd.f32 %v1073_v28, %v1072_v26  ;;  %v1089_v33 = vmul.f32 0.0625, %v1067_v31 }
 0x14b   :  { %v1090_v32 = vmul.f32 0.0625, %v1074_v30  ;;  %v7135_v36 = vsub.f32 %v967_v17, %v1089_v33  ;;  %v7137_v37 = vsub.f32 %v971_v5, %v1089_v33 }
 0x14d   :  { %v7131_v34 = vsub.f32 %v969_v16, %v1090_v32  ;;  %v7133_v35 = vsub.f32 %v973_v15, %v1090_v32  ;;  %v1101_v44 = vmul.f32 %v7135_v36, %v7135_v36  ;;  %v1105_v45 = vmul.f32 %v7137_v37, %v7137_v37 }
 0x14f   :  { %v1102_v42 = vmul.f32 %v7131_v34, %v7131_v34  ;;  %v1106_v43 = vmul.f32 %v7133_v35, %v7133_v35  ;;  %v1109_v56 = vadd.f32 %v1105_v45, %v1101_v44 }
 0x151   :  { %v1116_v52 = vadd.f32 %v1106_v43, %v1102_v42  ;;  %v1110_v62 = vrot.slane %v1109_v56, 4 }
 0x153   :  { %v1117_v59 = vrot.slane %v1116_v52, 4  ;;  %v1111_v6 = vadd.f32 %v1110_v62, %v1109_v56  ;;  %v1159_v56 = vlaneseq }
 0x155   :  { %v1118_v1 = vadd.f32 %v1117_v59, %v1116_v52  ;;  %v1112_v12 = vrot.slane %v1111_v6, 2 }
 0x157   :  { %v1119_v9 = vrot.slane %v1118_v1, 2  ;;  %v1113_v17 = vadd.f32 %v1112_v12, %v1111_v6 }
 0x159   :  { %v1120_v4 = vadd.f32 %v1119_v9, %v1118_v1  ;;  %v1114_v26 = vrot.slane %v1113_v17, 1 }
 0x15b   :  { %v1121_v22 = vrot.slane %v1120_v4, 1  ;;  %v1115_v32 = vadd.f32 %v1114_v26, %v1113_v17 }
 0x15d   :  { %v1122_v29 = vadd.f32 %v1121_v22, %v1120_v4  ;;  %v1137_v42 = vmul.f32 0.0625, %v1115_v32 }
 0x173   :  { %v1009_v38 = vpop.f32.mrf.mxu0 }
 0x174   :  { %v1052_v39 = vpop.f32.mrf.mxu1 }
 0x175   :  { %v1011_v40 = vpop.f32.mrf.mxu0  ;;  %v1053_v48 = vadd.f32 %v1052_v39, %v1009_v38  ;;  %v1138_v39 = vmul.f32 0.0625, %v1122_v29 }
 0x176   :  { %v1054_v41 = vpop.f32.mrf.mxu1 }
 0x177   :  { %v1013_v46 = vpop.f32.mrf.mxu0  ;;  %v1055_v53 = vadd.f32 %v1054_v41, %v1011_v40  ;;  %v1143_v45 = vadd.f32 1e-05, %v1138_v39 }
 0x178   :  { %v1056_v47 = vpop.f32.mrf.mxu1 }
 0x179   :  { %v1057_v49 = vadd.f32 %v1056_v47, %v1013_v46  ;;  %v1015_v50 = vpop.f32.mrf.mxu0  ;;  %6891 = vrsqrt.f32 %v1143_v45 }
 0x17a   :  { %v1058_v51 = vpop.f32.mrf.mxu1 }
 0x17b   :  { %v1075_v54 = vadd.f32 %v1057_v49, %v1053_v48  ;;  %v1059_v55 = vadd.f32 %v1058_v51, %v1015_v50 }
 0x17d   :  { %v1076_v57 = vrot.slane %v1075_v54, 4  ;;  %v1082_v58 = vadd.f32 %v1059_v55, %v1055_v53 }
 0x17f   :  { %v1077_v60 = vadd.f32 %v1076_v57, %v1075_v54  ;;  %v1083_v61 = vrot.slane %v1082_v58, 4  ;;  %v7031_v54 = vmov 1966171168  }
 0x181   :  { %v1078_v63 = vrot.slane %v1077_v60, 2  ;;  %v1084_v0 = vadd.f32 %v1083_v61, %v1082_v58  ;;  %v7163_v58 = vshrl.u32 %v1159_v56, 7  ;;  %v6620_v56 = vld [vmem:[#allocation5 + $0x2ac] ss:$16 sps:$4 sm:$0xff]  }
 0x183   :  { %v1079_v2 = vadd.f32 %v1078_v63, %v1077_v60  ;;  %v1085_v3 = vrot.slane %v1084_v0, 2  ;;  %v7184_v12 = vsub.s32 0, %v7163_v58 }
 0x185   :  { %v1080_v7 = vrot.slane %v1079_v2, 1  ;;  %v1086_v8 = vadd.f32 %v1085_v3, %v1084_v0 }
 0x186   :  { %v6892_v59 = vpop.eup %6891 }
 0x187   :  { %v1081_v10 = vadd.f32 %v1080_v7, %v1079_v2  ;;  %v1087_v11 = vrot.slane %v1086_v8, 1  ;;  %v1141_v7 = vld [vmem:[%s7406_s2] sm:$0xf] }
 0x189   :  { %v1091_v13 = vmul.f32 0.0625, %v1081_v10  ;;  %v1088_v14 = vadd.f32 %v1087_v11, %v1086_v8  ;;  %v7174_v8 = vsub.s32 3, %v7163_v58  ;;  %v7178_v10 = vsub.s32 1, %v7163_v58  ;;  %v1209_v11 = vld [vmem:[%s7407_s3] sm:$0xf] }
 0x18b   :  { %v7147_v15 = vsub.f32 %v1053_v48, %v1091_v13  ;;  %v7149_v5 = vsub.f32 %v1057_v49, %v1091_v13  ;;  %v1092_v16 = vmul.f32 0.0625, %v1088_v14  ;;  %v1142_v48 = vadd.f32 1e-05, %v1137_v42 }
 0x18c   :  { %v7187_v13 = vsub.s32 2, %v7163_v58  ;;  %v1218_v4 = vrot.slane %v1209_v11, %v7178_v10 }
 0x18d   :  { %v1103_v18 = vmul.f32 %v7147_v15, %v7147_v15  ;;  %v1107_v19 = vmul.f32 %v7149_v5, %v7149_v5  ;;  %v7155_v20 = vsub.f32 %v1055_v53, %v1092_v16  ;;  %v7157_v21 = vsub.f32 %v1059_v55, %v1092_v16 }
 0x18e   :  { %6893 = vrsqrt.f32 %v1142_v48  ;;  %v1157_v55 = vunpack.c.l.s4 %v7031_v54  ;;  %v1226_v16 = vrot.slane %v1209_v11, %v7174_v8  ;;  %v6603_v48 = vld [vmem:[#allocation5 + $0xe8] ss:$16 sps:$4 sm:$0xff]  }
 0x18f   :  { %v1123_v23 = vadd.f32 %v1107_v19, %v1103_v18  ;;  %v1104_v24 = vmul.f32 %v7155_v20, %v7155_v20  ;;  %v1108_v25 = vmul.f32 %v7157_v21, %v7157_v21  ;;  %v6612_v54 = vld [vmem:[#allocation5 + $0x2c8] ss:$16 sps:$4 sm:$0xff]  }
 0x190   :  { %v1158_v57 = vunpack.c.0.s8 %v1157_v55  ;;  %v6617_v55 = vld [vmem:[#allocation5 + $0xac] ss:$16 sps:$4 sm:$0xff]  }
 0x191   :  { %v1124_v27 = vrot.slane %v1123_v23, 4  ;;  %v1130_v28 = vadd.f32 %v1108_v25, %v1104_v24  ;;  %v1222_v24 = vrot.slane %v1209_v11, %v7187_v13 }
 0x192   :  { %v7166_v63 = vsub.s32 %v1158_v57, %v7163_v58  ;;  %v6615_v57 = vld [vmem:[#allocation5 + $0xa8] ss:$16 sps:$4 sm:$0xff]  }
 0x193   :  { %v1125_v30 = vadd.f32 %v1124_v27, %v1123_v23  ;;  %v1131_v31 = vrot.slane %v1130_v28, 4  ;;  %v1214_v23 = vrot.slane %v1209_v11, %v7184_v12  ;;  %v6633_v11 = vld [vmem:[#allocation5 + $0x48] ss:$16 sps:$4 sm:$0xff]  }
 0x195   :  { %v1126_v33 = vrot.slane %v1125_v30, 2  ;;  %v1132_v38 = vadd.f32 %v1131_v31, %v1130_v28 }
 0x197   :  { %v1127_v40 = vadd.f32 %v1126_v33, %v1125_v30  ;;  %v1133_v41 = vrot.slane %v1132_v38, 2 }
 0x199   :  { %v1128_v43 = vrot.slane %v1127_v40, 1  ;;  %v1134_v44 = vadd.f32 %v1133_v41, %v1132_v38 }
 0x19b   :  { %v1129_v46 = vadd.f32 %v1128_v43, %v1127_v40  ;;  %v1135_v47 = vrot.slane %v1134_v44, 1  ;;  %v6894_v60 = vpop.eup %6893 }
 0x19c   :  { %v1154_v62 = vcombine.low %v6894_v60, %v6892_v59  ;;  %v6618_v59 = vld [vmem:[#allocation5 + $0x2a8] ss:$16 sps:$4 sm:$0xff]   ;;  %v6623_v60 = vld [vmem:[#allocation5 + $0x8c] ss:$16 sps:$4 sm:$0xff]  }
 0x19d   :  { %v1139_v49 = vmul.f32 0.0625, %v1129_v46  ;;  %v1136_v50 = vadd.f32 %v1135_v47, %v1134_v44 }
 0x19e   :  { %v1162_v2 = vrot.slane %v1154_v62, %v7166_v63  ;;  %v6621_v62 = vld [vmem:[#allocation5 + $0x88] ss:$16 sps:$4 sm:$0xff]  }
 0x19f   :  { %v1144_v51 = vadd.f32 1e-05, %v1139_v49  ;;  %v1140_v52 = vmul.f32 0.0625, %v1136_v50 }
 0x1a1   :  { %v1145_v53 = vadd.f32 1e-05, %v1140_v52  ;;  %6895 = vrsqrt.f32 %v1144_v51  ;;  %v6611_v51 = vld [vmem:[#allocation5 + $0xcc] ss:$16 sps:$4 sm:$0xff]  }
 0x1a2   :  { %v6614_v52 = vld [vmem:[#allocation5 + $0x2cc] ss:$16 sps:$4 sm:$0xff]  }
 0x1a3   :  { %6897 = vrsqrt.f32 %v1145_v53  ;;  %v6609_v53 = vld [vmem:[#allocation5 + $0xc8] ss:$16 sps:$4 sm:$0xff]  }
 0x1ae   :  { %v6896_v61 = vpop.eup %6895 }
 0x1b0   :  { %v6898_v0 = vpop.eup %6897 }
 0x1b1   :  { %v1155_v1 = vcombine.low %v6896_v61, %v6898_v0  ;;  %v6626_v61 = vld [vmem:[#allocation5 + $0x28c] ss:$16 sps:$4 sm:$0xff]   ;;  %v6624_v0 = vld [vmem:[#allocation5 + $0x288] ss:$16 sps:$4 sm:$0xff]  }
 0x1b3   :  { %v1169_v3 = vrot.slane %v1155_v1, %v7166_v63  ;;  %v6629_v1 = vld [vmem:[#allocation5 + $0x6c] ss:$16 sps:$4 sm:$0xff]  }
 0x1b5   :  { %v1170_v6 = vcombine.low %v1162_v2, %v1169_v3  ;;  %v6632_v2 = vld [vmem:[#allocation5 + $0x26c] ss:$16 sps:$4 sm:$0xff]   ;;  %v6627_v3 = vld [vmem:[#allocation5 + $0x68] ss:$16 sps:$4 sm:$0xff]  }
 0x1b7   :  { %v1177_v9 = vrot.slane %v1170_v6, %v7166_v63  ;;  %v6630_v6 = vld [vmem:[#allocation5 + $0x268] ss:$16 sps:$4 sm:$0xff]  }
 0x1b9   :  { %v1179_v14 = vmul.f32 %v1177_v9, %v1141_v7  ;;  %v6635_v7 = vld [vmem:[#allocation5 + $0x4c] ss:$16 sps:$4 sm:$0xff]  }
 0x1ba   :  { %v6638_v9 = vld [vmem:[#allocation5 + $0x24c] ss:$16 sps:$4 sm:$0xff]  }
 0x1bb   :  { %v1196_v17 = vrot.slane %v1179_v14, %v7174_v8  ;;  %v1188_v18 = vrot.slane %v1179_v14, %v7178_v10  ;;  %v1184_v19 = vrot.slane %v1179_v14, %v7184_v12  ;;  %v1192_v22 = vrot.slane %v1179_v14, %v7187_v13  ;;  %v6636_v14 = vld [vmem:[#allocation5 + $0x248] ss:$16 sps:$4 sm:$0xff]  }
 0x1bd   :  { %v1208_v25 = vmul.f32 %v1196_v17, %v7157_v21  ;;  %v1202_v26 = vmul.f32 %v1188_v18, %v7131_v34  ;;  %v1206_v27 = vmul.f32 %v1188_v18, %v7133_v35  ;;  %v1204_v28 = vmul.f32 %v1196_v17, %v7155_v20  ;;  %v6639_v17 = vld [vmem:[#allocation5 + $0x28] ss:$16 sps:$4 sm:$0xff]  }
 0x1be   :  { %v1201_v29 = vmul.f32 %v1184_v19, %v7135_v36  ;;  %v1205_v30 = vmul.f32 %v1184_v19, %v7137_v37  ;;  %v1203_v31 = vmul.f32 %v1192_v22, %v7147_v15  ;;  %v1207_v32 = vmul.f32 %v1192_v22, %v7149_v5  ;;  %v6606_v5 = vld [vmem:[#allocation5 + $0x2e8] ss:$16 sps:$4 sm:$0xff]   ;;  %v6647_v19 = vld [vmem:[#allocation5 + $0xc] ss:$16 sps:$4 sm:$0xff]  }
 0x1bf   :  { %v1232_v33 = vadd.f32 %v1218_v4, %v1202_v26  ;;  %v1236_v38 = vadd.f32 %v1218_v4, %v1206_v27  ;;  %v1234_v39 = vadd.f32 %v1226_v16, %v1204_v28  ;;  %v1238_v40 = vadd.f32 %v1226_v16, %v1208_v25  ;;  %v6641_v4 = vld [vmem:[#allocation5 + $0x2c] ss:$16 sps:$4 sm:$0xff]   ;;  %v6642_v18 = vld [vmem:[#allocation5 + $0x228] ss:$16 sps:$4 sm:$0xff]  }
 0x1c0   :  { %v1231_v41 = vadd.f32 %v1214_v23, %v1201_v29  ;;  %v1235_v21 = vadd.f32 %v1214_v23, %v1205_v30  ;;  %v1233_v42 = vadd.f32 %v1222_v24, %v1203_v31  ;;  %v1237_v34 = vadd.f32 %v1222_v24, %v1207_v32  ;;  %v6644_v16 = vld [vmem:[#allocation5 + $0x22c] ss:$16 sps:$4 sm:$0xff]   ;;  %v6645_v23 = vld [vmem:[#allocation5 + $0x8] ss:$16 sps:$4 sm:$0xff]  }
 0x1c1   :  { %v1240_v43 = vmax.f32 %v1232_v33, 0.0  ;;  %v1244_v35 = vmax.f32 %v1236_v38, 0.0  ;;  %v1242_v44 = vmax.f32 %v1234_v39, 0.0  ;;  %v1246_v20 = vmax.f32 %v1238_v40, 0.0  ;;  %v6650_v22 = vld [vmem:[#allocation5 + $0x20c] ss:$16 sps:$4 sm:$0xff]  }
 0x1c2   :  { %v1239_v45 = vmax.f32 %v1231_v41, 0.0  ;;  %v1243_v36 = vmax.f32 %v1235_v21, 0.0  ;;  %v1241_v46 = vmax.f32 %v1233_v42, 0.0  ;;  %v1245_v37 = vmax.f32 %v1237_v34, 0.0  ;;  %v6648_v24 = vld [vmem:[#allocation5 + $0x208] ss:$16 sps:$4 sm:$0xff]  }
 0x1c3   :  { %v1248_v47 = vpack.c.bf16 %v1244_v35, %v1240_v43  ;;  %v1250_v15 = vpack.c.bf16 %v1246_v20, %v1242_v44  ;;  %v6653_v25 = vld [vmem:[#allocation5 + $0x1ec] ss:$16 sps:$4 sm:$0xff]   ;;  %v6651_v27 = vld [vmem:[#allocation5 + $0x1e8] ss:$16 sps:$4 sm:$0xff]  }
 0x1c4   :  { %v7205_v49 = vpack.c.bf16 %v1243_v36, %v1239_v45  ;;  %v7207_v50 = vpack.c.bf16 %v1245_v37, %v1241_v46  ;;  %v6656_v26 = vld [vmem:[#allocation5 + $0x3ec] ss:$16 sps:$4 sm:$0xff]   ;;  %v6654_v28 = vld [vmem:[#allocation5 + $0x3e8] ss:$16 sps:$4 sm:$0xff]  }
 0x1c5   :  { %2051 = vmatprep.mubr.bf16.mxu0 %v1248_v47  ;;  %2094 = vmatprep.mubr.bf16.mxu1 %v1250_v15  ;;  %v6659_v29 = vld [vmem:[#allocation5 + $0x1cc] ss:$16 sps:$4 sm:$0xff]   ;;  %v6657_v31 = vld [vmem:[#allocation5 + $0x1c8] ss:$16 sps:$4 sm:$0xff]  }
 0x1c6   :  { %2052 = vmatmul.mubr.bf16.vlgmr.msra.gmra.mxu0 %v7205_v49  ;;  %2095 = vmatmul.mubr.bf16.vlgmr.msra.gmra.mxu1 %v7207_v50  ;;  %v6662_v30 = vld [vmem:[#allocation5 + $0x3cc] ss:$16 sps:$4 sm:$0xff]   ;;  %v6660_v32 = vld [vmem:[#allocation5 + $0x3c8] ss:$16 sps:$4 sm:$0xff]  }
 0x1c7   :  { %2106 = vmatpush1.bf16.msra.mxu0 %v6603_v48  ;;  %2149 = vmatpush1.bf16.msra.mxu1 %v6606_v5  ;;  %v6665_v33 = vld [vmem:[#allocation5 + $0x1ac] ss:$16 sps:$4 sm:$0xff]   ;;  %v6663_v39 = vld [vmem:[#allocation5 + $0x1a8] ss:$16 sps:$4 sm:$0xff]  }
 0x1c8   :  { %2137 = vmatprep.mubr.bf16.mxu0 %v1248_v47  ;;  %2180 = vmatprep.mubr.bf16.mxu1 %v1250_v15  ;;  %v6668_v38 = vld [vmem:[#allocation5 + $0x3ac] ss:$16 sps:$4 sm:$0xff]   ;;  %v6666_v40 = vld [vmem:[#allocation5 + $0x3a8] ss:$16 sps:$4 sm:$0xff]  }
 0x1c9   :  { %2107 = vmatprep.subr.bf16.mxu0 %v6611_v51  ;;  %2150 = vmatprep.subr.bf16.mxu1 %v6614_v52  ;;  %v6671_v41 = vld [vmem:[#allocation5 + $0x18c] ss:$16 sps:$4 sm:$0xff]   ;;  %v6669_v42 = vld [vmem:[#allocation5 + $0x188] ss:$16 sps:$4 sm:$0xff]  }
 0x1ca   :  { %v6674_v21 = vld [vmem:[#allocation5 + $0x38c] ss:$16 sps:$4 sm:$0xff]   ;;  %v6672_v34 = vld [vmem:[#allocation5 + $0x388] ss:$16 sps:$4 sm:$0xff]  }
 0x1cb   :  { %2108 = vmatpush1.bf16.msra.mxu0 %v6609_v53  ;;  %2151 = vmatpush1.bf16.msra.mxu1 %v6612_v54  ;;  %v6677_v43 = vld [vmem:[#allocation5 + $0x16c] ss:$16 sps:$4 sm:$0xff]   ;;  %v6675_v44 = vld [vmem:[#allocation5 + $0x168] ss:$16 sps:$4 sm:$0xff]  }
 0x1cc   :  { %2109 = vmatprep.subr.bf16.mxu0 %v6617_v55  ;;  %2152 = vmatprep.subr.bf16.mxu1 %v6620_v56  ;;  %v6680_v35 = vld [vmem:[#allocation5 + $0x36c] ss:$16 sps:$4 sm:$0xff]   ;;  %v6678_v20 = vld [vmem:[#allocation5 + $0x368] ss:$16 sps:$4 sm:$0xff]   ;;  %v6701_v55 = vld [vmem:[#allocation7 + $0xe4] ss:$16 sps:$4 sm:$0xff]  }
 0x1cd   :  { %v6683_v45 = vld [vmem:[#allocation5 + $0x14c] ss:$16 sps:$4 sm:$0xff]   ;;  %v6681_v46 = vld [vmem:[#allocation5 + $0x148] ss:$16 sps:$4 sm:$0xff]   ;;  %v6704_v56 = vld [vmem:[#allocation7 + $0x2e4] ss:$16 sps:$4 sm:$0xff]  }
 0x1ce   :  { %v6686_v36 = vld [vmem:[#allocation5 + $0x34c] ss:$16 sps:$4 sm:$0xff]   ;;  %v6684_v37 = vld [vmem:[#allocation5 + $0x348] ss:$16 sps:$4 sm:$0xff]  }
 0x1cf   :  { %2110 = vmatpush1.bf16.msra.mxu0 %v6615_v57  ;;  %2153 = vmatpush1.bf16.msra.mxu1 %v6618_v59  ;;  %v6689_v47 = vld [vmem:[#allocation5 + $0x12c] ss:$16 sps:$4 sm:$0xff]   ;;  %v6687_v48 = vld [vmem:[#allocation5 + $0x128] ss:$16 sps:$4 sm:$0xff]   ;;  %v6699_v57 = vld [vmem:[#allocation7 + $0xe0] ss:$16 sps:$4 sm:$0xff]  }
 0x1d0   :  { %2111 = vmatprep.subr.bf16.mxu0 %v6623_v60  ;;  %2154 = vmatprep.subr.bf16.mxu1 %v6626_v61  ;;  %v6692_v15 = vld [vmem:[#allocation5 + $0x32c] ss:$16 sps:$4 sm:$0xff]   ;;  %v6690_v5 = vld [vmem:[#allocation5 + $0x328] ss:$16 sps:$4 sm:$0xff]   ;;  %v6702_v59 = vld [vmem:[#allocation7 + $0x2e0] ss:$16 sps:$4 sm:$0xff]  }
 0x1d1   :  { %v6695_v51 = vld [vmem:[#allocation5 + $0x10c] ss:$16 sps:$4 sm:$0xff]   ;;  %v6693_v53 = vld [vmem:[#allocation5 + $0x108] ss:$16 sps:$4 sm:$0xff]   ;;  %v6707_v60 = vld [vmem:[#allocation7 + $0xc4] ss:$16 sps:$4 sm:$0xff]  }
 0x1d2   :  { %v6698_v52 = vld [vmem:[#allocation5 + $0x30c] ss:$16 sps:$4 sm:$0xff]   ;;  %v6696_v54 = vld [vmem:[#allocation5 + $0x308] ss:$16 sps:$4 sm:$0xff]   ;;  %v6710_v61 = vld [vmem:[#allocation7 + $0x2c4] ss:$16 sps:$4 sm:$0xff]  }
 0x1d3   :  { %2112 = vmatpush1.bf16.msra.mxu0 %v6621_v62  ;;  %2155 = vmatpush1.bf16.msra.mxu1 %v6624_v0  ;;  %v6705_v62 = vld [vmem:[#allocation7 + $0xc0] ss:$16 sps:$4 sm:$0xff]  }
 0x1d4   :  { %2113 = vmatprep.subr.bf16.mxu0 %v6629_v1  ;;  %2156 = vmatprep.subr.bf16.mxu1 %v6632_v2  ;;  %v6708_v0 = vld [vmem:[#allocation7 + $0x2c0] ss:$16 sps:$4 sm:$0xff]   ;;  %v6713_v1 = vld [vmem:[#allocation7 + $0xa4] ss:$16 sps:$4 sm:$0xff]  }
 0x1d5   :  { %v6711_v2 = vld [vmem:[#allocation7 + $0xa0] ss:$16 sps:$4 sm:$0xff]  }
 0x1d7   :  { %2114 = vmatpush1.bf16.msra.mxu0 %v6627_v3  ;;  %2157 = vmatpush1.bf16.msra.mxu1 %v6630_v6  ;;  %v6719_v3 = vld [vmem:[#allocation7 + $0x84] ss:$16 sps:$4 sm:$0xff]  }
 0x1d8   :  { %2115 = vmatprep.subr.bf16.mxu0 %v6635_v7  ;;  %2158 = vmatprep.subr.bf16.mxu1 %v6638_v9  ;;  %v6722_v6 = vld [vmem:[#allocation7 + $0x284] ss:$16 sps:$4 sm:$0xff]   ;;  %v6717_v7 = vld [vmem:[#allocation7 + $0x80] ss:$16 sps:$4 sm:$0xff]  }
 0x1d9   :  { %v6720_v9 = vld [vmem:[#allocation7 + $0x280] ss:$16 sps:$4 sm:$0xff]  }
 0x1db   :  { %2116 = vmatpush1.bf16.msra.mxu0 %v6633_v11  ;;  %2159 = vmatpush1.bf16.msra.mxu1 %v6636_v14  ;;  %v6725_v11 = vld [vmem:[#allocation7 + $0x64] ss:$16 sps:$4 sm:$0xff]  }
 0x1dc   :  { %2117 = vmatprep.subr.bf16.mxu0 %v6641_v4  ;;  %2160 = vmatprep.subr.bf16.mxu1 %v6644_v16  ;;  %v6728_v14 = vld [vmem:[#allocation7 + $0x264] ss:$16 sps:$4 sm:$0xff]   ;;  %v6723_v4 = vld [vmem:[#allocation7 + $0x60] ss:$16 sps:$4 sm:$0xff]  }
 0x1dd   :  { %v6726_v16 = vld [vmem:[#allocation7 + $0x260] ss:$16 sps:$4 sm:$0xff]  }
 0x1df   :  { %2118 = vmatpush1.bf16.msra.mxu0 %v6639_v17  ;;  %2161 = vmatpush1.bf16.msra.mxu1 %v6642_v18  ;;  %v6731_v17 = vld [vmem:[#allocation7 + $0x44] ss:$16 sps:$4 sm:$0xff]  }
 0x1e0   :  { %2119 = vmatprep.subr.bf16.mxu0 %v6647_v19  ;;  %2162 = vmatprep.subr.bf16.mxu1 %v6650_v22  ;;  %v6734_v18 = vld [vmem:[#allocation7 + $0x244] ss:$16 sps:$4 sm:$0xff]   ;;  %v6729_v19 = vld [vmem:[#allocation7 + $0x40] ss:$16 sps:$4 sm:$0xff]  }
 0x1e1   :  { %v6732_v22 = vld [vmem:[#allocation7 + $0x240] ss:$16 sps:$4 sm:$0xff]  }
 0x1e3   :  { %2120 = vmatpush1.bf16.msra.mxu0 %v6645_v23  ;;  %2163 = vmatpush1.bf16.msra.mxu1 %v6648_v24  ;;  %v6737_v23 = vld [vmem:[#allocation7 + $0x24] ss:$16 sps:$4 sm:$0xff]  }
 0x1e4   :  { %2121 = vmatprep.subr.bf16.mxu0 %v6653_v25  ;;  %2164 = vmatprep.subr.bf16.mxu1 %v6656_v26  ;;  %v6740_v24 = vld [vmem:[#allocation7 + $0x224] ss:$16 sps:$4 sm:$0xff]   ;;  %v6735_v25 = vld [vmem:[#allocation7 + $0x20] ss:$16 sps:$4 sm:$0xff]  }
 0x1e5   :  { %v6738_v26 = vld [vmem:[#allocation7 + $0x220] ss:$16 sps:$4 sm:$0xff]  }
 0x1e7   :  { %2122 = vmatpush2.bf16.msra.mxu0 %v6651_v27  ;;  %2165 = vmatpush2.bf16.msra.mxu1 %v6654_v28  ;;  %v6743_v27 = vld [vmem:[#allocation7 + $0x4] ss:$16 sps:$4 sm:$0xff]  }
 0x1e8   :  { %2123 = vmatprep.subr.bf16.mxu0 %v6659_v29  ;;  %2166 = vmatprep.subr.bf16.mxu1 %v6662_v30  ;;  %v6746_v28 = vld [vmem:[#allocation7 + $0x204] ss:$16 sps:$4 sm:$0xff]   ;;  %v6741_v29 = vld [vmem:[#allocation7] ss:$16 sps:$4 sm:$0xff]  }
 0x1e9   :  { %v6744_v30 = vld [vmem:[#allocation7 + $0x200] ss:$16 sps:$4 sm:$0xff]  }
 0x1eb   :  { %2124 = vmatpush2.bf16.msra.mxu0 %v6657_v31  ;;  %2167 = vmatpush2.bf16.msra.mxu1 %v6660_v32  ;;  %v6749_v31 = vld [vmem:[#allocation7 + $0x1e4] ss:$16 sps:$4 sm:$0xff]  }
 0x1ec   :  { %2125 = vmatprep.subr.bf16.mxu0 %v6665_v33  ;;  %2168 = vmatprep.subr.bf16.mxu1 %v6668_v38  ;;  %v6752_v32 = vld [vmem:[#allocation7 + $0x3e4] ss:$16 sps:$4 sm:$0xff]   ;;  %v6747_v33 = vld [vmem:[#allocation7 + $0x1e0] ss:$16 sps:$4 sm:$0xff]  }
 0x1ed   :  { %v6750_v38 = vld [vmem:[#allocation7 + $0x3e0] ss:$16 sps:$4 sm:$0xff]  }
 0x1ef   :  { %2126 = vmatpush2.bf16.msra.mxu0 %v6663_v39  ;;  %2169 = vmatpush2.bf16.msra.mxu1 %v6666_v40  ;;  %v6755_v39 = vld [vmem:[#allocation7 + $0x1c4] ss:$16 sps:$4 sm:$0xff]  }
 0x1f0   :  { %2127 = vmatprep.subr.bf16.mxu0 %v6671_v41  ;;  %2170 = vmatprep.subr.bf16.mxu1 %v6674_v21  ;;  %v6758_v40 = vld [vmem:[#allocation7 + $0x3c4] ss:$16 sps:$4 sm:$0xff]   ;;  %v6753_v41 = vld [vmem:[#allocation7 + $0x1c0] ss:$16 sps:$4 sm:$0xff]  }
 0x1f1   :  { %v6756_v21 = vld [vmem:[#allocation7 + $0x3c0] ss:$16 sps:$4 sm:$0xff]  }
 0x1f3   :  { %2128 = vmatpush2.bf16.msra.mxu0 %v6669_v42  ;;  %2171 = vmatpush2.bf16.msra.mxu1 %v6672_v34  ;;  %v6761_v42 = vld [vmem:[#allocation7 + $0x1a4] ss:$16 sps:$4 sm:$0xff]  }
 0x1f4   :  { %2129 = vmatprep.subr.bf16.mxu0 %v6677_v43  ;;  %2172 = vmatprep.subr.bf16.mxu1 %v6680_v35  ;;  %v6764_v34 = vld [vmem:[#allocation7 + $0x3a4] ss:$16 sps:$4 sm:$0xff]   ;;  %v6759_v43 = vld [vmem:[#allocation7 + $0x1a0] ss:$16 sps:$4 sm:$0xff]  }
 0x1f5   :  { %v6762_v35 = vld [vmem:[#allocation7 + $0x3a0] ss:$16 sps:$4 sm:$0xff]  }
 0x1f7   :  { %2130 = vmatpush2.bf16.msra.mxu0 %v6675_v44  ;;  %2173 = vmatpush2.bf16.msra.mxu1 %v6678_v20  ;;  %v6767_v44 = vld [vmem:[#allocation7 + $0x184] ss:$16 sps:$4 sm:$0xff]  }
 0x1f8   :  { %2131 = vmatprep.subr.bf16.mxu0 %v6683_v45  ;;  %2174 = vmatprep.subr.bf16.mxu1 %v6686_v36  ;;  %v6770_v20 = vld [vmem:[#allocation7 + $0x384] ss:$16 sps:$4 sm:$0xff]   ;;  %v6765_v45 = vld [vmem:[#allocation7 + $0x180] ss:$16 sps:$4 sm:$0xff]  }
 0x1f9   :  { %v6768_v36 = vld [vmem:[#allocation7 + $0x380] ss:$16 sps:$4 sm:$0xff]  }
 0x1fb   :  { %2132 = vmatpush2.bf16.msra.mxu0 %v6681_v46  ;;  %2175 = vmatpush2.bf16.msra.mxu1 %v6684_v37  ;;  %v6773_v46 = vld [vmem:[#allocation7 + $0x164] ss:$16 sps:$4 sm:$0xff]  }
 0x1fc   :  { %2133 = vmatprep.subr.bf16.mxu0 %v6689_v47  ;;  %2176 = vmatprep.subr.bf16.mxu1 %v6692_v15  ;;  %v6776_v37 = vld [vmem:[#allocation7 + $0x364] ss:$16 sps:$4 sm:$0xff]   ;;  %v6771_v47 = vld [vmem:[#allocation7 + $0x160] ss:$16 sps:$4 sm:$0xff]  }
 0x1fd   :  { %v6774_v15 = vld [vmem:[#allocation7 + $0x360] ss:$16 sps:$4 sm:$0xff]  }
 0x1ff   :  { %2134 = vmatpush2.bf16.msra.mxu0 %v6687_v48  ;;  %2177 = vmatpush2.bf16.msra.mxu1 %v6690_v5  ;;  %v6779_v48 = vld [vmem:[#allocation7 + $0x144] ss:$16 sps:$4 sm:$0xff]  }
 0x200   :  { %2135 = vmatprep.subr.bf16.mxu0 %v6695_v51  ;;  %2178 = vmatprep.subr.bf16.mxu1 %v6698_v52  ;;  %v6782_v5 = vld [vmem:[#allocation7 + $0x344] ss:$16 sps:$4 sm:$0xff]   ;;  %v6777_v51 = vld [vmem:[#allocation7 + $0x140] ss:$16 sps:$4 sm:$0xff]  }
 0x201   :  { %v6780_v52 = vld [vmem:[#allocation7 + $0x340] ss:$16 sps:$4 sm:$0xff]  }
 0x203   :  { %2136 = vmatpush2.bf16.msra.mxu0 %v6693_v53  ;;  %2179 = vmatpush2.bf16.msra.mxu1 %v6696_v54  ;;  %v6785_v53 = vld [vmem:[#allocation7 + $0x124] ss:$16 sps:$4 sm:$0xff]  }
 0x204   :  { %3149 = vmatprep.subr.bf16.mxu0 %v6701_v55  ;;  %3192 = vmatprep.subr.bf16.mxu1 %v6704_v56  ;;  %v6788_v54 = vld [vmem:[#allocation7 + $0x324] ss:$16 sps:$4 sm:$0xff]   ;;  %v6783_v55 = vld [vmem:[#allocation7 + $0x120] ss:$16 sps:$4 sm:$0xff]  }
 0x205   :  { %v6786_v56 = vld [vmem:[#allocation7 + $0x320] ss:$16 sps:$4 sm:$0xff]  }
 0x206   :  { %2138 = vmatmul.mubr.bf16.vlgmr.msra.gmra.mxu0 %v7205_v49  ;;  %2181 = vmatmul.mubr.bf16.vlgmr.msra.gmra.mxu1 %v7207_v50  ;;  %v6716_v49 = vld [vmem:[#allocation7 + $0x2a4] ss:$16 sps:$4 sm:$0xff]   ;;  %v6714_v50 = vld [vmem:[#allocation7 + $0x2a0] ss:$16 sps:$4 sm:$0xff]  }
 0x207   :  { %3150 = vmatpush1.bf16.msra.mxu0 %v6699_v57  ;;  %3193 = vmatpush1.bf16.msra.mxu1 %v6702_v59  ;;  %v6791_v57 = vld [vmem:[#allocation7 + $0x104] ss:$16 sps:$4 sm:$0xff]   ;;  %v6789_v59 = vld [vmem:[#allocation7 + $0x100] ss:$16 sps:$4 sm:$0xff]  }
 0x208   :  { %3151 = vmatprep.subr.bf16.mxu0 %v6707_v60  ;;  %3194 = vmatprep.subr.bf16.mxu1 %v6710_v61  ;;  %v6792_v60 = vld [vmem:[#allocation7 + $0x300] ss:$16 sps:$4 sm:$0xff]   ;;  %v6794_v61 = vld [vmem:[#allocation7 + $0x304] ss:$16 sps:$4 sm:$0xff]  }
 0x20b   :  { %3152 = vmatpush1.bf16.msra.mxu0 %v6705_v62  ;;  %3195 = vmatpush1.bf16.msra.mxu1 %v6708_v0 }
 0x20c   :  { %3153 = vmatprep.subr.bf16.mxu0 %v6713_v1  ;;  %3196 = vmatprep.subr.bf16.mxu1 %v6716_v49  ;;  %v6797_v1 = vld [vmem:[#allocation7 + $0xec] ss:$16 sps:$4 sm:$0xff]  }
 0x20d   :  { %v6800_v49 = vld [vmem:[#allocation7 + $0x2ec] ss:$16 sps:$4 sm:$0xff]  }
 0x20f   :  { %3154 = vmatpush1.bf16.msra.mxu0 %v6711_v2  ;;  %3197 = vmatpush1.bf16.msra.mxu1 %v6714_v50 }
 0x210   :  { %3155 = vmatprep.subr.bf16.mxu0 %v6719_v3  ;;  %3198 = vmatprep.subr.bf16.mxu1 %v6722_v6 }
 0x213   :  { %3156 = vmatpush1.bf16.msra.mxu0 %v6717_v7  ;;  %3199 = vmatpush1.bf16.msra.mxu1 %v6720_v9 }
 0x214   :  { %3157 = vmatprep.subr.bf16.mxu0 %v6725_v11  ;;  %3200 = vmatprep.subr.bf16.mxu1 %v6728_v14 }
 0x217   :  { %3158 = vmatpush1.bf16.msra.mxu0 %v6723_v4  ;;  %3201 = vmatpush1.bf16.msra.mxu1 %v6726_v16 }
 0x218   :  { %3159 = vmatprep.subr.bf16.mxu0 %v6731_v17  ;;  %3202 = vmatprep.subr.bf16.mxu1 %v6734_v18 }
 0x21b   :  { %3160 = vmatpush1.bf16.msra.mxu0 %v6729_v19  ;;  %3203 = vmatpush1.bf16.msra.mxu1 %v6732_v22 }
 0x21c   :  { %3161 = vmatprep.subr.bf16.mxu0 %v6737_v23  ;;  %3204 = vmatprep.subr.bf16.mxu1 %v6740_v24 }
 0x21f   :  { %3162 = vmatpush1.bf16.msra.mxu0 %v6735_v25  ;;  %3205 = vmatpush1.bf16.msra.mxu1 %v6738_v26 }
 0x220   :  { %3163 = vmatprep.subr.bf16.mxu0 %v6743_v27  ;;  %3206 = vmatprep.subr.bf16.mxu1 %v6746_v28 }
 0x223   :  { %3164 = vmatpush1.bf16.msra.mxu0 %v6741_v29  ;;  %3207 = vmatpush1.bf16.msra.mxu1 %v6744_v30 }
 0x224   :  { %3165 = vmatprep.subr.bf16.mxu0 %v6749_v31  ;;  %3208 = vmatprep.subr.bf16.mxu1 %v6752_v32 }
 0x227   :  { %3166 = vmatpush2.bf16.msra.mxu0 %v6747_v33  ;;  %3209 = vmatpush2.bf16.msra.mxu1 %v6750_v38 }
 0x228   :  { %3167 = vmatprep.subr.bf16.mxu0 %v6755_v39  ;;  %3210 = vmatprep.subr.bf16.mxu1 %v6758_v40 }
 0x22b   :  { %3168 = vmatpush2.bf16.msra.mxu0 %v6753_v41  ;;  %3211 = vmatpush2.bf16.msra.mxu1 %v6756_v21 }
 0x22c   :  { %3169 = vmatprep.subr.bf16.mxu0 %v6761_v42  ;;  %3212 = vmatprep.subr.bf16.mxu1 %v6764_v34 }
 0x22f   :  { %3170 = vmatpush2.bf16.msra.mxu0 %v6759_v43  ;;  %3213 = vmatpush2.bf16.msra.mxu1 %v6762_v35 }
 0x230   :  { %3171 = vmatprep.subr.bf16.mxu0 %v6767_v44  ;;  %3214 = vmatprep.subr.bf16.mxu1 %v6770_v20 }
 0x233   :  { %3172 = vmatpush2.bf16.msra.mxu0 %v6765_v45  ;;  %3215 = vmatpush2.bf16.msra.mxu1 %v6768_v36 }
 0x234   :  { %3173 = vmatprep.subr.bf16.mxu0 %v6773_v46  ;;  %3216 = vmatprep.subr.bf16.mxu1 %v6776_v37 }
 0x237   :  { %3174 = vmatpush2.bf16.msra.mxu0 %v6771_v47  ;;  %3217 = vmatpush2.bf16.msra.mxu1 %v6774_v15 }
 0x238   :  { %3175 = vmatprep.subr.bf16.mxu0 %v6779_v48  ;;  %3218 = vmatprep.subr.bf16.mxu1 %v6782_v5 }
 0x23b   :  { %3176 = vmatpush2.bf16.msra.mxu0 %v6777_v51  ;;  %3219 = vmatpush2.bf16.msra.mxu1 %v6780_v52 }
 0x23c   :  { %3177 = vmatprep.subr.bf16.mxu0 %v6785_v53  ;;  %3220 = vmatprep.subr.bf16.mxu1 %v6788_v54 }
 0x23f   :  { %3178 = vmatpush2.bf16.msra.mxu0 %v6783_v55  ;;  %3221 = vmatpush2.bf16.msra.mxu1 %v6786_v56 }
 0x240   :  { %3179 = vmatprep.subr.bf16.mxu0 %v6791_v57  ;;  %3222 = vmatprep.subr.bf16.mxu1 %v6794_v61 }
 0x243   :  { %3180 = vmatpush2.bf16.msra.mxu0 %v6789_v59  ;;  %3223 = vmatpush2.bf16.msra.mxu1 %v6792_v60 }
 0x244   :  { %3235 = vmatprep.subr.bf16.mxu0 %v6797_v1  ;;  %3278 = vmatprep.subr.bf16.mxu1 %v6800_v49 }
 0x286   :  { %v2053_v62 = vpop.f32.mrf.mxu0  ;;  %v2096_v0 = vpop.f32.mrf.mxu1 }
 0x287   :  { %v2097_v16 = vadd.f32 %v2096_v0, %v2053_v62 }
 0x288   :  { %v2055_v2 = vpop.f32.mrf.mxu0  ;;  %v2098_v50 = vpop.f32.mrf.mxu1 }
 0x289   :  { %v2099_v4 = vadd.f32 %v2098_v50, %v2055_v2 }
 0x28a   :  { %v2057_v3 = vpop.f32.mrf.mxu0  ;;  %v2100_v6 = vpop.f32.mrf.mxu1 }
 0x28b   :  { %v2101_v14 = vadd.f32 %v2100_v6, %v2057_v3 }
 0x28c   :  { %v2059_v7 = vpop.f32.mrf.mxu0  ;;  %v2102_v9 = vpop.f32.mrf.mxu1 }
 0x28d   :  { %v2103_v11 = vadd.f32 %v2102_v9, %v2059_v7  ;;  %v2191_v18 = vadd.f32 %v2101_v14, %v2097_v16 }
 0x28f   :  { %v2198_v17 = vadd.f32 %v2103_v11, %v2099_v4  ;;  %v2192_v22 = vrot.slane %v2191_v18, 4 }
 0x291   :  { %v2199_v19 = vrot.slane %v2198_v17, 4  ;;  %v2193_v24 = vadd.f32 %v2192_v22, %v2191_v18 }
 0x293   :  { %v2200_v23 = vadd.f32 %v2199_v19, %v2198_v17  ;;  %v2194_v26 = vrot.slane %v2193_v24, 2 }
 0x295   :  { %v2201_v25 = vrot.slane %v2200_v23, 2  ;;  %v2195_v28 = vadd.f32 %v2194_v26, %v2193_v24 }
 0x297   :  { %v2202_v27 = vadd.f32 %v2201_v25, %v2200_v23  ;;  %v2196_v30 = vrot.slane %v2195_v28, 1 }
 0x299   :  { %v2203_v29 = vrot.slane %v2202_v27, 1  ;;  %v2197_v32 = vadd.f32 %v2196_v30, %v2195_v28 }
 0x29b   :  { %v2204_v31 = vadd.f32 %v2203_v29, %v2202_v27  ;;  %v2219_v38 = vmul.f32 0.0625, %v2197_v32 }
 0x29d   :  { %v2220_v33 = vmul.f32 0.0625, %v2204_v31  ;;  %v7217_v41 = vsub.f32 %v2097_v16, %v2219_v38  ;;  %v7219_v21 = vsub.f32 %v2101_v14, %v2219_v38 }
 0x29f   :  { %v7213_v39 = vsub.f32 %v2099_v4, %v2220_v33  ;;  %v7215_v40 = vsub.f32 %v2103_v11, %v2220_v33  ;;  %v2231_v45 = vmul.f32 %v7217_v41, %v7217_v41  ;;  %v2235_v36 = vmul.f32 %v7219_v21, %v7219_v21 }
 0x2a1   :  { %v2232_v44 = vmul.f32 %v7213_v39, %v7213_v39  ;;  %v2236_v20 = vmul.f32 %v7215_v40, %v7215_v40  ;;  %v2239_v55 = vadd.f32 %v2235_v36, %v2231_v45 }
 0x2a3   :  { %v2246_v51 = vadd.f32 %v2236_v20, %v2232_v44  ;;  %v2240_v62 = vrot.slane %v2239_v55, 4 }
 0x2a5   :  { %v2247_v59 = vrot.slane %v2246_v51, 4  ;;  %v2241_v3 = vadd.f32 %v2240_v62, %v2239_v55 }
 0x2a7   :  { %v2248_v49 = vadd.f32 %v2247_v59, %v2246_v51  ;;  %v2242_v4 = vrot.slane %v2241_v3, 2 }
 0x2a9   :  { %v2249_v9 = vrot.slane %v2248_v49, 2  ;;  %v2243_v24 = vadd.f32 %v2242_v4, %v2241_v3 }
 0x2ab   :  { %v2250_v18 = vadd.f32 %v2249_v9, %v2248_v49  ;;  %v2244_v33 = vrot.slane %v2243_v24, 1  ;;  %v2339_v9 = vld [vmem:[%s7410_s6] sm:$0xf] }
 0x2ac   :  { %v2356_v4 = vrot.slane %v2339_v9, %v7174_v8 }
 0x2ad   :  { %v2251_v29 = vrot.slane %v2250_v18, 1  ;;  %v2245_v44 = vadd.f32 %v2244_v33, %v2243_v24  ;;  %v2344_v24 = vrot.slane %v2339_v9, %v7184_v12 }
 0x2c6   :  { %v2139_v42 = vpop.f32.mrf.mxu0  ;;  %v2182_v34 = vpop.f32.mrf.mxu1 }
 0x2c7   :  { %v2183_v47 = vadd.f32 %v2182_v34, %v2139_v42  ;;  %v2252_v34 = vadd.f32 %v2251_v29, %v2250_v18 }
 0x2c8   :  { %v2141_v43 = vpop.f32.mrf.mxu0  ;;  %v2184_v35 = vpop.f32.mrf.mxu1 }
 0x2c9   :  { %v2185_v52 = vadd.f32 %v2184_v35, %v2141_v43  ;;  %v2268_v36 = vmul.f32 0.0625, %v2252_v34 }
 0x2ca   :  { %v2143_v46 = vpop.f32.mrf.mxu0  ;;  %v2186_v37 = vpop.f32.mrf.mxu1 }
 0x2cb   :  { %v2187_v15 = vadd.f32 %v2186_v37, %v2143_v46 }
 0x2cc   :  { %v2145_v48 = vpop.f32.mrf.mxu0  ;;  %v2188_v5 = vpop.f32.mrf.mxu1 }
 0x2cd   :  { %v2205_v53 = vadd.f32 %v2187_v15, %v2183_v47  ;;  %v2189_v54 = vadd.f32 %v2188_v5, %v2145_v48  ;;  %v2273_v5 = vadd.f32 1e-05, %v2268_v36 }
 0x2cf   :  { %v2206_v56 = vrot.slane %v2205_v53, 4  ;;  %v2212_v57 = vadd.f32 %v2189_v54, %v2185_v52  ;;  %6899 = vrsqrt.f32 %v2273_v5 }
 0x2d1   :  { %v2207_v60 = vadd.f32 %v2206_v56, %v2205_v53  ;;  %v2213_v61 = vrot.slane %v2212_v57, 4 }
 0x2d3   :  { %v2208_v0 = vrot.slane %v2207_v60, 2  ;;  %v2214_v1 = vadd.f32 %v2213_v61, %v2212_v57 }
 0x2d5   :  { %v2209_v2 = vadd.f32 %v2208_v0, %v2207_v60  ;;  %v2215_v50 = vrot.slane %v2214_v1, 2 }
 0x2d7   :  { %v2210_v6 = vrot.slane %v2209_v2, 1  ;;  %v2216_v7 = vadd.f32 %v2215_v50, %v2214_v1 }
 0x2d9   :  { %v2211_v11 = vadd.f32 %v2210_v6, %v2209_v2  ;;  %v2217_v14 = vrot.slane %v2216_v7, 1  ;;  %v2271_v6 = vld [vmem:[%s7409_s5] sm:$0xf] }
 0x2db   :  { %v2221_v16 = vmul.f32 0.0625, %v2211_v11  ;;  %v2218_v17 = vadd.f32 %v2217_v14, %v2216_v7  ;;  %v2348_v14 = vrot.slane %v2339_v9, %v7178_v10 }
 0x2dc   :  { %v6900_v60 = vpop.eup %6899 }
 0x2dd   :  { %v7229_v19 = vsub.f32 %v2183_v47, %v2221_v16  ;;  %v7231_v22 = vsub.f32 %v2187_v15, %v2221_v16  ;;  %v2222_v23 = vmul.f32 0.0625, %v2218_v17  ;;  %v2267_v47 = vmul.f32 0.0625, %v2245_v44 }
 0x2df   :  { %v2233_v25 = vmul.f32 %v7229_v19, %v7229_v19  ;;  %v2237_v26 = vmul.f32 %v7231_v22, %v7231_v22  ;;  %v2226_v27 = vsub.f32 %v2185_v52, %v2222_v23  ;;  %v2230_v28 = vsub.f32 %v2189_v54, %v2222_v23 }
 0x2e0   :  { %v2272_v53 = vadd.f32 1e-05, %v2267_v47 }
 0x2e1   :  { %v2253_v30 = vadd.f32 %v2237_v26, %v2233_v25  ;;  %v2234_v31 = vmul.f32 %v2226_v27, %v2226_v27  ;;  %v2238_v32 = vmul.f32 %v2230_v28, %v2230_v28  ;;  %v2352_v25 = vrot.slane %v2339_v9, %v7187_v13  ;;  %v6825_v9 = vld [vmem:[#allocation7 + $0x48] ss:$16 sps:$4 sm:$0xff]  }
 0x2e2   :  { %6901 = vrsqrt.f32 %v2272_v53  ;;  %v6806_v53 = vld [vmem:[#allocation7 + $0x2cc] ss:$16 sps:$4 sm:$0xff]  }
 0x2e3   :  { %v2254_v38 = vrot.slane %v2253_v30, 4  ;;  %v2260_v42 = vadd.f32 %v2238_v32, %v2234_v31 }
 0x2e5   :  { %v2255_v43 = vadd.f32 %v2254_v38, %v2253_v30  ;;  %v2261_v35 = vrot.slane %v2260_v42, 4 }
 0x2e7   :  { %v2256_v20 = vrot.slane %v2255_v43, 2  ;;  %v2262_v45 = vadd.f32 %v2261_v35, %v2260_v42 }
 0x2e9   :  { %v2257_v46 = vadd.f32 %v2256_v20, %v2255_v43  ;;  %v2263_v37 = vrot.slane %v2262_v45, 2 }
 0x2eb   :  { %v2258_v15 = vrot.slane %v2257_v46, 1  ;;  %v2264_v48 = vadd.f32 %v2263_v37, %v2262_v45 }
 0x2ed   :  { %v2259_v51 = vadd.f32 %v2258_v15, %v2257_v46  ;;  %v2265_v52 = vrot.slane %v2264_v48, 1 }
 0x2ef   :  { %v2269_v54 = vmul.f32 0.0625, %v2259_v51  ;;  %v2266_v55 = vadd.f32 %v2265_v52, %v2264_v48  ;;  %v6902_v61 = vpop.eup %6901  ;;  %v6795_v48 = vld [vmem:[#allocation7 + $0xe8] ss:$16 sps:$4 sm:$0xff]   ;;  %v6803_v52 = vld [vmem:[#allocation7 + $0xcc] ss:$16 sps:$4 sm:$0xff]  }
 0x2f0   :  { %v2284_v0 = vcombine.low %v6902_v61, %v6900_v60  ;;  %v6810_v60 = vld [vmem:[#allocation7 + $0x2a8] ss:$16 sps:$4 sm:$0xff]   ;;  %v6815_v61 = vld [vmem:[#allocation7 + $0x8c] ss:$16 sps:$4 sm:$0xff]  }
 0x2f1   :  { %v2274_v56 = vadd.f32 1e-05, %v2269_v54  ;;  %v2270_v57 = vmul.f32 0.0625, %v2266_v55  ;;  %v6801_v54 = vld [vmem:[#allocation7 + $0xc8] ss:$16 sps:$4 sm:$0xff]  }
 0x2f2   :  { %v2292_v2 = vrot.slane %v2284_v0, %v7166_v63  ;;  %v6804_v55 = vld [vmem:[#allocation7 + $0x2c8] ss:$16 sps:$4 sm:$0xff]  }
 0x2f3   :  { %v2275_v59 = vadd.f32 1e-05, %v2270_v57  ;;  %6903 = vrsqrt.f32 %v2274_v56  ;;  %v6809_v56 = vld [vmem:[#allocation7 + $0xac] ss:$16 sps:$4 sm:$0xff]   ;;  %v6813_v0 = vld [vmem:[#allocation7 + $0x88] ss:$16 sps:$4 sm:$0xff]  }
 0x2f4   :  { %v6812_v57 = vld [vmem:[#allocation7 + $0x2ac] ss:$16 sps:$4 sm:$0xff]  }
 0x2f5   :  { %6905 = vrsqrt.f32 %v2275_v59  ;;  %v6807_v59 = vld [vmem:[#allocation7 + $0xa8] ss:$16 sps:$4 sm:$0xff]  }
 0x300   :  { %v6904_v62 = vpop.eup %6903 }
 0x302   :  { %v6906_v1 = vpop.eup %6905 }
 0x303   :  { %v2285_v49 = vcombine.low %v6904_v62, %v6906_v1  ;;  %v6818_v62 = vld [vmem:[#allocation7 + $0x28c] ss:$16 sps:$4 sm:$0xff]   ;;  %v6816_v1 = vld [vmem:[#allocation7 + $0x288] ss:$16 sps:$4 sm:$0xff]  }
 0x305   :  { %v2299_v50 = vrot.slane %v2285_v49, %v7166_v63  ;;  %v6821_v49 = vld [vmem:[#allocation7 + $0x6c] ss:$16 sps:$4 sm:$0xff]  }
 0x307   :  { %v2300_v3 = vcombine.low %v2292_v2, %v2299_v50  ;;  %v6824_v2 = vld [vmem:[#allocation7 + $0x26c] ss:$16 sps:$4 sm:$0xff]   ;;  %v6819_v50 = vld [vmem:[#allocation7 + $0x68] ss:$16 sps:$4 sm:$0xff]  }
 0x309   :  { %v2307_v7 = vrot.slane %v2300_v3, %v7166_v63  ;;  %v6822_v3 = vld [vmem:[#allocation7 + $0x268] ss:$16 sps:$4 sm:$0xff]  }
 0x30b   :  { %v2309_v11 = vmul.f32 %v2307_v7, %v2271_v6  ;;  %v6827_v6 = vld [vmem:[#allocation7 + $0x4c] ss:$16 sps:$4 sm:$0xff]  }
 0x30c   :  { %v6830_v7 = vld [vmem:[#allocation7 + $0x24c] ss:$16 sps:$4 sm:$0xff]  }
 0x30d   :  { %v2326_v16 = vrot.slane %v2309_v11, %v7174_v8  ;;  %v2318_v17 = vrot.slane %v2309_v11, %v7178_v10  ;;  %v2314_v18 = vrot.slane %v2309_v11, %v7184_v12  ;;  %v2322_v23 = vrot.slane %v2309_v11, %v7187_v13  ;;  %v6828_v11 = vld [vmem:[#allocation7 + $0x248] ss:$16 sps:$4 sm:$0xff]  }
 0x30f   :  { %v2338_v26 = vmul.f32 %v2326_v16, %v2230_v28  ;;  %v2332_v29 = vmul.f32 %v2318_v17, %v7213_v39  ;;  %v2336_v30 = vmul.f32 %v2318_v17, %v7215_v40  ;;  %v2334_v31 = vmul.f32 %v2326_v16, %v2226_v27  ;;  %v6831_v16 = vld [vmem:[#allocation7 + $0x28] ss:$16 sps:$4 sm:$0xff]  }
 0x310   :  { %v2331_v32 = vmul.f32 %v2314_v18, %v7217_v41  ;;  %v2335_v33 = vmul.f32 %v2314_v18, %v7219_v21  ;;  %v2333_v38 = vmul.f32 %v2322_v23, %v7229_v19  ;;  %v2337_v42 = vmul.f32 %v2322_v23, %v7231_v22  ;;  %v6798_v22 = vld [vmem:[#allocation7 + $0x2e8] ss:$16 sps:$4 sm:$0xff]   ;;  %v6839_v18 = vld [vmem:[#allocation7 + $0xc] ss:$16 sps:$4 sm:$0xff]  }
 0x311   :  { %v2362_v34 = vadd.f32 %v2348_v14, %v2332_v29  ;;  %v2366_v43 = vadd.f32 %v2348_v14, %v2336_v30  ;;  %v2364_v35 = vadd.f32 %v2356_v4, %v2334_v31  ;;  %v2368_v44 = vadd.f32 %v2356_v4, %v2338_v26  ;;  %v6833_v14 = vld [vmem:[#allocation7 + $0x2c] ss:$16 sps:$4 sm:$0xff]   ;;  %v6834_v17 = vld [vmem:[#allocation7 + $0x228] ss:$16 sps:$4 sm:$0xff]  }
 0x312   :  { %v2361_v20 = vadd.f32 %v2344_v24, %v2331_v32  ;;  %v2365_v45 = vadd.f32 %v2344_v24, %v2335_v33  ;;  %v2363_v28 = vadd.f32 %v2352_v25, %v2333_v38  ;;  %v2367_v36 = vadd.f32 %v2352_v25, %v2337_v42  ;;  %v6836_v4 = vld [vmem:[#allocation7 + $0x22c] ss:$16 sps:$4 sm:$0xff]   ;;  %v6837_v24 = vld [vmem:[#allocation7 + $0x8] ss:$16 sps:$4 sm:$0xff]  }
 0x313   :  { %v2370_v39 = vmax.f32 %v2362_v34, 0.0  ;;  %v2374_v46 = vmax.f32 %v2366_v43, 0.0  ;;  %v2372_v40 = vmax.f32 %v2364_v35, 0.0  ;;  %v2376_v27 = vmax.f32 %v2368_v44, 0.0  ;;  %v6842_v23 = vld [vmem:[#allocation7 + $0x20c] ss:$16 sps:$4 sm:$0xff]  }
 0x314   :  { %v2369_v37 = vmax.f32 %v2361_v20, 0.0  ;;  %v2373_v41 = vmax.f32 %v2365_v45, 0.0  ;;  %v2371_v47 = vmax.f32 %v2363_v28, 0.0  ;;  %v2375_v21 = vmax.f32 %v2367_v36, 0.0  ;;  %v6840_v25 = vld [vmem:[#allocation7 + $0x208] ss:$16 sps:$4 sm:$0xff]  }
 0x315   :  { %v2378_v15 = vpack.c.bf16 %v2374_v46, %v2370_v39  ;;  %v2380_v19 = vpack.c.bf16 %v2376_v27, %v2372_v40  ;;  %v6845_v26 = vld [vmem:[#allocation7 + $0x1ec] ss:$16 sps:$4 sm:$0xff]   ;;  %v6843_v30 = vld [vmem:[#allocation7 + $0x1e8] ss:$16 sps:$4 sm:$0xff]  }
 0x316   :  { %v7260_v5 = vpack.c.bf16 %v2373_v41, %v2369_v37  ;;  %v7262_v51 = vpack.c.bf16 %v2375_v21, %v2371_v47  ;;  %v6848_v29 = vld [vmem:[#allocation7 + $0x3ec] ss:$16 sps:$4 sm:$0xff]   ;;  %v6846_v31 = vld [vmem:[#allocation7 + $0x3e8] ss:$16 sps:$4 sm:$0xff]  }
 0x317   :  { %3181 = vmatprep.mubr.bf16.mxu0 %v2378_v15  ;;  %3224 = vmatprep.mubr.bf16.mxu1 %v2380_v19  ;;  %v6851_v32 = vld [vmem:[#allocation7 + $0x1cc] ss:$16 sps:$4 sm:$0xff]   ;;  %v6849_v38 = vld [vmem:[#allocation7 + $0x1c8] ss:$16 sps:$4 sm:$0xff]  }
 0x318   :  { %3182 = vmatmul.mubr.bf16.vlgmr.msra.gmra.mxu0 %v7260_v5  ;;  %3225 = vmatmul.mubr.bf16.vlgmr.msra.gmra.mxu1 %v7262_v51  ;;  %v6854_v33 = vld [vmem:[#allocation7 + $0x3cc] ss:$16 sps:$4 sm:$0xff]   ;;  %v6852_v42 = vld [vmem:[#allocation7 + $0x3c8] ss:$16 sps:$4 sm:$0xff]  }
 0x319   :  { %3236 = vmatpush1.bf16.msra.mxu0 %v6795_v48  ;;  %3279 = vmatpush1.bf16.msra.mxu1 %v6798_v22  ;;  %v6857_v34 = vld [vmem:[#allocation7 + $0x1ac] ss:$16 sps:$4 sm:$0xff]   ;;  %v6855_v35 = vld [vmem:[#allocation7 + $0x1a8] ss:$16 sps:$4 sm:$0xff]  }
 0x31a   :  { %3267 = vmatprep.mubr.bf16.mxu0 %v2378_v15  ;;  %3310 = vmatprep.mubr.bf16.mxu1 %v2380_v19  ;;  %v6860_v43 = vld [vmem:[#allocation7 + $0x3ac] ss:$16 sps:$4 sm:$0xff]   ;;  %v6858_v44 = vld [vmem:[#allocation7 + $0x3a8] ss:$16 sps:$4 sm:$0xff]  }
 0x31b   :  { %3237 = vmatprep.subr.bf16.mxu0 %v6803_v52  ;;  %3280 = vmatprep.subr.bf16.mxu1 %v6806_v53  ;;  %v6863_v20 = vld [vmem:[#allocation7 + $0x18c] ss:$16 sps:$4 sm:$0xff]   ;;  %v6861_v28 = vld [vmem:[#allocation7 + $0x188] ss:$16 sps:$4 sm:$0xff]  }
 0x31c   :  { %v6866_v45 = vld [vmem:[#allocation7 + $0x38c] ss:$16 sps:$4 sm:$0xff]   ;;  %v6864_v36 = vld [vmem:[#allocation7 + $0x388] ss:$16 sps:$4 sm:$0xff]  }
 0x31d   :  { %3238 = vmatpush1.bf16.msra.mxu0 %v6801_v54  ;;  %3281 = vmatpush1.bf16.msra.mxu1 %v6804_v55  ;;  %v6869_v39 = vld [vmem:[#allocation7 + $0x16c] ss:$16 sps:$4 sm:$0xff]   ;;  %v6867_v40 = vld [vmem:[#allocation7 + $0x168] ss:$16 sps:$4 sm:$0xff]  }
 0x31e   :  { %3239 = vmatprep.subr.bf16.mxu0 %v6809_v56  ;;  %3282 = vmatprep.subr.bf16.mxu1 %v6812_v57  ;;  %v6872_v46 = vld [vmem:[#allocation7 + $0x36c] ss:$16 sps:$4 sm:$0xff]   ;;  %v6870_v27 = vld [vmem:[#allocation7 + $0x368] ss:$16 sps:$4 sm:$0xff]   ;;  %v3567_v56 = vld [vmem:[#allocation8 + $0x1c0] sm:$0xff] }
 0x31f   :  { %v6875_v37 = vld [vmem:[#allocation7 + $0x14c] ss:$16 sps:$4 sm:$0xff]   ;;  %v6873_v47 = vld [vmem:[#allocation7 + $0x148] ss:$16 sps:$4 sm:$0xff]   ;;  %v3571_v57 = vld [vmem:[#allocation8 + $0x1e0] sm:$0xff] }
 0x320   :  { %v6878_v41 = vld [vmem:[#allocation7 + $0x34c] ss:$16 sps:$4 sm:$0xff]   ;;  %v6876_v21 = vld [vmem:[#allocation7 + $0x348] ss:$16 sps:$4 sm:$0xff]  }
 0x321   :  { %3240 = vmatpush1.bf16.msra.mxu0 %v6807_v59  ;;  %3283 = vmatpush1.bf16.msra.mxu1 %v6810_v60  ;;  %v6881_v15 = vld [vmem:[#allocation7 + $0x12c] ss:$16 sps:$4 sm:$0xff]   ;;  %v6879_v48 = vld [vmem:[#allocation7 + $0x128] ss:$16 sps:$4 sm:$0xff]   ;;  %v3695_v59 = vld [vmem:[#allocation8 + $0x5c0] sm:$0xff]  ;;  %v6099_v60 = vcombine.high %v3567_v56, %v3571_v57 }
 0x322   :  { %3241 = vmatprep.subr.bf16.mxu0 %v6815_v61  ;;  %3284 = vmatprep.subr.bf16.mxu1 %v6818_v62  ;;  %v6884_v19 = vld [vmem:[#allocation7 + $0x32c] ss:$16 sps:$4 sm:$0xff]   ;;  %v6882_v22 = vld [vmem:[#allocation7 + $0x328] ss:$16 sps:$4 sm:$0xff]   ;;  %v3699_v61 = vld [vmem:[#allocation8 + $0x5e0] sm:$0xff]  ;;  %v6098_v62 = vcombine.low %v3567_v56, %v3571_v57 }
 0x323   :  { %v6887_v52 = vld [vmem:[#allocation7 + $0x10c] ss:$16 sps:$4 sm:$0xff]   ;;  %v6885_v54 = vld [vmem:[#allocation7 + $0x108] ss:$16 sps:$4 sm:$0xff]   ;;  %v3639_v56 = vld [vmem:[#allocation8 + $0x400] sm:$0xff] }
 0x324   :  { %v6890_v53 = vld [vmem:[#allocation7 + $0x30c] ss:$16 sps:$4 sm:$0xff]   ;;  %v6888_v55 = vld [vmem:[#allocation7 + $0x308] ss:$16 sps:$4 sm:$0xff]  }
 0x325   :  { %3242 = vmatpush1.bf16.msra.mxu0 %v6813_v0  ;;  %3285 = vmatpush1.bf16.msra.mxu1 %v6816_v1  ;;  %v6226_v0 = vcombine.low %v3695_v59, %v3699_v61  ;;  %v6227_v1 = vcombine.high %v3695_v59, %v3699_v61  ;;  %v3643_v59 = vld [vmem:[#allocation8 + $0x420] sm:$0xff] }
 0x326   :  { %3243 = vmatprep.subr.bf16.mxu0 %v6821_v49  ;;  %3286 = vmatprep.subr.bf16.mxu1 %v6824_v2  ;;  %v3559_v49 = vld [vmem:[#allocation8 + $0x180] sm:$0xff]  ;;  %v6170_v61 = vcombine.low %v3639_v56, %v3643_v59 }
 0x327   :  { %v3563_v2 = vld [vmem:[#allocation8 + $0x1a0] sm:$0xff] }
 0x329   :  { %3244 = vmatpush1.bf16.msra.mxu0 %v6819_v50  ;;  %3287 = vmatpush1.bf16.msra.mxu1 %v6822_v3  ;;  %v3687_v50 = vld [vmem:[#allocation8 + $0x580] sm:$0xff]  ;;  %v6091_v3 = vcombine.high %v3559_v49, %v3563_v2 }
 0x32a   :  { %3245 = vmatprep.subr.bf16.mxu0 %v6827_v6  ;;  %3288 = vmatprep.subr.bf16.mxu1 %v6830_v7  ;;  %v3691_v6 = vld [vmem:[#allocation8 + $0x5a0] sm:$0xff] }
 0x32b   :  { %v6218_v7 = vcombine.low %v3687_v50, %v3691_v6 }
 0x32d   :  { %3246 = vmatpush1.bf16.msra.mxu0 %v6825_v9  ;;  %3289 = vmatpush1.bf16.msra.mxu1 %v6828_v11  ;;  %v3551_v9 = vld [vmem:[#allocation8 + $0x140] sm:$0xff] }
 0x32e   :  { %3247 = vmatprep.subr.bf16.mxu0 %v6833_v14  ;;  %3290 = vmatprep.subr.bf16.mxu1 %v6836_v4  ;;  %v3555_v11 = vld [vmem:[#allocation8 + $0x160] sm:$0xff] }
 0x32f   :  { %v3679_v14 = vld [vmem:[#allocation8 + $0x540] sm:$0xff]  ;;  %v6083_v4 = vcombine.high %v3551_v9, %v3555_v11 }
 0x331   :  { %3248 = vmatpush1.bf16.msra.mxu0 %v6831_v16  ;;  %3291 = vmatpush1.bf16.msra.mxu1 %v6834_v17  ;;  %v3683_v16 = vld [vmem:[#allocation8 + $0x560] sm:$0xff]  ;;  %v6082_v17 = vcombine.low %v3551_v9, %v3555_v11 }
 0x332   :  { %3249 = vmatprep.subr.bf16.mxu0 %v6839_v18  ;;  %3292 = vmatprep.subr.bf16.mxu1 %v6842_v23  ;;  %v6210_v18 = vcombine.low %v3679_v14, %v3683_v16  ;;  %v6211_v23 = vcombine.high %v3679_v14, %v3683_v16  ;;  %v3751_v9 = vld [vmem:[#allocation8 + $0x780] sm:$0xff] }
 0x333   :  { %v3755_v14 = vld [vmem:[#allocation8 + $0x7a0] sm:$0xff] }
 0x334   :  { %v6282_v16 = vcombine.low %v3751_v9, %v3755_v14 }
 0x335   :  { %3250 = vmatpush1.bf16.msra.mxu0 %v6837_v24  ;;  %3293 = vmatpush1.bf16.msra.mxu1 %v6840_v25  ;;  %v3543_v24 = vld [vmem:[#allocation8 + $0x100] sm:$0xff] }
 0x336   :  { %3251 = vmatprep.subr.bf16.mxu0 %v6845_v26  ;;  %3294 = vmatprep.subr.bf16.mxu1 %v6848_v29  ;;  %v3547_v25 = vld [vmem:[#allocation8 + $0x120] sm:$0xff] }
 0x337   :  { %v3671_v26 = vld [vmem:[#allocation8 + $0x500] sm:$0xff]  ;;  %v6075_v29 = vcombine.high %v3543_v24, %v3547_v25 }
 0x339   :  { %3252 = vmatpush2.bf16.msra.mxu0 %v6843_v30  ;;  %3295 = vmatpush2.bf16.msra.mxu1 %v6846_v31  ;;  %v3675_v30 = vld [vmem:[#allocation8 + $0x520] sm:$0xff]  ;;  %v6074_v31 = vcombine.low %v3543_v24, %v3547_v25 }
 0x33a   :  { %3253 = vmatprep.subr.bf16.mxu0 %v6851_v32  ;;  %3296 = vmatprep.subr.bf16.mxu1 %v6854_v33  ;;  %v6202_v32 = vcombine.low %v3671_v26, %v3675_v30  ;;  %v6203_v33 = vcombine.high %v3671_v26, %v3675_v30  ;;  %v3743_v24 = vld [vmem:[#allocation8 + $0x740] sm:$0xff] }
 0x33b   :  { %v3747_v26 = vld [vmem:[#allocation8 + $0x760] sm:$0xff] }
 0x33c   :  { %v6274_v30 = vcombine.low %v3743_v24, %v3747_v26 }
 0x33d   :  { %3254 = vmatpush2.bf16.msra.mxu0 %v6849_v38  ;;  %3297 = vmatpush2.bf16.msra.mxu1 %v6852_v42  ;;  %v3535_v38 = vld [vmem:[#allocation8 + $0xc0] sm:$0xff] }
 0x33e   :  { %3255 = vmatprep.subr.bf16.mxu0 %v6857_v34  ;;  %3298 = vmatprep.subr.bf16.mxu1 %v6860_v43  ;;  %v3539_v42 = vld [vmem:[#allocation8 + $0xe0] sm:$0xff] }
 0x33f   :  { %v3663_v34 = vld [vmem:[#allocation8 + $0x4c0] sm:$0xff]  ;;  %v6067_v43 = vcombine.high %v3535_v38, %v3539_v42 }
 0x341   :  { %3256 = vmatpush2.bf16.msra.mxu0 %v6855_v35  ;;  %3299 = vmatpush2.bf16.msra.mxu1 %v6858_v44  ;;  %v3667_v35 = vld [vmem:[#allocation8 + $0x4e0] sm:$0xff]  ;;  %v6066_v44 = vcombine.low %v3535_v38, %v3539_v42 }
 0x342   :  { %3257 = vmatprep.subr.bf16.mxu0 %v6863_v20  ;;  %3300 = vmatprep.subr.bf16.mxu1 %v6866_v45  ;;  %v6194_v20 = vcombine.low %v3663_v34, %v3667_v35  ;;  %v6195_v45 = vcombine.high %v3663_v34, %v3667_v35  ;;  %v3735_v38 = vld [vmem:[#allocation8 + $0x700] sm:$0xff] }
 0x343   :  { %v3739_v34 = vld [vmem:[#allocation8 + $0x720] sm:$0xff] }
 0x344   :  { %v6266_v35 = vcombine.low %v3735_v38, %v3739_v34 }
 0x345   :  { %3258 = vmatpush2.bf16.msra.mxu0 %v6861_v28  ;;  %3301 = vmatpush2.bf16.msra.mxu1 %v6864_v36  ;;  %v3527_v28 = vld [vmem:[#allocation8 + $0x80] sm:$0xff] }
 0x346   :  { %3259 = vmatprep.subr.bf16.mxu0 %v6869_v39  ;;  %3302 = vmatprep.subr.bf16.mxu1 %v6872_v46  ;;  %v3531_v36 = vld [vmem:[#allocation8 + $0xa0] sm:$0xff] }
 0x347   :  { %v3655_v39 = vld [vmem:[#allocation8 + $0x480] sm:$0xff]  ;;  %v6059_v46 = vcombine.high %v3527_v28, %v3531_v36 }
 0x349   :  { %3260 = vmatpush2.bf16.msra.mxu0 %v6867_v40  ;;  %3303 = vmatpush2.bf16.msra.mxu1 %v6870_v27  ;;  %v3659_v40 = vld [vmem:[#allocation8 + $0x4a0] sm:$0xff]  ;;  %v6058_v27 = vcombine.low %v3527_v28, %v3531_v36 }
 0x34a   :  { %3261 = vmatprep.subr.bf16.mxu0 %v6875_v37  ;;  %3304 = vmatprep.subr.bf16.mxu1 %v6878_v41  ;;  %v6186_v37 = vcombine.low %v3655_v39, %v3659_v40  ;;  %v6187_v41 = vcombine.high %v3655_v39, %v3659_v40  ;;  %v3727_v28 = vld [vmem:[#allocation8 + $0x6c0] sm:$0xff] }
 0x34b   :  { %v3731_v39 = vld [vmem:[#allocation8 + $0x6e0] sm:$0xff] }
 0x34c   :  { %v6258_v40 = vcombine.low %v3727_v28, %v3731_v39 }
 0x34d   :  { %3262 = vmatpush2.bf16.msra.mxu0 %v6873_v47  ;;  %3305 = vmatpush2.bf16.msra.mxu1 %v6876_v21  ;;  %v3519_v47 = vld [vmem:[#allocation8 + $0x40] sm:$0xff] }
 0x34e   :  { %3263 = vmatprep.subr.bf16.mxu0 %v6881_v15  ;;  %3306 = vmatprep.subr.bf16.mxu1 %v6884_v19  ;;  %v3523_v21 = vld [vmem:[#allocation8 + $0x60] sm:$0xff] }
 0x34f   :  { %v3647_v15 = vld [vmem:[#allocation8 + $0x440] sm:$0xff]  ;;  %v6051_v19 = vcombine.high %v3519_v47, %v3523_v21 }
 0x351   :  { %3264 = vmatpush2.bf16.msra.mxu0 %v6879_v48  ;;  %3307 = vmatpush2.bf16.msra.mxu1 %v6882_v22  ;;  %v3651_v48 = vld [vmem:[#allocation8 + $0x460] sm:$0xff]  ;;  %v6050_v22 = vcombine.low %v3519_v47, %v3523_v21 }
 0x352   :  { %3265 = vmatprep.subr.bf16.mxu0 %v6887_v52  ;;  %3308 = vmatprep.subr.bf16.mxu1 %v6890_v53  ;;  %v6178_v52 = vcombine.low %v3647_v15, %v3651_v48  ;;  %v6179_v53 = vcombine.high %v3647_v15, %v3651_v48  ;;  %v3719_v47 = vld [vmem:[#allocation8 + $0x680] sm:$0xff] }
 0x353   :  { %v3723_v15 = vld [vmem:[#allocation8 + $0x6a0] sm:$0xff] }
 0x354   :  { %v6250_v48 = vcombine.low %v3719_v47, %v3723_v15 }
 0x355   :  { %3266 = vmatpush2.bf16.msra.mxu0 %v6885_v54  ;;  %3309 = vmatpush2.bf16.msra.mxu1 %v6888_v55  ;;  %v3511_v54 = vld [vmem:[#allocation8] sm:$0xff] }
 0x356   :  { %5089 = vmatprep.subr.bf16.mxu0 %v6099_v60  ;;  %5132 = vmatprep.subr.bf16.mxu1 %v6227_v1  ;;  %v3515_v55 = vld [vmem:[#allocation8 + $0x20] sm:$0xff] }
 0x357   :  { %v6043_v57 = vcombine.high %v3511_v54, %v3515_v55  ;;  %v6042_v60 = vcombine.low %v3511_v54, %v3515_v55  ;;  %v3635_v1 = vld [vmem:[#allocation8 + $0x3e0] sm:$0xff] }
 0x358   :  { %3268 = vmatmul.mubr.bf16.vlgmr.msra.gmra.mxu0 %v7260_v5  ;;  %3311 = vmatmul.mubr.bf16.vlgmr.msra.gmra.mxu1 %v7262_v51  ;;  %v6090_v5 = vcombine.low %v3559_v49, %v3563_v2  ;;  %v6219_v51 = vcombine.high %v3687_v50, %v3691_v6  ;;  %v3759_v49 = vld [vmem:[#allocation8 + $0x7c0] sm:$0xff] }
 0x359   :  { %5090 = vmatpush1.bf16.msra.mxu0 %v6098_v62  ;;  %5133 = vmatpush1.bf16.msra.mxu1 %v6226_v0  ;;  %v6171_v62 = vcombine.high %v3639_v56, %v3643_v59  ;;  %v3631_v0 = vld [vmem:[#allocation8 + $0x3c0] sm:$0xff] }
 0x35a   :  { %5091 = vmatprep.subr.bf16.mxu0 %v6091_v3  ;;  %5134 = vmatprep.subr.bf16.mxu1 %v6219_v51  ;;  %v6163_v2 = vcombine.high %v3631_v0, %v3635_v1  ;;  %v3763_v50 = vld [vmem:[#allocation8 + $0x7e0] sm:$0xff]  ;;  %v6162_v3 = vcombine.low %v3631_v0, %v3635_v1 }
 0x35b   :  { %v6290_v6 = vcombine.low %v3759_v49, %v3763_v50  ;;  %v3627_v51 = vld [vmem:[#allocation8 + $0x3a0] sm:$0xff] }
 0x35c   :  { %v3711_v54 = vld [vmem:[#allocation8 + $0x640] sm:$0xff] }
 0x35d   :  { %5092 = vmatpush1.bf16.msra.mxu0 %v6090_v5  ;;  %5135 = vmatpush1.bf16.msra.mxu1 %v6218_v7  ;;  %v6291_v5 = vcombine.high %v3759_v49, %v3763_v50  ;;  %v3623_v7 = vld [vmem:[#allocation8 + $0x380] sm:$0xff] }
 0x35e   :  { %5093 = vmatprep.subr.bf16.mxu0 %v6083_v4  ;;  %5136 = vmatprep.subr.bf16.mxu1 %v6211_v23  ;;  %v6155_v11 = vcombine.high %v3623_v7, %v3627_v51  ;;  %v6154_v4 = vcombine.low %v3623_v7, %v3627_v51  ;;  %v3619_v23 = vld [vmem:[#allocation8 + $0x360] sm:$0xff]  ;;  %v7268_v7 = vld [vmem:[#allocation8 + $0x1c8] sm:$0xff] }
 0x35f   :  { %v3715_v56 = vld [vmem:[#allocation8 + $0x660] sm:$0xff]  ;;  %v7270_v51 = vld [vmem:[#allocation8 + $0x1e8] sm:$0xff] }
 0x360   :  { %v6242_v59 = vcombine.low %v3711_v54, %v3715_v56  ;;  %v3703_v0 = vld [vmem:[#allocation8 + $0x600] sm:$0xff] }
 0x361   :  { %5094 = vmatpush1.bf16.msra.mxu0 %v6082_v17  ;;  %5137 = vmatpush1.bf16.msra.mxu1 %v6210_v18  ;;  %v6283_v17 = vcombine.high %v3751_v9, %v3755_v14  ;;  %v3615_v18 = vld [vmem:[#allocation8 + $0x340] sm:$0xff]  ;;  %v7272_v9 = vld [vmem:[#allocation8 + $0x5c8] sm:$0xff] }
 0x362   :  { %5095 = vmatprep.subr.bf16.mxu0 %v6075_v29  ;;  %5138 = vmatprep.subr.bf16.mxu1 %v6203_v33  ;;  %v6147_v25 = vcombine.high %v3615_v18, %v3619_v23  ;;  %v6146_v29 = vcombine.low %v3615_v18, %v3619_v23  ;;  %v3611_v33 = vld [vmem:[#allocation8 + $0x320] sm:$0xff]  ;;  %v7276_v14 = vld [vmem:[#allocation8 + $0x5e8] sm:$0xff] }
 0x363   :  { %v3707_v49 = vld [vmem:[#allocation8 + $0x620] sm:$0xff]  ;;  %v6228_v18 = vcombine.low %v7272_v9, %v7276_v14  ;;  %v6229_v23 = vcombine.high %v7272_v9, %v7276_v14 }
 0x365   :  { %5096 = vmatpush1.bf16.msra.mxu0 %v6074_v31  ;;  %5139 = vmatpush1.bf16.msra.mxu1 %v6202_v32  ;;  %v6275_v31 = vcombine.high %v3743_v24, %v3747_v26  ;;  %v3607_v32 = vld [vmem:[#allocation8 + $0x300] sm:$0xff] }
 0x366   :  { %5097 = vmatprep.subr.bf16.mxu0 %v6067_v43  ;;  %5140 = vmatprep.subr.bf16.mxu1 %v6195_v45  ;;  %v6139_v42 = vcombine.high %v3607_v32, %v3611_v33  ;;  %v6138_v43 = vcombine.low %v3607_v32, %v3611_v33  ;;  %v3603_v45 = vld [vmem:[#allocation8 + $0x2e0] sm:$0xff] }
 0x369   :  { %5098 = vmatpush1.bf16.msra.mxu0 %v6066_v44  ;;  %5141 = vmatpush1.bf16.msra.mxu1 %v6194_v20  ;;  %v6267_v44 = vcombine.high %v3735_v38, %v3739_v34  ;;  %v3599_v20 = vld [vmem:[#allocation8 + $0x2c0] sm:$0xff] }
 0x36a   :  { %5099 = vmatprep.subr.bf16.mxu0 %v6059_v46  ;;  %5142 = vmatprep.subr.bf16.mxu1 %v6187_v41  ;;  %v6131_v36 = vcombine.high %v3599_v20, %v3603_v45  ;;  %v6130_v46 = vcombine.low %v3599_v20, %v3603_v45  ;;  %v3595_v41 = vld [vmem:[#allocation8 + $0x2a0] sm:$0xff] }
 0x36d   :  { %5100 = vmatpush1.bf16.msra.mxu0 %v6058_v27  ;;  %5143 = vmatpush1.bf16.msra.mxu1 %v6186_v37  ;;  %v6259_v27 = vcombine.high %v3727_v28, %v3731_v39  ;;  %v3591_v37 = vld [vmem:[#allocation8 + $0x280] sm:$0xff] }
 0x36e   :  { %5101 = vmatprep.subr.bf16.mxu0 %v6051_v19  ;;  %5144 = vmatprep.subr.bf16.mxu1 %v6179_v53  ;;  %v6123_v21 = vcombine.high %v3591_v37, %v3595_v41  ;;  %v6122_v19 = vcombine.low %v3591_v37, %v3595_v41  ;;  %v3587_v53 = vld [vmem:[#allocation8 + $0x260] sm:$0xff] }
 0x371   :  { %5102 = vmatpush1.bf16.msra.mxu0 %v6050_v22  ;;  %5145 = vmatpush1.bf16.msra.mxu1 %v6178_v52  ;;  %v6251_v22 = vcombine.high %v3719_v47, %v3723_v15  ;;  %v3583_v52 = vld [vmem:[#allocation8 + $0x240] sm:$0xff] }
 0x372   :  { %5103 = vmatprep.subr.bf16.mxu0 %v6043_v57  ;;  %5146 = vmatprep.subr.bf16.mxu1 %v6171_v62  ;;  %v6115_v55 = vcombine.high %v3583_v52, %v3587_v53  ;;  %v6114_v57 = vcombine.low %v3583_v52, %v3587_v53  ;;  %v3579_v62 = vld [vmem:[#allocation8 + $0x220] sm:$0xff] }
 0x375   :  { %5104 = vmatpush1.bf16.msra.mxu0 %v6042_v60  ;;  %5147 = vmatpush1.bf16.msra.mxu1 %v6170_v61  ;;  %v6243_v60 = vcombine.high %v3711_v54, %v3715_v56  ;;  %v3575_v61 = vld [vmem:[#allocation8 + $0x200] sm:$0xff] }
 0x376   :  { %5105 = vmatprep.subr.bf16.mxu0 %v6163_v2  ;;  %5148 = vmatprep.subr.bf16.mxu1 %v6291_v5  ;;  %v6107_v1 = vcombine.high %v3575_v61, %v3579_v62  ;;  %v6235_v5 = vcombine.high %v3703_v0, %v3707_v49 }
 0x379   :  { %5106 = vmatpush2.bf16.msra.mxu0 %v6162_v3  ;;  %5149 = vmatpush2.bf16.msra.mxu1 %v6290_v6  ;;  %v6106_v3 = vcombine.low %v3575_v61, %v3579_v62  ;;  %v6234_v6 = vcombine.low %v3703_v0, %v3707_v49 }
 0x37a   :  { %5107 = vmatprep.subr.bf16.mxu0 %v6155_v11  ;;  %5150 = vmatprep.subr.bf16.mxu1 %v6283_v17  ;;  %v6101_v11 = vcombine.high %v7268_v7, %v7270_v51  ;;  %v6100_v17 = vcombine.low %v7268_v7, %v7270_v51 }
 0x37d   :  { %5108 = vmatpush2.bf16.msra.mxu0 %v6154_v4  ;;  %5151 = vmatpush2.bf16.msra.mxu1 %v6282_v16 }
 0x37e   :  { %5109 = vmatprep.subr.bf16.mxu0 %v6147_v25  ;;  %5152 = vmatprep.subr.bf16.mxu1 %v6275_v31 }
 0x381   :  { %5110 = vmatpush2.bf16.msra.mxu0 %v6146_v29  ;;  %5153 = vmatpush2.bf16.msra.mxu1 %v6274_v30 }
 0x382   :  { %5111 = vmatprep.subr.bf16.mxu0 %v6139_v42  ;;  %5154 = vmatprep.subr.bf16.mxu1 %v6267_v44 }
 0x385   :  { %5112 = vmatpush2.bf16.msra.mxu0 %v6138_v43  ;;  %5155 = vmatpush2.bf16.msra.mxu1 %v6266_v35 }
 0x386   :  { %5113 = vmatprep.subr.bf16.mxu0 %v6131_v36  ;;  %5156 = vmatprep.subr.bf16.mxu1 %v6259_v27 }
 0x389   :  { %5114 = vmatpush2.bf16.msra.mxu0 %v6130_v46  ;;  %5157 = vmatpush2.bf16.msra.mxu1 %v6258_v40 }
 0x38a   :  { %5115 = vmatprep.subr.bf16.mxu0 %v6123_v21  ;;  %5158 = vmatprep.subr.bf16.mxu1 %v6251_v22 }
 0x38d   :  { %5116 = vmatpush2.bf16.msra.mxu0 %v6122_v19  ;;  %5159 = vmatpush2.bf16.msra.mxu1 %v6250_v48 }
 0x38e   :  { %5117 = vmatprep.subr.bf16.mxu0 %v6115_v55  ;;  %5160 = vmatprep.subr.bf16.mxu1 %v6243_v60 }
 0x391   :  { %5118 = vmatpush2.bf16.msra.mxu0 %v6114_v57  ;;  %5161 = vmatpush2.bf16.msra.mxu1 %v6242_v59 }
 0x392   :  { %5119 = vmatprep.subr.bf16.mxu0 %v6107_v1  ;;  %5162 = vmatprep.subr.bf16.mxu1 %v6235_v5 }
 0x395   :  { %5120 = vmatpush2.bf16.msra.mxu0 %v6106_v3  ;;  %5163 = vmatpush2.bf16.msra.mxu1 %v6234_v6 }
 0x396   :  { %5175 = vmatprep.subr.bf16.mxu0 %v6101_v11  ;;  %5218 = vmatprep.subr.bf16.mxu1 %v6229_v23 }
 0x3d8   :  { %v3183_v2 = vpop.f32.mrf.mxu0  ;;  %v3226_v50 = vpop.f32.mrf.mxu1 }
 0x3d9   :  { %v3227_v33 = vadd.f32 %v3226_v50, %v3183_v2 }
 0x3da   :  { %v3185_v4 = vpop.f32.mrf.mxu0  ;;  %v3228_v16 = vpop.f32.mrf.mxu1 }
 0x3db   :  { %v3229_v32 = vadd.f32 %v3228_v16, %v3185_v4 }
 0x3dc   :  { %v3187_v24 = vpop.f32.mrf.mxu0  ;;  %v3230_v25 = vpop.f32.mrf.mxu1 }
 0x3dd   :  { %v3231_v31 = vadd.f32 %v3230_v25, %v3187_v24 }
 0x3de   :  { %v3189_v26 = vpop.f32.mrf.mxu0  ;;  %v3232_v29 = vpop.f32.mrf.mxu1 }
 0x3df   :  { %v3233_v30 = vadd.f32 %v3232_v29, %v3189_v26  ;;  %v3321_v42 = vadd.f32 %v3231_v31, %v3227_v33 }
 0x3e1   :  { %v3328_v38 = vadd.f32 %v3233_v30, %v3229_v32  ;;  %v3322_v43 = vrot.slane %v3321_v42, 4 }
 0x3e3   :  { %v3329_v34 = vrot.slane %v3328_v38, 4  ;;  %v3323_v44 = vadd.f32 %v3322_v43, %v3321_v42 }
 0x3e5   :  { %v3330_v35 = vadd.f32 %v3329_v34, %v3328_v38  ;;  %v3324_v45 = vrot.slane %v3323_v44, 2 }
 0x3e7   :  { %v3331_v20 = vrot.slane %v3330_v35, 2  ;;  %v3325_v36 = vadd.f32 %v3324_v45, %v3323_v44 }
 0x3e9   :  { %v3332_v28 = vadd.f32 %v3331_v20, %v3330_v35  ;;  %v3326_v46 = vrot.slane %v3325_v36, 1 }
 0x3eb   :  { %v3333_v39 = vrot.slane %v3332_v28, 1  ;;  %v3327_v27 = vadd.f32 %v3326_v46, %v3325_v36 }
 0x3ed   :  { %v3334_v40 = vadd.f32 %v3333_v39, %v3332_v28  ;;  %v3349_v41 = vmul.f32 0.0625, %v3327_v27 }
 0x3ef   :  { %v3350_v37 = vmul.f32 0.0625, %v3334_v40  ;;  %v7288_v15 = vsub.f32 %v3227_v33, %v3349_v41  ;;  %v7290_v19 = vsub.f32 %v3231_v31, %v3349_v41 }
 0x3f1   :  { %v7284_v47 = vsub.f32 %v3229_v32, %v3350_v37  ;;  %v7286_v21 = vsub.f32 %v3233_v30, %v3350_v37  ;;  %v3361_v56 = vmul.f32 %v7288_v15, %v7288_v15  ;;  %v3365_v57 = vmul.f32 %v7290_v19, %v7290_v19 }
 0x3f3   :  { %v3362_v54 = vmul.f32 %v7284_v47, %v7284_v47  ;;  %v3366_v55 = vmul.f32 %v7286_v21, %v7286_v21  ;;  %v3369_v6 = vadd.f32 %v3365_v57, %v3361_v56 }
 0x3f5   :  { %v3376_v49 = vadd.f32 %v3366_v55, %v3362_v54  ;;  %v3370_v24 = vrot.slane %v3369_v6, 4 }
 0x3f7   :  { %v3377_v4 = vrot.slane %v3376_v49, 4  ;;  %v3371_v32 = vadd.f32 %v3370_v24, %v3369_v6 }
 0x3f9   :  { %v3378_v29 = vadd.f32 %v3377_v4, %v3376_v49  ;;  %v3372_v35 = vrot.slane %v3371_v32, 2 }
 0x3fb   :  { %v3379_v42 = vrot.slane %v3378_v29, 2  ;;  %v3373_v46 = vadd.f32 %v3372_v35, %v3371_v32 }
 0x3fd   :  { %v3380_v45 = vadd.f32 %v3379_v42, %v3378_v29  ;;  %v3374_v54 = vrot.slane %v3373_v46, 1 }
 0x418   :  { %v3269_v48 = vpop.f32.mrf.mxu0  ;;  %v3312_v22 = vpop.f32.mrf.mxu1 }
 0x419   :  { %v3313_v61 = vadd.f32 %v3312_v22, %v3269_v48  ;;  %v3381_v48 = vrot.slane %v3380_v45, 1 }
 0x41a   :  { %v3271_v52 = vpop.f32.mrf.mxu0  ;;  %v3314_v53 = vpop.f32.mrf.mxu1 }
 0x41b   :  { %v3315_v2 = vadd.f32 %v3314_v53, %v3271_v52  ;;  %v3382_v57 = vadd.f32 %v3381_v48, %v3380_v45  ;;  %v3469_v45 = vld [vmem:[%s7413_s9] sm:$0xf] }
 0x41c   :  { %v3273_v59 = vpop.f32.mrf.mxu0  ;;  %v3316_v60 = vpop.f32.mrf.mxu1 }
 0x41d   :  { %v3317_v62 = vadd.f32 %v3316_v60, %v3273_v59 }
 0x41e   :  { %v3275_v0 = vpop.f32.mrf.mxu0  ;;  %v3318_v1 = vpop.f32.mrf.mxu1 }
 0x41f   :  { %v3335_v50 = vadd.f32 %v3317_v62, %v3313_v61  ;;  %v3319_v3 = vadd.f32 %v3318_v1, %v3275_v0  ;;  %v3398_v1 = vmul.f32 0.0625, %v3382_v57 }
 0x421   :  { %v3336_v5 = vrot.slane %v3335_v50, 4  ;;  %v3342_v11 = vadd.f32 %v3319_v3, %v3315_v2 }
 0x423   :  { %v3337_v16 = vadd.f32 %v3336_v5, %v3335_v50  ;;  %v3343_v23 = vrot.slane %v3342_v11, 4 }
 0x425   :  { %v3338_v25 = vrot.slane %v3337_v16, 2  ;;  %v3344_v26 = vadd.f32 %v3343_v23, %v3342_v11 }
 0x427   :  { %v3339_v30 = vadd.f32 %v3338_v25, %v3337_v16  ;;  %v3345_v31 = vrot.slane %v3344_v26, 2 }
 0x429   :  { %v3340_v33 = vrot.slane %v3339_v30, 1  ;;  %v3346_v38 = vadd.f32 %v3345_v31, %v3344_v26 }
 0x42b   :  { %v3341_v34 = vadd.f32 %v3340_v33, %v3339_v30  ;;  %v3347_v43 = vrot.slane %v3346_v38, 1 }
 0x42d   :  { %v3351_v44 = vmul.f32 0.0625, %v3341_v34  ;;  %v3348_v20 = vadd.f32 %v3347_v43, %v3346_v38 }
 0x42f   :  { %v7300_v28 = vsub.f32 %v3313_v61, %v3351_v44  ;;  %v7302_v36 = vsub.f32 %v3317_v62, %v3351_v44  ;;  %v3352_v39 = vmul.f32 0.0625, %v3348_v20  ;;  %v3375_v61 = vadd.f32 %v3374_v54, %v3373_v46  ;;  %v3401_v44 = vld [vmem:[%s7412_s8] sm:$0xf] }
 0x430   :  { %v3486_v46 = vrot.slane %v3469_v45, %v7174_v8 }
 0x431   :  { %v3363_v40 = vmul.f32 %v7300_v28, %v7300_v28  ;;  %v3367_v27 = vmul.f32 %v7302_v36, %v7302_v36  ;;  %v3356_v37 = vsub.f32 %v3315_v2, %v3352_v39  ;;  %v3360_v41 = vsub.f32 %v3319_v3, %v3352_v39 }
 0x432   :  { %v3397_v6 = vmul.f32 0.0625, %v3375_v61  ;;  %v3403_v3 = vadd.f32 1e-05, %v3398_v1 }
 0x433   :  { %v3383_v22 = vadd.f32 %v3367_v27, %v3363_v40  ;;  %v3364_v52 = vmul.f32 %v3356_v37, %v3356_v37  ;;  %v3368_v53 = vmul.f32 %v3360_v41, %v3360_v41  ;;  %v3478_v40 = vrot.slane %v3469_v45, %v7178_v10 }
 0x434   :  { %v3402_v16 = vadd.f32 1e-05, %v3397_v6  ;;  %6907 = vrsqrt.f32 %v3403_v3 }
 0x435   :  { %v3384_v55 = vrot.slane %v3383_v22, 4  ;;  %v3390_v56 = vadd.f32 %v3368_v53, %v3364_v52  ;;  %v3474_v53 = vrot.slane %v3469_v45, %v7184_v12 }
 0x436   :  { %6909 = vrsqrt.f32 %v3402_v16 }
 0x437   :  { %v3385_v59 = vadd.f32 %v3384_v55, %v3383_v22  ;;  %v3391_v60 = vrot.slane %v3390_v56, 4 }
 0x439   :  { %v3386_v62 = vrot.slane %v3385_v59, 2  ;;  %v3392_v0 = vadd.f32 %v3391_v60, %v3390_v56 }
 0x43b   :  { %v3387_v49 = vadd.f32 %v3386_v62, %v3385_v59  ;;  %v3393_v50 = vrot.slane %v3392_v0, 2 }
 0x43d   :  { %v3388_v5 = vrot.slane %v3387_v49, 1  ;;  %v3394_v2 = vadd.f32 %v3393_v50, %v3392_v0 }
 0x43f   :  { %v3389_v11 = vadd.f32 %v3388_v5, %v3387_v49  ;;  %v3395_v4 = vrot.slane %v3394_v2, 1 }
 0x441   :  { %v3399_v23 = vmul.f32 0.0625, %v3389_v11  ;;  %v3396_v24 = vadd.f32 %v3395_v4, %v3394_v2  ;;  %v6908_v30 = vpop.eup %6907  ;;  %v3560_v11 = vld [vmem:[#allocation8 + $0x188] sm:$0xff] }
 0x443   :  { %v3404_v25 = vadd.f32 1e-05, %v3399_v23  ;;  %v3400_v26 = vmul.f32 0.0625, %v3396_v24  ;;  %v6910_v31 = vpop.eup %6909  ;;  %v3688_v23 = vld [vmem:[#allocation8 + $0x588] sm:$0xff] }
 0x444   :  { %v3414_v33 = vcombine.low %v6910_v31, %v6908_v30  ;;  %v3552_v30 = vld [vmem:[#allocation8 + $0x148] sm:$0xff] }
 0x445   :  { %v3405_v29 = vadd.f32 1e-05, %v3400_v26  ;;  %6911 = vrsqrt.f32 %v3404_v25 }
 0x446   :  { %v3422_v34 = vrot.slane %v3414_v33, %v7166_v63  ;;  %v3556_v33 = vld [vmem:[#allocation8 + $0x168] sm:$0xff] }
 0x447   :  { %6913 = vrsqrt.f32 %v3405_v29  ;;  %v6084_v7 = vcombine.low %v3552_v30, %v3556_v33 }
 0x452   :  { %v6912_v32 = vpop.eup %6911 }
 0x454   :  { %v6914_v38 = vpop.eup %6913 }
 0x455   :  { %v3415_v42 = vcombine.low %v6912_v32, %v6914_v38  ;;  %v3680_v38 = vld [vmem:[#allocation8 + $0x548] sm:$0xff] }
 0x457   :  { %v3429_v43 = vrot.slane %v3415_v42, %v7166_v63  ;;  %v3684_v42 = vld [vmem:[#allocation8 + $0x568] sm:$0xff] }
 0x458   :  { %v6212_v51 = vcombine.low %v3680_v38, %v3684_v42 }
 0x459   :  { %v3430_v35 = vcombine.low %v3422_v34, %v3429_v43 }
 0x45b   :  { %v3437_v20 = vrot.slane %v3430_v35, %v7166_v63  ;;  %v3482_v63 = vrot.slane %v3469_v45, %v7187_v13  ;;  %v6085_v35 = vcombine.high %v3552_v30, %v3556_v33  ;;  %v3548_v45 = vld [vmem:[#allocation8 + $0x128] sm:$0xff] }
 0x45c   :  { %v3624_v33 = vld [vmem:[#allocation8 + $0x388] sm:$0xff] }
 0x45d   :  { %v3439_v39 = vmul.f32 %v3437_v20, %v3401_v44  ;;  %v6213_v44 = vcombine.high %v3680_v38, %v3684_v42  ;;  %v3544_v20 = vld [vmem:[#allocation8 + $0x108] sm:$0xff] }
 0x45e   :  { %v6077_v9 = vcombine.high %v3544_v20, %v3548_v45  ;;  %v3628_v38 = vld [vmem:[#allocation8 + $0x3a8] sm:$0xff] }
 0x45f   :  { %v3456_v27 = vrot.slane %v3439_v39, %v7174_v8  ;;  %v3448_v48 = vrot.slane %v3439_v39, %v7178_v10  ;;  %v3444_v22 = vrot.slane %v3439_v39, %v7184_v12  ;;  %v3452_v52 = vrot.slane %v3439_v39, %v7187_v13  ;;  %v3672_v39 = vld [vmem:[#allocation8 + $0x508] sm:$0xff] }
 0x460   :  { %v3752_v42 = vld [vmem:[#allocation8 + $0x788] sm:$0xff] }
 0x461   :  { %v3464_v54 = vmul.f32 %v3456_v27, %v3356_v37  ;;  %v3468_v55 = vmul.f32 %v3456_v27, %v3360_v41  ;;  %v3462_v56 = vmul.f32 %v3448_v48, %v7284_v47  ;;  %v3466_v57 = vmul.f32 %v3448_v48, %v7286_v21  ;;  %v3668_v27 = vld [vmem:[#allocation8 + $0x4e8] sm:$0xff] }
 0x462   :  { %v3461_v59 = vmul.f32 %v3444_v22, %v7288_v15  ;;  %v3465_v60 = vmul.f32 %v3444_v22, %v7290_v19  ;;  %v3463_v61 = vmul.f32 %v3452_v52, %v7300_v28  ;;  %v3467_v62 = vmul.f32 %v3452_v52, %v7302_v36  ;;  %v3564_v15 = vld [vmem:[#allocation8 + $0x1a8] sm:$0xff] }
 0x463   :  { %v3498_v0 = vadd.f32 %v3486_v46, %v3468_v55  ;;  %v3492_v1 = vadd.f32 %v3478_v40, %v3462_v56  ;;  %v3496_v49 = vadd.f32 %v3478_v40, %v3466_v57  ;;  %v3494_v50 = vadd.f32 %v3486_v46, %v3464_v54  ;;  %v3692_v36 = vld [vmem:[#allocation8 + $0x5a8] sm:$0xff] }
 0x464   :  { %v3491_v6 = vadd.f32 %v3474_v53, %v3461_v59  ;;  %v3495_v5 = vadd.f32 %v3474_v53, %v3465_v60  ;;  %v3493_v37 = vadd.f32 %v3482_v63, %v3463_v61  ;;  %v3497_v41 = vadd.f32 %v3482_v63, %v3467_v62  ;;  %v3676_v46 = vld [vmem:[#allocation8 + $0x528] sm:$0xff] }
 0x465   :  { %v3506_v2 = vmax.f32 %v3498_v0, 0.0  ;;  %v3500_v47 = vmax.f32 %v3492_v1, 0.0  ;;  %v3504_v3 = vmax.f32 %v3496_v49, 0.0  ;;  %v3502_v21 = vmax.f32 %v3494_v50, 0.0  ;;  %v3664_v40 = vld [vmem:[#allocation8 + $0x4c8] sm:$0xff] }
 0x466   :  { %v3499_v4 = vmax.f32 %v3491_v6, 0.0  ;;  %v3503_v19 = vmax.f32 %v3495_v5, 0.0  ;;  %v3501_v16 = vmax.f32 %v3493_v37, 0.0  ;;  %v3505_v28 = vmax.f32 %v3497_v41, 0.0  ;;  %v3528_v63 = vld [vmem:[#allocation8 + $0x88] sm:$0xff] }
 0x467   :  { %v7331_v24 = vpack.c.bf16 %v3504_v3, %v3500_v47  ;;  %v7333_v25 = vpack.c.bf16 %v3506_v2, %v3502_v21  ;;  %v6093_v31 = vcombine.high %v3560_v11, %v3564_v15  ;;  %v6221_v32 = vcombine.high %v3688_v23, %v3692_v36  ;;  %v3532_v54 = vld [vmem:[#allocation8 + $0xa8] sm:$0xff] }
 0x468   :  { %v7335_v26 = vpack.c.bf16 %v3503_v19, %v3499_v4  ;;  %v7337_v29 = vpack.c.bf16 %v3505_v28, %v3501_v16  ;;  %v6092_v34 = vcombine.low %v3560_v11, %v3564_v15  ;;  %v6220_v43 = vcombine.low %v3688_v23, %v3692_v36  ;;  %v3656_v55 = vld [vmem:[#allocation8 + $0x488] sm:$0xff] }
 0x469   :  { %5121 = vmatprep.mubr.bf16.mxu0 %v7331_v24  ;;  %5164 = vmatprep.mubr.bf16.mxu1 %v7333_v25  ;;  %v6205_v14 = vcombine.high %v3672_v39, %v3676_v46  ;;  %v6076_v48 = vcombine.low %v3544_v20, %v3548_v45  ;;  %v6204_v22 = vcombine.low %v3672_v39, %v3676_v46  ;;  %v3660_v56 = vld [vmem:[#allocation8 + $0x4a8] sm:$0xff] }
 0x46a   :  { %5122 = vmatmul.mubr.bf16.vlgmr.msra.gmra.mxu0 %v7335_v26  ;;  %5165 = vmatmul.mubr.bf16.vlgmr.msra.gmra.mxu1 %v7337_v29  ;;  %v6197_v53 = vcombine.high %v3664_v40, %v3668_v27  ;;  %v6196_v59 = vcombine.low %v3664_v40, %v3668_v27  ;;  %v6061_v60 = vcombine.high %v3528_v63, %v3532_v54  ;;  %v3520_v62 = vld [vmem:[#allocation8 + $0x48] sm:$0xff] }
 0x46b   :  { %5176 = vmatpush1.bf16.msra.mxu0 %v6100_v17  ;;  %5219 = vmatpush1.bf16.msra.mxu1 %v6228_v18  ;;  %v3536_v17 = vld [vmem:[#allocation8 + $0xc8] sm:$0xff]  ;;  %v6189_v61 = vcombine.high %v3656_v55, %v3660_v56  ;;  %v6060_v50 = vcombine.low %v3528_v63, %v3532_v54  ;;  %v6188_v6 = vcombine.low %v3656_v55, %v3660_v56 }
 0x46c   :  { %5207 = vmatprep.mubr.bf16.mxu0 %v7331_v24  ;;  %5250 = vmatprep.mubr.bf16.mxu1 %v7333_v25  ;;  %v3540_v18 = vld [vmem:[#allocation8 + $0xe8] sm:$0xff] }
 0x46d   :  { %5177 = vmatprep.subr.bf16.mxu0 %v6093_v31  ;;  %5220 = vmatprep.subr.bf16.mxu1 %v6221_v32  ;;  %v6069_v52 = vcombine.high %v3536_v17, %v3540_v18  ;;  %v6068_v57 = vcombine.low %v3536_v17, %v3540_v18  ;;  %v3524_v0 = vld [vmem:[#allocation8 + $0x68] sm:$0xff] }
 0x46e   :  { %v3648_v1 = vld [vmem:[#allocation8 + $0x448] sm:$0xff]  ;;  %v6053_v5 = vcombine.high %v3520_v62, %v3524_v0  ;;  %v6052_v21 = vcombine.low %v3520_v62, %v3524_v0 }
 0x46f   :  { %5178 = vmatpush1.bf16.msra.mxu0 %v6092_v34  ;;  %5221 = vmatpush1.bf16.msra.mxu1 %v6220_v43  ;;  %v3652_v49 = vld [vmem:[#allocation8 + $0x468] sm:$0xff] }
 0x470   :  { %5179 = vmatprep.subr.bf16.mxu0 %v6085_v35  ;;  %5222 = vmatprep.subr.bf16.mxu1 %v6213_v44  ;;  %v6181_v37 = vcombine.high %v3648_v1, %v3652_v49  ;;  %v3512_v41 = vld [vmem:[#allocation8 + $0x8] sm:$0xff]  ;;  %v6180_v11 = vcombine.low %v3648_v1, %v3652_v49  ;;  %v6157_v44 = vcombine.high %v3624_v33, %v3628_v38 }
 0x471   :  { %v3516_v2 = vld [vmem:[#allocation8 + $0x28] sm:$0xff] }
 0x472   :  { %v3640_v47 = vld [vmem:[#allocation8 + $0x408] sm:$0xff]  ;;  %v6045_v15 = vcombine.high %v3512_v41, %v3516_v2  ;;  %v6044_v36 = vcombine.low %v3512_v41, %v3516_v2 }
 0x473   :  { %5180 = vmatpush1.bf16.msra.mxu0 %v6084_v7  ;;  %5223 = vmatpush1.bf16.msra.mxu1 %v6212_v51  ;;  %v3644_v3 = vld [vmem:[#allocation8 + $0x428] sm:$0xff]  ;;  %v6156_v51 = vcombine.low %v3624_v33, %v3628_v38  ;;  %v3569_v38 = vld [vmem:[#allocation8 + $0x1d0] sm:$0xff] }
 0x474   :  { %5181 = vmatprep.subr.bf16.mxu0 %v6077_v9  ;;  %5224 = vmatprep.subr.bf16.mxu1 %v6205_v14  ;;  %v6173_v4 = vcombine.high %v3640_v47, %v3644_v3  ;;  %v3632_v19 = vld [vmem:[#allocation8 + $0x3c8] sm:$0xff]  ;;  %v6172_v30 = vcombine.low %v3640_v47, %v3644_v3 }
 0x475   :  { %v3636_v16 = vld [vmem:[#allocation8 + $0x3e8] sm:$0xff] }
 0x476   :  { %v3760_v28 = vld [vmem:[#allocation8 + $0x7c8] sm:$0xff]  ;;  %v6165_v31 = vcombine.high %v3632_v19, %v3636_v16  ;;  %v6164_v43 = vcombine.low %v3632_v19, %v3636_v16 }
 0x477   :  { %5182 = vmatpush1.bf16.msra.mxu0 %v6076_v48  ;;  %5225 = vmatpush1.bf16.msra.mxu1 %v6204_v22  ;;  %v3764_v23 = vld [vmem:[#allocation8 + $0x7e8] sm:$0xff] }
 0x478   :  { %5183 = vmatprep.subr.bf16.mxu0 %v6069_v52  ;;  %5226 = vmatprep.subr.bf16.mxu1 %v6197_v53  ;;  %v6293_v32 = vcombine.high %v3760_v28, %v3764_v23  ;;  %v3756_v34 = vld [vmem:[#allocation8 + $0x7a8] sm:$0xff]  ;;  %v6292_v35 = vcombine.low %v3760_v28, %v3764_v23 }
 0x479   :  { %v6285_v20 = vcombine.high %v3752_v42, %v3756_v34  ;;  %v3616_v45 = vld [vmem:[#allocation8 + $0x348] sm:$0xff]  ;;  %v6284_v9 = vcombine.low %v3752_v42, %v3756_v34  ;;  %v3573_v42 = vld [vmem:[#allocation8 + $0x1f0] sm:$0xff] }
 0x47a   :  { %v3620_v39 = vld [vmem:[#allocation8 + $0x368] sm:$0xff]  ;;  %v3697_v34 = vld [vmem:[#allocation8 + $0x5d0] sm:$0xff] }
 0x47b   :  { %5184 = vmatpush1.bf16.msra.mxu0 %v6068_v57  ;;  %5227 = vmatpush1.bf16.msra.mxu1 %v6196_v59  ;;  %v3744_v46 = vld [vmem:[#allocation8 + $0x748] sm:$0xff]  ;;  %v6149_v14 = vcombine.high %v3616_v45, %v3620_v39  ;;  %v6148_v22 = vcombine.low %v3616_v45, %v3620_v39  ;;  %v3561_v39 = vld [vmem:[#allocation8 + $0x190] sm:$0xff] }
 0x47c   :  { %5185 = vmatprep.subr.bf16.mxu0 %v6061_v60  ;;  %5228 = vmatprep.subr.bf16.mxu1 %v6189_v61  ;;  %v3748_v7 = vld [vmem:[#allocation8 + $0x768] sm:$0xff] }
 0x47d   :  { %v6277_v17 = vcombine.high %v3744_v46, %v3748_v7  ;;  %v3608_v18 = vld [vmem:[#allocation8 + $0x308] sm:$0xff]  ;;  %v6276_v52 = vcombine.low %v3744_v46, %v3748_v7  ;;  %v3565_v46 = vld [vmem:[#allocation8 + $0x1b0] sm:$0xff] }
 0x47e   :  { %v3612_v40 = vld [vmem:[#allocation8 + $0x328] sm:$0xff]  ;;  %v3689_v7 = vld [vmem:[#allocation8 + $0x590] sm:$0xff] }
 0x47f   :  { %5186 = vmatpush1.bf16.msra.mxu0 %v6060_v50  ;;  %5229 = vmatpush1.bf16.msra.mxu1 %v6188_v6  ;;  %v3736_v27 = vld [vmem:[#allocation8 + $0x708] sm:$0xff]  ;;  %v6141_v53 = vcombine.high %v3608_v18, %v3612_v40  ;;  %v6140_v59 = vcombine.low %v3608_v18, %v3612_v40  ;;  %v3553_v40 = vld [vmem:[#allocation8 + $0x150] sm:$0xff] }
 0x480   :  { %5187 = vmatprep.subr.bf16.mxu0 %v6053_v5  ;;  %5230 = vmatprep.subr.bf16.mxu1 %v6181_v37  ;;  %v3740_v48 = vld [vmem:[#allocation8 + $0x728] sm:$0xff] }
 0x481   :  { %v6269_v63 = vcombine.high %v3736_v27, %v3740_v48  ;;  %v3600_v54 = vld [vmem:[#allocation8 + $0x2c8] sm:$0xff]  ;;  %v6268_v60 = vcombine.low %v3736_v27, %v3740_v48  ;;  %v3557_v27 = vld [vmem:[#allocation8 + $0x170] sm:$0xff] }
 0x482   :  { %v3604_v55 = vld [vmem:[#allocation8 + $0x2e8] sm:$0xff]  ;;  %v3681_v48 = vld [vmem:[#allocation8 + $0x550] sm:$0xff] }
 0x483   :  { %5188 = vmatpush1.bf16.msra.mxu0 %v6052_v21  ;;  %5231 = vmatpush1.bf16.msra.mxu1 %v6180_v11  ;;  %v3728_v56 = vld [vmem:[#allocation8 + $0x6c8] sm:$0xff]  ;;  %v6133_v61 = vcombine.high %v3600_v54, %v3604_v55  ;;  %v6132_v6 = vcombine.low %v3600_v54, %v3604_v55  ;;  %v3545_v55 = vld [vmem:[#allocation8 + $0x110] sm:$0xff] }
 0x484   :  { %5189 = vmatprep.subr.bf16.mxu0 %v6045_v15  ;;  %5232 = vmatprep.subr.bf16.mxu1 %v6173_v4  ;;  %v3732_v57 = vld [vmem:[#allocation8 + $0x6e8] sm:$0xff] }
 0x485   :  { %v6261_v62 = vcombine.high %v3728_v56, %v3732_v57  ;;  %v3592_v0 = vld [vmem:[#allocation8 + $0x288] sm:$0xff]  ;;  %v6260_v5 = vcombine.low %v3728_v56, %v3732_v57  ;;  %v3549_v56 = vld [vmem:[#allocation8 + $0x130] sm:$0xff] }
 0x486   :  { %v3596_v1 = vld [vmem:[#allocation8 + $0x2a8] sm:$0xff]  ;;  %v3673_v57 = vld [vmem:[#allocation8 + $0x510] sm:$0xff] }
 0x487   :  { %5190 = vmatpush1.bf16.msra.mxu0 %v6044_v36  ;;  %5233 = vmatpush1.bf16.msra.mxu1 %v6172_v30  ;;  %v3720_v49 = vld [vmem:[#allocation8 + $0x688] sm:$0xff]  ;;  %v6125_v37 = vcombine.high %v3592_v0, %v3596_v1  ;;  %v6124_v11 = vcombine.low %v3592_v0, %v3596_v1  ;;  %v3537_v1 = vld [vmem:[#allocation8 + $0xd0] sm:$0xff] }
 0x488   :  { %5191 = vmatprep.subr.bf16.mxu0 %v6165_v31  ;;  %5234 = vmatprep.subr.bf16.mxu1 %v6293_v32  ;;  %v3724_v50 = vld [vmem:[#allocation8 + $0x6a8] sm:$0xff] }
 0x489   :  { %v6253_v41 = vcombine.high %v3720_v49, %v3724_v50  ;;  %v3584_v2 = vld [vmem:[#allocation8 + $0x248] sm:$0xff]  ;;  %v6252_v15 = vcombine.low %v3720_v49, %v3724_v50  ;;  %v3541_v49 = vld [vmem:[#allocation8 + $0xf0] sm:$0xff] }
 0x48a   :  { %v3588_v47 = vld [vmem:[#allocation8 + $0x268] sm:$0xff]  ;;  %v3665_v50 = vld [vmem:[#allocation8 + $0x4d0] sm:$0xff] }
 0x48b   :  { %5192 = vmatpush2.bf16.msra.mxu0 %v6164_v43  ;;  %5235 = vmatpush2.bf16.msra.mxu1 %v6292_v35  ;;  %v3712_v3 = vld [vmem:[#allocation8 + $0x648] sm:$0xff]  ;;  %v6117_v4 = vcombine.high %v3584_v2, %v3588_v47  ;;  %v6116_v30 = vcombine.low %v3584_v2, %v3588_v47  ;;  %v3701_v43 = vld [vmem:[#allocation8 + $0x5f0] sm:$0xff] }
 0x48c   :  { %5193 = vmatprep.subr.bf16.mxu0 %v6157_v44  ;;  %5236 = vmatprep.subr.bf16.mxu1 %v6285_v20  ;;  %v3716_v21 = vld [vmem:[#allocation8 + $0x668] sm:$0xff]  ;;  %v6103_v20 = vcombine.high %v3569_v38, %v3573_v42  ;;  %v6231_v45 = vcombine.high %v3697_v34, %v3701_v43  ;;  %v3529_v47 = vld [vmem:[#allocation8 + $0x90] sm:$0xff] }
 0x48d   :  { %v6245_v19 = vcombine.high %v3712_v3, %v3716_v21  ;;  %v3576_v16 = vld [vmem:[#allocation8 + $0x208] sm:$0xff]  ;;  %v6244_v31 = vcombine.low %v3712_v3, %v3716_v21  ;;  %v3533_v3 = vld [vmem:[#allocation8 + $0xb0] sm:$0xff] }
 0x48e   :  { %v3580_v28 = vld [vmem:[#allocation8 + $0x228] sm:$0xff]  ;;  %v3657_v21 = vld [vmem:[#allocation8 + $0x490] sm:$0xff] }
 0x48f   :  { %5194 = vmatpush2.bf16.msra.mxu0 %v6156_v51  ;;  %5237 = vmatpush2.bf16.msra.mxu1 %v6284_v9  ;;  %v3704_v23 = vld [vmem:[#allocation8 + $0x608] sm:$0xff]  ;;  %v6109_v32 = vcombine.high %v3576_v16, %v3580_v28  ;;  %v6108_v35 = vcombine.low %v3576_v16, %v3580_v28  ;;  %v3693_v51 = vld [vmem:[#allocation8 + $0x5b0] sm:$0xff]  ;;  %v6102_v9 = vcombine.low %v3569_v38, %v3573_v42 }
 0x490   :  { %5195 = vmatprep.subr.bf16.mxu0 %v6149_v14  ;;  %5238 = vmatprep.subr.bf16.mxu1 %v6277_v17  ;;  %v3708_v36 = vld [vmem:[#allocation8 + $0x628] sm:$0xff]  ;;  %v6230_v14 = vcombine.low %v3697_v34, %v3701_v43  ;;  %v6095_v17 = vcombine.high %v3561_v39, %v3565_v46  ;;  %v6223_v18 = vcombine.high %v3689_v7, %v3693_v51  ;;  %v3521_v28 = vld [vmem:[#allocation8 + $0x50] sm:$0xff] }
 0x491   :  { %v6237_v33 = vcombine.high %v3704_v23, %v3708_v36  ;;  %v6236_v44 = vcombine.low %v3704_v23, %v3708_v36  ;;  %v3525_v23 = vld [vmem:[#allocation8 + $0x70] sm:$0xff] }
 0x492   :  { %v3649_v36 = vld [vmem:[#allocation8 + $0x450] sm:$0xff] }
 0x493   :  { %5196 = vmatpush2.bf16.msra.mxu0 %v6148_v22  ;;  %5239 = vmatpush2.bf16.msra.mxu1 %v6276_v52  ;;  %v3685_v22 = vld [vmem:[#allocation8 + $0x570] sm:$0xff]  ;;  %v6094_v52 = vcombine.low %v3561_v39, %v3565_v46 }
 0x494   :  { %5197 = vmatprep.subr.bf16.mxu0 %v6141_v53  ;;  %5240 = vmatprep.subr.bf16.mxu1 %v6269_v63  ;;  %v6222_v53 = vcombine.low %v3689_v7, %v3693_v51  ;;  %v6087_v63 = vcombine.high %v3553_v40, %v3557_v27  ;;  %v6215_v54 = vcombine.high %v3681_v48, %v3685_v22  ;;  %v3513_v42 = vld [vmem:[#allocation8 + $0x10] sm:$0xff] }
 0x495   :  { %v3517_v34 = vld [vmem:[#allocation8 + $0x30] sm:$0xff] }
 0x496   :  { %v3641_v43 = vld [vmem:[#allocation8 + $0x410] sm:$0xff] }
 0x497   :  { %5198 = vmatpush2.bf16.msra.mxu0 %v6140_v59  ;;  %5241 = vmatpush2.bf16.msra.mxu1 %v6268_v60  ;;  %v3677_v59 = vld [vmem:[#allocation8 + $0x530] sm:$0xff]  ;;  %v6086_v60 = vcombine.low %v3553_v40, %v3557_v27 }
 0x498   :  { %5199 = vmatprep.subr.bf16.mxu0 %v6133_v61  ;;  %5242 = vmatprep.subr.bf16.mxu1 %v6261_v62  ;;  %v6214_v61 = vcombine.low %v3681_v48, %v3685_v22  ;;  %v6079_v62 = vcombine.high %v3545_v55, %v3549_v56  ;;  %v6207_v0 = vcombine.high %v3673_v57, %v3677_v59  ;;  %v3633_v46 = vld [vmem:[#allocation8 + $0x3d0] sm:$0xff] }
 0x499   :  { %v3637_v7 = vld [vmem:[#allocation8 + $0x3f0] sm:$0xff] }
 0x49a   :  { %v3761_v51 = vld [vmem:[#allocation8 + $0x7d0] sm:$0xff] }
 0x49b   :  { %5200 = vmatpush2.bf16.msra.mxu0 %v6132_v6  ;;  %5243 = vmatpush2.bf16.msra.mxu1 %v6260_v5  ;;  %v3669_v6 = vld [vmem:[#allocation8 + $0x4f0] sm:$0xff]  ;;  %v6078_v5 = vcombine.low %v3545_v55, %v3549_v56 }
 0x49c   :  { %5201 = vmatprep.subr.bf16.mxu0 %v6125_v37  ;;  %5244 = vmatprep.subr.bf16.mxu1 %v6253_v41  ;;  %v6206_v37 = vcombine.low %v3673_v57, %v3677_v59  ;;  %v6071_v41 = vcombine.high %v3537_v1, %v3541_v49  ;;  %v6199_v2 = vcombine.high %v3665_v50, %v3669_v6  ;;  %v3625_v27 = vld [vmem:[#allocation8 + $0x390] sm:$0xff] }
 0x49d   :  { %v3629_v48 = vld [vmem:[#allocation8 + $0x3b0] sm:$0xff] }
 0x49e   :  { %v3753_v22 = vld [vmem:[#allocation8 + $0x790] sm:$0xff] }
 0x49f   :  { %5202 = vmatpush2.bf16.msra.mxu0 %v6124_v11  ;;  %5245 = vmatpush2.bf16.msra.mxu1 %v6252_v15  ;;  %v3661_v11 = vld [vmem:[#allocation8 + $0x4b0] sm:$0xff]  ;;  %v6070_v15 = vcombine.low %v3537_v1, %v3541_v49 }
 0x4a0   :  { %5203 = vmatprep.subr.bf16.mxu0 %v6117_v4  ;;  %5246 = vmatprep.subr.bf16.mxu1 %v6245_v19  ;;  %v6198_v4 = vcombine.low %v3665_v50, %v3669_v6  ;;  %v6063_v19 = vcombine.high %v3529_v47, %v3533_v3  ;;  %v6191_v16 = vcombine.high %v3657_v21, %v3661_v11  ;;  %v3617_v56 = vld [vmem:[#allocation8 + $0x350] sm:$0xff] }
 0x4a1   :  { %v3621_v57 = vld [vmem:[#allocation8 + $0x370] sm:$0xff] }
 0x4a2   :  { %v3745_v59 = vld [vmem:[#allocation8 + $0x750] sm:$0xff] }
 0x4a3   :  { %5204 = vmatpush2.bf16.msra.mxu0 %v6116_v30  ;;  %5247 = vmatpush2.bf16.msra.mxu1 %v6244_v31  ;;  %v3653_v30 = vld [vmem:[#allocation8 + $0x470] sm:$0xff]  ;;  %v6062_v31 = vcombine.low %v3529_v47, %v3533_v3 }
 0x4a4   :  { %5205 = vmatprep.subr.bf16.mxu0 %v6109_v32  ;;  %5248 = vmatprep.subr.bf16.mxu1 %v6237_v33  ;;  %v6190_v32 = vcombine.low %v3657_v21, %v3661_v11  ;;  %v6055_v33 = vcombine.high %v3521_v28, %v3525_v23  ;;  %v6183_v38 = vcombine.high %v3649_v36, %v3653_v30  ;;  %v3609_v49 = vld [vmem:[#allocation8 + $0x310] sm:$0xff] }
 0x4a5   :  { %v3613_v50 = vld [vmem:[#allocation8 + $0x330] sm:$0xff] }
 0x4a6   :  { %v3737_v6 = vld [vmem:[#allocation8 + $0x710] sm:$0xff] }
 0x4a7   :  { %5206 = vmatpush2.bf16.msra.mxu0 %v6108_v35  ;;  %5249 = vmatpush2.bf16.msra.mxu1 %v6236_v44  ;;  %v3645_v35 = vld [vmem:[#allocation8 + $0x430] sm:$0xff]  ;;  %v6054_v44 = vcombine.low %v3521_v28, %v3525_v23 }
 0x4a8   :  { %5261 = vmatprep.subr.bf16.mxu0 %v6103_v20  ;;  %5304 = vmatprep.subr.bf16.mxu1 %v6231_v45  ;;  %v6182_v20 = vcombine.low %v3649_v36, %v3653_v30  ;;  %v6047_v45 = vcombine.high %v3513_v42, %v3517_v34  ;;  %v6175_v39 = vcombine.high %v3641_v43, %v3645_v35  ;;  %v3601_v3 = vld [vmem:[#allocation8 + $0x2d0] sm:$0xff] }
 0x4a9   :  { %v3605_v21 = vld [vmem:[#allocation8 + $0x2f0] sm:$0xff] }
 0x4aa   :  { %5208 = vmatmul.mubr.bf16.vlgmr.msra.gmra.mxu0 %v7335_v26  ;;  %5251 = vmatmul.mubr.bf16.vlgmr.msra.gmra.mxu1 %v7337_v29  ;;  %v3729_v11 = vld [vmem:[#allocation8 + $0x6d0] sm:$0xff] }
 0x4ab   :  { %5262 = vmatpush1.bf16.msra.mxu0 %v6102_v9  ;;  %5293 = vmatprep.mubr.bf16.mxu0 %v7331_v24  ;;  %v3765_v9 = vld [vmem:[#allocation8 + $0x7f0] sm:$0xff] }
 0x4ac   :  { %5305 = vmatpush1.bf16.msra.mxu1 %v6230_v14  ;;  %5336 = vmatprep.mubr.bf16.mxu1 %v7333_v25  ;;  %v6046_v14 = vcombine.low %v3513_v42, %v3517_v34  ;;  %v6295_v40 = vcombine.high %v3761_v51, %v3765_v9  ;;  %v3593_v23 = vld [vmem:[#allocation8 + $0x290] sm:$0xff] }
 0x4ad   :  { %5263 = vmatprep.subr.bf16.mxu0 %v6095_v17  ;;  %5306 = vmatprep.subr.bf16.mxu1 %v6223_v18  ;;  %v6174_v17 = vcombine.low %v3641_v43, %v3645_v35  ;;  %v6167_v18 = vcombine.high %v3633_v46, %v3637_v7  ;;  %v3597_v36 = vld [vmem:[#allocation8 + $0x2b0] sm:$0xff] }
 0x4ae   :  { %v3721_v30 = vld [vmem:[#allocation8 + $0x690] sm:$0xff] }
 0x4af   :  { %5264 = vmatpush1.bf16.msra.mxu0 %v6094_v52  ;;  %v3757_v52 = vld [vmem:[#allocation8 + $0x7b0] sm:$0xff] }
 0x4b0   :  { %5307 = vmatpush1.bf16.msra.mxu1 %v6222_v53  ;;  %5265 = vmatprep.subr.bf16.mxu0 %v6087_v63  ;;  %v6166_v53 = vcombine.low %v3633_v46, %v3637_v7  ;;  %v6294_v63 = vcombine.low %v3761_v51, %v3765_v9  ;;  %v6287_v55 = vcombine.high %v3753_v22, %v3757_v52  ;;  %v3585_v34 = vld [vmem:[#allocation8 + $0x250] sm:$0xff] }
 0x4b1   :  { %5308 = vmatprep.subr.bf16.mxu1 %v6215_v54  ;;  %v6159_v54 = vcombine.high %v3625_v27, %v3629_v48  ;;  %v3589_v43 = vld [vmem:[#allocation8 + $0x270] sm:$0xff] }
 0x4b2   :  { %v3713_v35 = vld [vmem:[#allocation8 + $0x650] sm:$0xff] }
 0x4b3   :  { %5266 = vmatpush1.bf16.msra.mxu0 %v6086_v60  ;;  %v3749_v60 = vld [vmem:[#allocation8 + $0x770] sm:$0xff] }
 0x4b4   :  { %5309 = vmatpush1.bf16.msra.mxu1 %v6214_v61  ;;  %5267 = vmatprep.subr.bf16.mxu0 %v6079_v62  ;;  %v6158_v61 = vcombine.low %v3625_v27, %v3629_v48  ;;  %v6286_v62 = vcombine.low %v3753_v22, %v3757_v52  ;;  %v6279_v1 = vcombine.high %v3745_v59, %v3749_v60  ;;  %v3577_v7 = vld [vmem:[#allocation8 + $0x210] sm:$0xff]  ;;  %v3570_v48 = vld [vmem:[#allocation8 + $0x1d8] sm:$0xff] }
 0x4b5   :  { %5310 = vmatprep.subr.bf16.mxu1 %v6207_v0  ;;  %v6151_v0 = vcombine.high %v3617_v56, %v3621_v57  ;;  %v3581_v51 = vld [vmem:[#allocation8 + $0x230] sm:$0xff]  ;;  %v3574_v22 = vld [vmem:[#allocation8 + $0x1f8] sm:$0xff] }
 0x4b6   :  { %v3705_v9 = vld [vmem:[#allocation8 + $0x610] sm:$0xff]  ;;  %v3698_v52 = vld [vmem:[#allocation8 + $0x5d8] sm:$0xff] }
 0x4b7   :  { %5268 = vmatpush1.bf16.msra.mxu0 %v6078_v5  ;;  %v3741_v5 = vld [vmem:[#allocation8 + $0x730] sm:$0xff] }
 0x4b8   :  { %5311 = vmatpush1.bf16.msra.mxu1 %v6206_v37  ;;  %5269 = vmatprep.subr.bf16.mxu0 %v6071_v41  ;;  %v6150_v37 = vcombine.low %v3617_v56, %v3621_v57  ;;  %v6278_v41 = vcombine.low %v3745_v59, %v3749_v60  ;;  %v6271_v47 = vcombine.high %v3737_v6, %v3741_v5  ;;  %v3562_v57 = vld [vmem:[#allocation8 + $0x198] sm:$0xff] }
 0x4b9   :  { %5312 = vmatprep.subr.bf16.mxu1 %v6199_v2  ;;  %v6143_v2 = vcombine.high %v3609_v49, %v3613_v50  ;;  %v3566_v59 = vld [vmem:[#allocation8 + $0x1b8] sm:$0xff]  ;;  %v6104_v60 = vcombine.low %v3570_v48, %v3574_v22 }
 0x4bb   :  { %5270 = vmatpush1.bf16.msra.mxu0 %v6070_v15  ;;  %v3733_v15 = vld [vmem:[#allocation8 + $0x6f0] sm:$0xff] }
 0x4bc   :  { %5313 = vmatpush1.bf16.msra.mxu1 %v6198_v4  ;;  %5271 = vmatprep.subr.bf16.mxu0 %v6063_v19  ;;  %v6142_v4 = vcombine.low %v3609_v49, %v3613_v50  ;;  %v6270_v19 = vcombine.low %v3737_v6, %v3741_v5  ;;  %v6263_v28 = vcombine.high %v3729_v11, %v3733_v15  ;;  %v3554_v49 = vld [vmem:[#allocation8 + $0x158] sm:$0xff] }
 0x4bd   :  { %5314 = vmatprep.subr.bf16.mxu1 %v6191_v16  ;;  %v6135_v16 = vcombine.high %v3601_v3, %v3605_v21  ;;  %v3558_v50 = vld [vmem:[#allocation8 + $0x178] sm:$0xff] }
 0x4be   :  { %v3682_v5 = vld [vmem:[#allocation8 + $0x558] sm:$0xff] }
 0x4bf   :  { %5272 = vmatpush1.bf16.msra.mxu0 %v6062_v31  ;;  %v3725_v31 = vld [vmem:[#allocation8 + $0x6b0] sm:$0xff] }
 0x4c0   :  { %5315 = vmatpush1.bf16.msra.mxu1 %v6190_v32  ;;  %5273 = vmatprep.subr.bf16.mxu0 %v6055_v33  ;;  %v6134_v32 = vcombine.low %v3601_v3, %v3605_v21  ;;  %v6262_v33 = vcombine.low %v3729_v11, %v3733_v15  ;;  %v6255_v42 = vcombine.high %v3721_v30, %v3725_v31  ;;  %v3546_v21 = vld [vmem:[#allocation8 + $0x118] sm:$0xff] }
 0x4c1   :  { %5316 = vmatprep.subr.bf16.mxu1 %v6183_v38  ;;  %v6127_v38 = vcombine.high %v3593_v23, %v3597_v36  ;;  %v3550_v11 = vld [vmem:[#allocation8 + $0x138] sm:$0xff] }
 0x4c2   :  { %v3674_v15 = vld [vmem:[#allocation8 + $0x518] sm:$0xff] }
 0x4c3   :  { %5274 = vmatpush1.bf16.msra.mxu0 %v6054_v44  ;;  %v3717_v44 = vld [vmem:[#allocation8 + $0x670] sm:$0xff] }
 0x4c4   :  { %5317 = vmatpush1.bf16.msra.mxu1 %v6182_v20  ;;  %5275 = vmatprep.subr.bf16.mxu0 %v6047_v45  ;;  %v6126_v20 = vcombine.low %v3593_v23, %v3597_v36  ;;  %v6254_v45 = vcombine.low %v3721_v30, %v3725_v31  ;;  %v6247_v46 = vcombine.high %v3713_v35, %v3717_v44  ;;  %v3538_v23 = vld [vmem:[#allocation8 + $0xd8] sm:$0xff] }
 0x4c5   :  { %5318 = vmatprep.subr.bf16.mxu1 %v6175_v39  ;;  %v6119_v39 = vcombine.high %v3585_v34, %v3589_v43  ;;  %v3542_v36 = vld [vmem:[#allocation8 + $0xf8] sm:$0xff] }
 0x4c6   :  { %v3666_v30 = vld [vmem:[#allocation8 + $0x4d8] sm:$0xff] }
 0x4c7   :  { %5276 = vmatpush1.bf16.msra.mxu0 %v6046_v14  ;;  %v3709_v14 = vld [vmem:[#allocation8 + $0x630] sm:$0xff]  ;;  %v3670_v31 = vld [vmem:[#allocation8 + $0x4f8] sm:$0xff] }
 0x4c8   :  { %5319 = vmatpush1.bf16.msra.mxu1 %v6174_v17  ;;  %5277 = vmatprep.subr.bf16.mxu0 %v6167_v18  ;;  %v6118_v17 = vcombine.low %v3585_v34, %v3589_v43  ;;  %v6246_v18 = vcombine.low %v3713_v35, %v3717_v44  ;;  %v6239_v27 = vcombine.high %v3705_v9, %v3709_v14  ;;  %v3534_v34 = vld [vmem:[#allocation8 + $0xb8] sm:$0xff] }
 0x4c9   :  { %5320 = vmatprep.subr.bf16.mxu1 %v6295_v40  ;;  %v6111_v40 = vcombine.high %v3577_v7, %v3581_v51  ;;  %v3658_v43 = vld [vmem:[#allocation8 + $0x498] sm:$0xff]  ;;  %v6072_v44 = vcombine.low %v3538_v23, %v3542_v36 }
 0x4ca   :  { %v3662_v35 = vld [vmem:[#allocation8 + $0x4b8] sm:$0xff] }
 0x4cb   :  { %5278 = vmatpush2.bf16.msra.mxu0 %v6166_v53  ;;  %v3702_v53 = vld [vmem:[#allocation8 + $0x5f8] sm:$0xff] }
 0x4cc   :  { %5321 = vmatpush2.bf16.msra.mxu1 %v6294_v63  ;;  %5279 = vmatprep.subr.bf16.mxu0 %v6159_v54  ;;  %v6110_v63 = vcombine.low %v3577_v7, %v3581_v51  ;;  %v6238_v54 = vcombine.low %v3705_v9, %v3709_v14  ;;  %v6233_v56 = vcombine.high %v3698_v52, %v3702_v53  ;;  %v3526_v7 = vld [vmem:[#allocation8 + $0x78] sm:$0xff] }
 0x4cd   :  { %5322 = vmatprep.subr.bf16.mxu1 %v6287_v55  ;;  %v6105_v55 = vcombine.high %v3570_v48, %v3574_v22  ;;  %v3650_v51 = vld [vmem:[#allocation8 + $0x458] sm:$0xff] }
 0x4ce   :  { %v3654_v9 = vld [vmem:[#allocation8 + $0x478] sm:$0xff] }
 0x4cf   :  { %5280 = vmatpush2.bf16.msra.mxu0 %v6158_v61  ;;  %v3690_v61 = vld [vmem:[#allocation8 + $0x598] sm:$0xff] }
 0x4d0   :  { %5323 = vmatpush2.bf16.msra.mxu1 %v6286_v62  ;;  %5281 = vmatprep.subr.bf16.mxu0 %v6151_v0  ;;  %v3694_v62 = vld [vmem:[#allocation8 + $0x5b8] sm:$0xff]  ;;  %v6232_v0 = vcombine.low %v3698_v52, %v3702_v53 }
 0x4d1   :  { %5324 = vmatprep.subr.bf16.mxu1 %v6279_v1  ;;  %v6097_v1 = vcombine.high %v3562_v57, %v3566_v59  ;;  %v6225_v6 = vcombine.high %v3690_v61, %v3694_v62  ;;  %v3518_v48 = vld [vmem:[#allocation8 + $0x38] sm:$0xff] }
 0x4d2   :  { %v3642_v22 = vld [vmem:[#allocation8 + $0x418] sm:$0xff] }
 0x4d3   :  { %5282 = vmatpush2.bf16.msra.mxu0 %v6150_v37  ;;  %v3686_v37 = vld [vmem:[#allocation8 + $0x578] sm:$0xff] }
 0x4d4   :  { %5325 = vmatpush2.bf16.msra.mxu1 %v6278_v41  ;;  %5283 = vmatprep.subr.bf16.mxu0 %v6143_v2  ;;  %v6096_v41 = vcombine.low %v3562_v57, %v3566_v59  ;;  %v6224_v2 = vcombine.low %v3690_v61, %v3694_v62  ;;  %v6217_v3 = vcombine.high %v3682_v5, %v3686_v37  ;;  %v3646_v52 = vld [vmem:[#allocation8 + $0x438] sm:$0xff] }
 0x4d5   :  { %5326 = vmatprep.subr.bf16.mxu1 %v6271_v47  ;;  %v6089_v47 = vcombine.high %v3554_v49, %v3558_v50  ;;  %v3638_v57 = vld [vmem:[#allocation8 + $0x3f8] sm:$0xff]  ;;  %v6176_v62 = vcombine.low %v3642_v22, %v3646_v52 }
 0x4d6   :  { %v3762_v59 = vld [vmem:[#allocation8 + $0x7d8] sm:$0xff] }
 0x4d7   :  { %5284 = vmatpush2.bf16.msra.mxu0 %v6142_v4  ;;  %v3678_v4 = vld [vmem:[#allocation8 + $0x538] sm:$0xff] }
 0x4d8   :  { %5327 = vmatpush2.bf16.msra.mxu1 %v6270_v19  ;;  %5285 = vmatprep.subr.bf16.mxu0 %v6135_v16  ;;  %v6088_v19 = vcombine.low %v3554_v49, %v3558_v50  ;;  %v6216_v16 = vcombine.low %v3682_v5, %v3686_v37  ;;  %v3626_v49 = vld [vmem:[#allocation8 + $0x398] sm:$0xff] }
 0x4d9   :  { %5328 = vmatprep.subr.bf16.mxu1 %v6263_v28  ;;  %v6081_v28 = vcombine.high %v3546_v21, %v3550_v11  ;;  %v3630_v50 = vld [vmem:[#allocation8 + $0x3b8] sm:$0xff] }
 0x4da   :  { %v3758_v5 = vld [vmem:[#allocation8 + $0x7b8] sm:$0xff] }
 0x4db   :  { %5286 = vmatpush2.bf16.msra.mxu0 %v6134_v32  ;;  %v6208_v32 = vcombine.low %v3674_v15, %v3678_v4 }
 0x4dc   :  { %5329 = vmatpush2.bf16.msra.mxu1 %v6262_v33  ;;  %5287 = vmatprep.subr.bf16.mxu0 %v6127_v38  ;;  %v6073_v33 = vcombine.high %v3538_v23, %v3542_v36  ;;  %v6201_v38 = vcombine.high %v3666_v30, %v3670_v31  ;;  %v3614_v23 = vld [vmem:[#allocation8 + $0x338] sm:$0xff] }
 0x4dd   :  { %5330 = vmatprep.subr.bf16.mxu1 %v6255_v42  ;;  %v3530_v42 = vld [vmem:[#allocation8 + $0x98] sm:$0xff] }
 0x4de   :  { %v6064_v14 = vcombine.low %v3530_v42, %v3534_v34  ;;  %v3738_v36 = vld [vmem:[#allocation8 + $0x718] sm:$0xff] }
 0x4df   :  { %5288 = vmatpush2.bf16.msra.mxu0 %v6126_v20  ;;  %v6200_v20 = vcombine.low %v3666_v30, %v3670_v31  ;;  %v3742_v30 = vld [vmem:[#allocation8 + $0x738] sm:$0xff] }
 0x4e0   :  { %5331 = vmatpush2.bf16.msra.mxu1 %v6254_v45  ;;  %5289 = vmatprep.subr.bf16.mxu0 %v6119_v39  ;;  %v6065_v45 = vcombine.high %v3530_v42, %v3534_v34  ;;  %v6193_v39 = vcombine.high %v3658_v43, %v3662_v35  ;;  %v3606_v42 = vld [vmem:[#allocation8 + $0x2f8] sm:$0xff] }
 0x4e1   :  { %5332 = vmatprep.subr.bf16.mxu1 %v6247_v46  ;;  %v3522_v46 = vld [vmem:[#allocation8 + $0x58] sm:$0xff] }
 0x4e2   :  { %v6056_v53 = vcombine.low %v3522_v46, %v3526_v7  ;;  %v3730_v34 = vld [vmem:[#allocation8 + $0x6d8] sm:$0xff] }
 0x4e3   :  { %5290 = vmatpush2.bf16.msra.mxu0 %v6118_v17  ;;  %v6192_v17 = vcombine.low %v3658_v43, %v3662_v35  ;;  %v3734_v43 = vld [vmem:[#allocation8 + $0x6f8] sm:$0xff] }
 0x4e4   :  { %5333 = vmatpush2.bf16.msra.mxu1 %v6246_v18  ;;  %5291 = vmatprep.subr.bf16.mxu0 %v6111_v40  ;;  %v6057_v18 = vcombine.high %v3522_v46, %v3526_v7  ;;  %v6185_v40 = vcombine.high %v3650_v51, %v3654_v9  ;;  %v3598_v46 = vld [vmem:[#allocation8 + $0x2b8] sm:$0xff] }
 0x4e5   :  { %5334 = vmatprep.subr.bf16.mxu1 %v6239_v27  ;;  %v3514_v27 = vld [vmem:[#allocation8 + $0x18] sm:$0xff] }
 0x4e6   :  { %v6048_v61 = vcombine.low %v3514_v27, %v3518_v48  ;;  %v3722_v7 = vld [vmem:[#allocation8 + $0x698] sm:$0xff] }
 0x4e7   :  { %5292 = vmatpush2.bf16.msra.mxu0 %v6110_v63  ;;  %v6184_v63 = vcombine.low %v3650_v51, %v3654_v9  ;;  %v3726_v51 = vld [vmem:[#allocation8 + $0x6b8] sm:$0xff] }
 0x4e8   :  { %5335 = vmatpush2.bf16.msra.mxu1 %v6238_v54  ;;  %5347 = vmatprep.subr.bf16.mxu0 %v6105_v55  ;;  %v6049_v54 = vcombine.high %v3514_v27, %v3518_v48  ;;  %v6177_v55 = vcombine.high %v3642_v22, %v3646_v52  ;;  %v3590_v27 = vld [vmem:[#allocation8 + $0x278] sm:$0xff] }
 0x4e9   :  { %5390 = vmatprep.subr.bf16.mxu1 %v6233_v56  ;;  %v3634_v56 = vld [vmem:[#allocation8 + $0x3d8] sm:$0xff] }
 0x4ea   :  { %5294 = vmatmul.mubr.bf16.vlgmr.msra.gmra.mxu0 %v7335_v26  ;;  %v6168_v37 = vcombine.low %v3634_v56, %v3638_v57  ;;  %v3714_v48 = vld [vmem:[#allocation8 + $0x658] sm:$0xff] }
 0x4eb   :  { %5337 = vmatmul.mubr.bf16.vlgmr.msra.gmra.mxu1 %v7337_v29  ;;  %5348 = vmatpush1.bf16.msra.mxu0 %v6104_v60  ;;  %v3766_v60 = vld [vmem:[#allocation8 + $0x7f8] sm:$0xff] }
 0x4ec   :  { %5379 = vmatprep.mubr.bf16.mxu0 %v7331_v24  ;;  %5391 = vmatpush1.bf16.msra.mxu1 %v6232_v0  ;;  %v6209_v24 = vcombine.high %v3674_v15, %v3678_v4  ;;  %v6169_v0 = vcombine.high %v3634_v56, %v3638_v57  ;;  %v3750_v15 = vld [vmem:[#allocation8 + $0x778] sm:$0xff]  ;;  %v6160_v4 = vcombine.low %v3626_v49, %v3630_v50 }
 0x4ed   :  { %5422 = vmatprep.mubr.bf16.mxu1 %v7333_v25  ;;  %5349 = vmatprep.subr.bf16.mxu0 %v6097_v1  ;;  %v6080_v25 = vcombine.low %v3546_v21, %v3550_v11  ;;  %v6297_v1 = vcombine.high %v3762_v59, %v3766_v60  ;;  %v3622_v21 = vld [vmem:[#allocation8 + $0x378] sm:$0xff] }
 0x4ee   :  { %5392 = vmatprep.subr.bf16.mxu1 %v6225_v6  ;;  %v3754_v6 = vld [vmem:[#allocation8 + $0x798] sm:$0xff] }
 0x4ef   :  { %5350 = vmatpush1.bf16.msra.mxu0 %v6096_v41  ;;  %v6296_v41 = vcombine.low %v3762_v59, %v3766_v60  ;;  %v3746_v11 = vld [vmem:[#allocation8 + $0x758] sm:$0xff] }
 0x4f0   :  { %5393 = vmatpush1.bf16.msra.mxu1 %v6224_v2  ;;  %5351 = vmatprep.subr.bf16.mxu0 %v6089_v47  ;;  %v6161_v2 = vcombine.high %v3626_v49, %v3630_v50  ;;  %v6289_v47 = vcombine.high %v3754_v6, %v3758_v5  ;;  %v3718_v22 = vld [vmem:[#allocation8 + $0x678] sm:$0xff] }
 0x4f1   :  { %5394 = vmatprep.subr.bf16.mxu1 %v6217_v3  ;;  %v3618_v3 = vld [vmem:[#allocation8 + $0x358] sm:$0xff] }
 0x4f2   :  { %v6152_v31 = vcombine.low %v3618_v3, %v3622_v21  ;;  %v3582_v56 = vld [vmem:[#allocation8 + $0x238] sm:$0xff] }
 0x4f3   :  { %5352 = vmatpush1.bf16.msra.mxu0 %v6088_v19  ;;  %v6288_v19 = vcombine.low %v3754_v6, %v3758_v5  ;;  %v3706_v57 = vld [vmem:[#allocation8 + $0x618] sm:$0xff] }
 0x4f4   :  { %5395 = vmatpush1.bf16.msra.mxu1 %v6216_v16  ;;  %5353 = vmatprep.subr.bf16.mxu0 %v6081_v28  ;;  %v6153_v16 = vcombine.high %v3618_v3, %v3622_v21  ;;  %v6281_v28 = vcombine.high %v3746_v11, %v3750_v15  ;;  %v3710_v59 = vld [vmem:[#allocation8 + $0x638] sm:$0xff] }
 0x4f5   :  { %5396 = vmatprep.subr.bf16.mxu1 %v6209_v24  ;;  %v3610_v24 = vld [vmem:[#allocation8 + $0x318] sm:$0xff]  ;;  %v6240_v49 = vcombine.low %v3706_v57, %v3710_v59 }
 0x4f6   :  { %v6144_v35 = vcombine.low %v3610_v24, %v3614_v23 }
 0x4f7   :  { %5354 = vmatpush1.bf16.msra.mxu0 %v6080_v25  ;;  %v6280_v25 = vcombine.low %v3746_v11, %v3750_v15 }
 0x4f8   :  { %5397 = vmatpush1.bf16.msra.mxu1 %v6208_v32  ;;  %5355 = vmatprep.subr.bf16.mxu0 %v6073_v33  ;;  %v6145_v32 = vcombine.high %v3610_v24, %v3614_v23  ;;  %v6273_v33 = vcombine.high %v3738_v36, %v3742_v30 }
 0x4f9   :  { %5398 = vmatprep.subr.bf16.mxu1 %v6201_v38  ;;  %v3602_v38 = vld [vmem:[#allocation8 + $0x2d8] sm:$0xff] }
 0x4fa   :  { %v6136_v9 = vcombine.low %v3602_v38, %v3606_v42 }
 0x4fb   :  { %5356 = vmatpush1.bf16.msra.mxu0 %v6072_v44  ;;  %v6272_v44 = vcombine.low %v3738_v36, %v3742_v30 }
 0x4fc   :  { %5399 = vmatpush1.bf16.msra.mxu1 %v6200_v20  ;;  %5357 = vmatprep.subr.bf16.mxu0 %v6065_v45  ;;  %v6137_v20 = vcombine.high %v3602_v38, %v3606_v42  ;;  %v6265_v45 = vcombine.high %v3730_v34, %v3734_v43 }
 0x4fd   :  { %5400 = vmatprep.subr.bf16.mxu1 %v6193_v39  ;;  %v3594_v39 = vld [vmem:[#allocation8 + $0x298] sm:$0xff] }
 0x4fe   :  { %v6128_v52 = vcombine.low %v3594_v39, %v3598_v46 }
 0x4ff   :  { %5358 = vmatpush1.bf16.msra.mxu0 %v6064_v14  ;;  %v6264_v14 = vcombine.low %v3730_v34, %v3734_v43 }
 0x500   :  { %5401 = vmatpush1.bf16.msra.mxu1 %v6192_v17  ;;  %5359 = vmatprep.subr.bf16.mxu0 %v6057_v18  ;;  %v6129_v17 = vcombine.high %v3594_v39, %v3598_v46  ;;  %v6257_v18 = vcombine.high %v3722_v7, %v3726_v51 }
 0x501   :  { %5402 = vmatprep.subr.bf16.mxu1 %v6185_v40  ;;  %v3586_v40 = vld [vmem:[#allocation8 + $0x258] sm:$0xff] }
 0x502   :  { %v6120_v60 = vcombine.low %v3586_v40, %v3590_v27 }
 0x503   :  { %5360 = vmatpush1.bf16.msra.mxu0 %v6056_v53  ;;  %v6256_v53 = vcombine.low %v3722_v7, %v3726_v51 }
 0x504   :  { %5403 = vmatpush1.bf16.msra.mxu1 %v6184_v63  ;;  %5361 = vmatprep.subr.bf16.mxu0 %v6049_v54  ;;  %v6121_v63 = vcombine.high %v3586_v40, %v3590_v27  ;;  %v6249_v54 = vcombine.high %v3714_v48, %v3718_v22 }
 0x505   :  { %5404 = vmatprep.subr.bf16.mxu1 %v6177_v55  ;;  %v3578_v55 = vld [vmem:[#allocation8 + $0x218] sm:$0xff] }
 0x507   :  { %5362 = vmatpush1.bf16.msra.mxu0 %v6048_v61  ;;  %v6248_v61 = vcombine.low %v3714_v48, %v3718_v22 }
 0x508   :  { %5405 = vmatpush1.bf16.msra.mxu1 %v6176_v62  ;;  %5363 = vmatprep.subr.bf16.mxu0 %v6169_v0  ;;  %v6113_v62 = vcombine.high %v3578_v55, %v3582_v56  ;;  %v6241_v0 = vcombine.high %v3706_v57, %v3710_v59 }
 0x509   :  { %5406 = vmatprep.subr.bf16.mxu1 %v6297_v1  ;;  %v6112_v1 = vcombine.low %v3578_v55, %v3582_v56 }
 0x50b   :  { %5364 = vmatpush2.bf16.msra.mxu0 %v6168_v37 }
 0x50c   :  { %5407 = vmatpush2.bf16.msra.mxu1 %v6296_v41  ;;  %5365 = vmatprep.subr.bf16.mxu0 %v6161_v2  ;;  %v7364_v2 = vld [vmem:[%s7415_s11] sm:$0xff]  ;;  %s7033_s11 = smov [#allocation10]  }
 0x50d   :  { %5408 = vmatprep.subr.bf16.mxu1 %v6289_v47  ;;  %v3776_v3 = vrot.slane %v7364_v2, %v7178_v10  ;;  %v3780_v30 = vrot.slane %v7364_v2, %v7187_v13  ;;  %v3784_v10 = vrot.slane %v7364_v2, %v7174_v8  ;;  %s5643_s4 = sshll.u32 %s7033_s11, 4  ;;  %s5644_s4 = int_to_ptr.vmem [resolvable:$true] %s5643_s4 }
 0x50e   :  { %s6995_s20 = scalar_lea.vmem %s5644_s4, 256  ;;  %p7000_p7 = scmp.lt.s32.totalorder %s5644_s4, %s5644_s4 }
 0x50f   :  { %5366 = vmatpush2.bf16.msra.mxu0 %v6160_v4  ;;  %p6996_p6 = scmp.ne.s32.totalorder %s5644_s4, %s6995_s20  ;;  %p7001_p8 = scmp.lt.s32.totalorder %s6995_s20, %s6995_s20 }
 0x510   :  { %5409 = vmatpush2.bf16.msra.mxu1 %v6288_v19  ;;  %5367 = vmatprep.subr.bf16.mxu0 %v6153_v16 }
 0x511   :  { %5410 = vmatprep.subr.bf16.mxu1 %v6281_v28  ;;  %p7002_p9 = por %p7001_p8, %p7000_p7 }
 0x513   :  { %5368 = vmatpush2.bf16.msra.mxu0 %v6152_v31  ;;  %p7003_p10 = pnand %p7002_p9, %p6996_p6 }
 0x514   :  { %5411 = vmatpush2.bf16.msra.mxu1 %v6280_v25  ;;  %5369 = vmatprep.subr.bf16.mxu0 %v6145_v32 }
 0x515   :  { %5412 = vmatprep.subr.bf16.mxu1 %v6273_v33 }
 0x517   :  { %5370 = vmatpush2.bf16.msra.mxu0 %v6144_v35 }
 0x518   :  { %5413 = vmatpush2.bf16.msra.mxu1 %v6272_v44  ;;  %5371 = vmatprep.subr.bf16.mxu0 %v6137_v20 }
 0x519   :  { %5414 = vmatprep.subr.bf16.mxu1 %v6265_v45 }
 0x51b   :  { %5372 = vmatpush2.bf16.msra.mxu0 %v6136_v9 }
 0x51c   :  { %5415 = vmatpush2.bf16.msra.mxu1 %v6264_v14  ;;  %5373 = vmatprep.subr.bf16.mxu0 %v6129_v17 }
 0x51d   :  { %5416 = vmatprep.subr.bf16.mxu1 %v6257_v18 }
 0x51f   :  { %5374 = vmatpush2.bf16.msra.mxu0 %v6128_v52 }
 0x520   :  { %5417 = vmatpush2.bf16.msra.mxu1 %v6256_v53  ;;  %5375 = vmatprep.subr.bf16.mxu0 %v6121_v63 }
 0x521   :  { %5418 = vmatprep.subr.bf16.mxu1 %v6249_v54 }
 0x523   :  { %5376 = vmatpush2.bf16.msra.mxu0 %v6120_v60 }
 0x524   :  { %5419 = vmatpush2.bf16.msra.mxu1 %v6248_v61  ;;  %5377 = vmatprep.subr.bf16.mxu0 %v6113_v62 }
 0x525   :  { %5420 = vmatprep.subr.bf16.mxu1 %v6241_v0 }
 0x527   :  { %5378 = vmatpush2.bf16.msra.mxu0 %v6112_v1 }
 0x528   :  { %5421 = vmatpush2.bf16.msra.mxu1 %v6240_v49 }
 0x52a   :  { %5380 = vmatmul.mubr.bf16.vlgmr.msra.gmra.mxu0 %v7335_v26  ;;  %v5123_v50 = vpop.f32.mrf.mxu0  ;;  %v5166_v5 = vpop.f32.mrf.mxu1  ;;  %v3772_v26 = vrot.slane %v7364_v2, %v7184_v12 }
 0x52b   :  { %5423 = vmatmul.mubr.bf16.vlgmr.msra.gmra.mxu1 %v7337_v29 }
 0x52c   :  { %v5125_v6 = vpop.f32.mrf.mxu0  ;;  %v5168_v41 = vpop.f32.mrf.mxu1  ;;  %v5124_v19 = vadd.f32 %v5123_v50, %v3772_v26 }
 0x52d   :  { %v5126_v29 = vadd.f32 %v5125_v6, %v3776_v3 }
 0x52e   :  { %v5127_v37 = vpop.f32.mrf.mxu0  ;;  %v5170_v21 = vpop.f32.mrf.mxu1  ;;  %v5167_v23 = vadd.f32 %v5166_v5, %v5124_v19 }
 0x52f   :  { %v5128_v15 = vadd.f32 %v5127_v37, %v3772_v26  ;;  %v5169_v28 = vadd.f32 %v5168_v41, %v5126_v29 }
 0x530   :  { %v5129_v47 = vpop.f32.mrf.mxu0  ;;  %v5172_v4 = vpop.f32.mrf.mxu1  ;;  %v5433_v32 = vrot.slane %v5167_v23, 4 }
 0x531   :  { %v5130_v11 = vadd.f32 %v5129_v47, %v3776_v3  ;;  %v5171_v24 = vadd.f32 %v5170_v21, %v5128_v15  ;;  %v5439_v31 = vrot.slane %v5169_v28, 4  ;;  %v7032_v47 = vmov 1983009808  }
 0x532   :  { %v5434_v39 = vmax.f32 %v5167_v23, %v5433_v32  ;;  %v5548_v3 = vunpack.c.l.s4 %v7032_v47 }
 0x533   :  { %v5173_v16 = vadd.f32 %v5172_v4, %v5130_v11  ;;  %v5481_v25 = vrot.slane %v5171_v24, 4  ;;  %v5440_v34 = vmax.f32 %v5169_v28, %v5439_v31 }
 0x534   :  { %v5435_v52 = vrot.slane %v5434_v39, 2  ;;  %v5549_v23 = vunpack.c.0.s8 %v5548_v3 }
 0x535   :  { %v5487_v36 = vrot.slane %v5173_v16, 4  ;;  %v5482_v43 = vmax.f32 %v5171_v24, %v5481_v25  ;;  %v5441_v17 = vrot.slane %v5440_v34, 2 }
 0x536   :  { %v5436_v49 = vmax.f32 %v5434_v39, %v5435_v52 }
 0x537   :  { %v5488_v12 = vmax.f32 %v5173_v16, %v5487_v36  ;;  %v5483_v8 = vrot.slane %v5482_v43, 2  ;;  %v5442_v59 = vmax.f32 %v5440_v34, %v5441_v17  ;;  %v7375_v34 = vsub.s32 %v5549_v23, %v7163_v58 }
 0x538   :  { %v5437_v4 = vrot.slane %v5436_v49, 1 }
 0x539   :  { %v5489_v46 = vrot.slane %v5488_v12, 2  ;;  %v5484_v60 = vmax.f32 %v5482_v43, %v5483_v8  ;;  %v5443_v41 = vrot.slane %v5442_v59, 1 }
 0x53b   :  { %v5490_v53 = vmax.f32 %v5488_v12, %v5489_v46  ;;  %v5485_v21 = vrot.slane %v5484_v60, 1  ;;  %v5444_v36 = vmax.f32 %v5442_v59, %v5443_v41 }
 0x53d   :  { %v5491_v50 = vrot.slane %v5490_v53, 1 }
 0x53f   :  { %v5492_v19 = vmax.f32 %v5490_v53, %v5491_v50 }
 0x56a   :  { %v5209_v33 = vpop.f32.mrf.mxu0  ;;  %v5252_v38 = vpop.f32.mrf.mxu1 }
 0x56b   :  { %v5210_v42 = vadd.f32 %v5209_v33, %v3780_v30 }
 0x56c   :  { %v5211_v35 = vpop.f32.mrf.mxu0  ;;  %v5254_v44 = vpop.f32.mrf.mxu1 }
 0x56d   :  { %v5253_v20 = vadd.f32 %v5252_v38, %v5210_v42  ;;  %v5212_v45 = vadd.f32 %v5211_v35, %v3784_v10 }
 0x56e   :  { %v5213_v7 = vpop.f32.mrf.mxu0  ;;  %v5256_v13 = vpop.f32.mrf.mxu1 }
 0x56f   :  { %v5445_v51 = vrot.slane %v5253_v20, 4  ;;  %v5255_v9 = vadd.f32 %v5254_v44, %v5212_v45  ;;  %v5214_v14 = vadd.f32 %v5213_v7, %v3780_v30  ;;  %v5486_v30 = vmax.f32 %v5484_v60, %v5485_v21 }
 0x570   :  { %v5215_v18 = vpop.f32.mrf.mxu0  ;;  %v5258_v63 = vpop.f32.mrf.mxu1 }
 0x571   :  { %v5446_v40 = vmax.f32 %v5253_v20, %v5445_v51  ;;  %v5451_v27 = vrot.slane %v5255_v9, 4  ;;  %v5257_v48 = vadd.f32 %v5256_v13, %v5214_v14  ;;  %v5216_v22 = vadd.f32 %v5215_v18, %v3784_v10 }
 0x572   :  { %v5438_v10 = vmax.f32 %v5436_v49, %v5437_v4  ;;  %v5579_v32 = vcombine.low %v5486_v30, %v5492_v19  ;;  %v3799_v49 = vsub.s32 7, %v7163_v58 }
 0x573   :  { %v5447_v54 = vrot.slane %v5446_v40, 2  ;;  %v5452_v55 = vmax.f32 %v5255_v9, %v5451_v27  ;;  %v5493_v56 = vrot.slane %v5257_v48, 4  ;;  %v5259_v57 = vadd.f32 %v5258_v63, %v5216_v22 }
 0x574   :  { %v5545_v42 = vcombine.low %v5438_v10, %v5444_v36  ;;  %v5587_v35 = vrot.slane %v5579_v32, %v7375_v34  ;;  %v3791_v27 = vsub.s32 5, %v7163_v58  ;;  %v3787_v22 = vsub.s32 4, %v7163_v58 }
 0x575   :  { %v5448_v61 = vmax.f32 %v5446_v40, %v5447_v54  ;;  %v5453_v62 = vrot.slane %v5452_v55, 2  ;;  %v5494_v0 = vmax.f32 %v5257_v48, %v5493_v56  ;;  %v5499_v1 = vrot.slane %v5259_v57, 4 }
 0x576   :  { %v5553_v45 = vrot.slane %v5545_v42, %v7375_v34  ;;  %v3792_v53 = vrot.slane %v7364_v2, %v3791_v27  ;;  %v3788_v54 = vrot.slane %v7364_v2, %v3787_v22  ;;  %v3800_v47 = vrot.slane %v7364_v2, %v3799_v49 }
 0x577   :  { %v5454_v6 = vmax.f32 %v5452_v55, %v5453_v62  ;;  %v5495_v5 = vrot.slane %v5494_v0, 2  ;;  %v5500_v37 = vmax.f32 %v5259_v57, %v5499_v1  ;;  %v5449_v26 = vrot.slane %v5448_v61, 1 }
 0x578   :  { %v3795_v62 = vsub.s32 6, %v7163_v58 }
 0x579   :  { %v5455_v11 = vrot.slane %v5454_v6, 1  ;;  %v5496_v29 = vmax.f32 %v5494_v0, %v5495_v5  ;;  %v5501_v15 = vrot.slane %v5500_v37, 2  ;;  %v5450_v31 = vmax.f32 %v5448_v61, %v5449_v26 }
 0x57a   :  { %v3796_v5 = vrot.slane %v7364_v2, %v3795_v62 }
 0x57b   :  { %v5456_v16 = vmax.f32 %v5454_v6, %v5455_v11  ;;  %v5497_v28 = vrot.slane %v5496_v29, 1  ;;  %v5502_v24 = vmax.f32 %v5500_v37, %v5501_v15 }
 0x57d   :  { %v5503_v25 = vrot.slane %v5502_v24, 1  ;;  %v5546_v12 = vcombine.low %v5450_v31, %v5456_v16  ;;  %v5498_v33 = vmax.f32 %v5496_v29, %v5497_v28 }
 0x57f   :  { %v5504_v38 = vmax.f32 %v5502_v24, %v5503_v25  ;;  %v5560_v44 = vrot.slane %v5546_v12, %v7375_v34 }
 0x581   :  { %v5580_v43 = vcombine.low %v5498_v33, %v5504_v38  ;;  %v5561_v46 = vcombine.low %v5553_v45, %v5560_v44 }
 0x583   :  { %v5594_v20 = vrot.slane %v5580_v43, %v7375_v34 }
 0x585   :  { %v5595_v39 = vcombine.low %v5587_v35, %v5594_v20 }
 0x587   :  { %v5617_v7 = vrot.slane %v5595_v39, 7 }
 0x589   :  { %v5619_v13 = vsel %vm5618_vm0, %v5617_v7, %v5561_v46 }
 0x58a   :  { %v5621_v51 = vsel %vm5620_vm1, %v5617_v7, %v5619_v13 }
 0x58b   :  { %v5623_v9 = vsel %vm5622_vm2, %v5617_v7, %v5621_v51 }
 0x58c   :  { %v5625_v14 = vsel %vm5624_vm3, %v5617_v7, %v5623_v9 }
 0x58d   :  { %5635 = vst [vmem:[#allocation10] sm:$0xff] %v5625_v14 }
 0x5aa   :  { %v5295_v17 = vpop.f32.mrf.mxu0 }
 0x5ab   :  { %v5338_v18 = vpop.f32.mrf.mxu1  ;;  %v5296_v60 = vadd.f32 %v5295_v17, %v3788_v54 }
 0x5ac   :  { %v5297_v8 = vpop.f32.mrf.mxu0 }
 0x5ad   :  { %v5340_v48 = vpop.f32.mrf.mxu1  ;;  %v5298_v56 = vadd.f32 %v5297_v8, %v3792_v53  ;;  %v5339_v50 = vadd.f32 %v5338_v18, %v5296_v60 }
 0x5ae   :  { %v5299_v40 = vpop.f32.mrf.mxu0 }
 0x5af   :  { %v5342_v63 = vpop.f32.mrf.mxu1  ;;  %v5300_v57 = vadd.f32 %v5299_v40, %v3788_v54  ;;  %v5341_v0 = vadd.f32 %v5340_v48, %v5298_v56  ;;  %v5457_v3 = vrot.slane %v5339_v50, 4 }
 0x5b0   :  { %v5301_v52 = vpop.f32.mrf.mxu0 }
 0x5b1   :  { %v5302_v55 = vadd.f32 %v5301_v52, %v3792_v53  ;;  %v5344_v59 = vpop.f32.mrf.mxu1  ;;  %v5343_v1 = vadd.f32 %v5342_v63, %v5300_v57  ;;  %v5463_v37 = vrot.slane %v5341_v0, 4  ;;  %v5458_v58 = vmax.f32 %v5339_v50, %v5457_v3 }
 0x5b3   :  { %v5345_v61 = vadd.f32 %v5344_v59, %v5302_v55  ;;  %v5505_v41 = vrot.slane %v5343_v1, 4  ;;  %v5464_v15 = vmax.f32 %v5341_v0, %v5463_v37  ;;  %v5459_v35 = vrot.slane %v5458_v58, 2 }
 0x5b5   :  { %v5511_v6 = vrot.slane %v5345_v61, 4  ;;  %v5506_v4 = vmax.f32 %v5343_v1, %v5505_v41  ;;  %v5465_v32 = vrot.slane %v5464_v15, 2  ;;  %v5460_v18 = vmax.f32 %v5458_v58, %v5459_v35 }
 0x5b7   :  { %v5512_v21 = vmax.f32 %v5345_v61, %v5511_v6  ;;  %v5507_v2 = vrot.slane %v5506_v4, 2  ;;  %v5466_v13 = vmax.f32 %v5464_v15, %v5465_v32  ;;  %v5461_v57 = vrot.slane %v5460_v18, 1 }
 0x5b9   :  { %v5513_v23 = vrot.slane %v5512_v21, 2  ;;  %v5508_v51 = vmax.f32 %v5506_v4, %v5507_v2  ;;  %v5467_v52 = vrot.slane %v5466_v13, 1  ;;  %v5462_v6 = vmax.f32 %v5460_v18, %v5461_v57 }
 0x5bb   :  { %v5514_v44 = vmax.f32 %v5512_v21, %v5513_v23  ;;  %v5509_v53 = vrot.slane %v5508_v51, 1  ;;  %v5468_v0 = vmax.f32 %v5466_v13, %v5467_v52 }
 0x5bd   :  { %v5515_v40 = vrot.slane %v5514_v44, 1  ;;  %v5510_v1 = vmax.f32 %v5508_v51, %v5509_v53  ;;  %v5562_v3 = vcombine.low %v5462_v6, %v5468_v0 }
 0x5bf   :  { %v5516_v59 = vmax.f32 %v5514_v44, %v5515_v40  ;;  %v5570_v15 = vrot.slane %v5562_v3, %v7375_v34 }
 0x5ea   :  { %v5381_v26 = vpop.f32.mrf.mxu0 }
 0x5eb   :  { %v5382_v11 = vadd.f32 %v5381_v26, %v3796_v5  ;;  %v5424_v29 = vpop.f32.mrf.mxu1 }
 0x5ec   :  { %v5383_v19 = vpop.f32.mrf.mxu0 }
 0x5ed   :  { %v5425_v16 = vadd.f32 %v5424_v29, %v5382_v11  ;;  %v5384_v28 = vadd.f32 %v5383_v19, %v3800_v47  ;;  %v5426_v24 = vpop.f32.mrf.mxu1 }
 0x5ee   :  { %v5385_v36 = vpop.f32.mrf.mxu0 }
 0x5ef   :  { %v5469_v30 = vrot.slane %v5425_v16, 4  ;;  %v5427_v31 = vadd.f32 %v5426_v24, %v5384_v28  ;;  %v5386_v25 = vadd.f32 %v5385_v36, %v3796_v5  ;;  %v5428_v10 = vpop.f32.mrf.mxu1  ;;  %v5596_v5 = vcombine.low %v5510_v1, %v5516_v59 }
 0x5f0   :  { %v5387_v12 = vpop.f32.mrf.mxu0 }
 0x5f1   :  { %v5470_v33 = vmax.f32 %v5425_v16, %v5469_v30  ;;  %v5475_v38 = vrot.slane %v5427_v31, 4  ;;  %v5429_v42 = vadd.f32 %v5428_v10, %v5386_v25  ;;  %v5388_v43 = vadd.f32 %v5387_v12, %v3800_v47  ;;  %v5430_v20 = vpop.f32.mrf.mxu1 }
 0x5f2   :  { %v5604_v26 = vrot.slane %v5596_v5, %v7375_v34 }
 0x5f3   :  { %v5471_v45 = vrot.slane %v5470_v33, 2  ;;  %v5476_v39 = vmax.f32 %v5427_v31, %v5475_v38  ;;  %v5517_v46 = vrot.slane %v5429_v42, 4  ;;  %v5431_v7 = vadd.f32 %v5430_v20, %v5388_v43 }
 0x5f5   :  { %v5472_v9 = vmax.f32 %v5470_v33, %v5471_v45  ;;  %v5477_v14 = vrot.slane %v5476_v39, 2  ;;  %v5518_v17 = vmax.f32 %v5429_v42, %v5517_v46  ;;  %v5523_v8 = vrot.slane %v5431_v7, 4 }
 0x5f7   :  { %v5478_v27 = vmax.f32 %v5476_v39, %v5477_v14  ;;  %v5519_v48 = vrot.slane %v5518_v17, 2  ;;  %v5524_v22 = vmax.f32 %v5431_v7, %v5523_v8  ;;  %v5473_v63 = vrot.slane %v5472_v9, 1 }
 0x5f9   :  { %v5479_v54 = vrot.slane %v5478_v27, 1  ;;  %v5520_v55 = vmax.f32 %v5518_v17, %v5519_v48  ;;  %v5525_v56 = vrot.slane %v5524_v22, 2  ;;  %v5474_v49 = vmax.f32 %v5472_v9, %v5473_v63 }
 0x5fb   :  { %v5480_v60 = vmax.f32 %v5478_v27, %v5479_v54  ;;  %v5521_v61 = vrot.slane %v5520_v55, 1  ;;  %v5526_v62 = vmax.f32 %v5524_v22, %v5525_v56 }
 0x5fd   :  { %v5527_v50 = vrot.slane %v5526_v62, 1  ;;  %v5563_v37 = vcombine.low %v5474_v49, %v5480_v60  ;;  %v5522_v41 = vmax.f32 %v5520_v55, %v5521_v61 }
 0x5ff   :  { %v5528_v47 = vmax.f32 %v5526_v62, %v5527_v50  ;;  %v5577_v11 = vrot.slane %v5563_v37, %v7375_v34 }
 0x601   :  { %v5597_v21 = vcombine.low %v5522_v41, %v5528_v47  ;;  %v5578_v19 = vcombine.low %v5570_v15, %v5577_v11 }
 0x603   :  { %v5611_v29 = vrot.slane %v5597_v21, %v7375_v34 }
 0x605   :  { %v5612_v4 = vcombine.low %v5604_v26, %v5611_v29 }
 0x607   :  { %v5628_v16 = vrot.slane %v5612_v4, 7 }
 0x609   :  { %v5629_v28 = vsel %vm5618_vm0, %v5628_v16, %v5578_v19 }
 0x60a   :  { %v5630_v24 = vsel %vm5620_vm1, %v5628_v16, %v5629_v28 }
 0x60b   :  { %v5631_v58 = vsel %vm5622_vm2, %v5628_v16, %v5630_v24 }
 0x60c   :  { %v5632_v23 = vsel %vm5624_vm3, %v5628_v16, %v5631_v58 }
 0x60d   :  { %5636 = vst [vmem:[#allocation10 + $0x8] sm:$0xff] %v5632_v23 }
 0x60e   :  { %7006 = shalt.err (!%p7003_p10)
}
 0x60f   :  { %5646 = dma.vmem_to_hbm [thread:$0]  %s5644_s4, 256, %s7416_s12, [#allocation4]  }
 0x610   :  { %7021 = dma.done.wait [#allocation4], 256  }
 0x611   :  { %7022 = vsyncadd [#allocation4], 4294967040 }
 0x612   :  { %5650 = vsyncpa [#allocation3], 1 }
 0x613   :  { %5651 = vsyncpa [#allocation6], 1 }
 0x614   :  { %5652 = vsyncpa [#allocation9], 1 }
 0x615   :  { %5653 = vsyncpa [#allocation4], 1 }

</bundles_post_ra>
